<compile_context>
chip_gen: v7x
topology: tpu7x:2x2x1
jax: 0.10.0
libtpu: 0.0.40
codegen_flags: <defaults>
</compile_context>

<pallas_src>
from functools import partial

import numpy as np
import jax
import jax.numpy as jnp
from jax.experimental import pallas as pl
from jax.experimental.pallas import tpu as pltpu


_VMEM_LIMIT = 48 * 1024 * 1024   # safe on v5e/v6e (128 MiB) and v7x (64 MiB)


def _auto_rows(h, w, t, hidden, budget_bytes=4 << 20):
    """Largest divisor of h whose dominant (t, rows, w, 2*hidden) f32 tile fits the budget."""
    per_row = max(1, t * w * (2 * hidden) * 4)
    max_rows = max(1, budget_bytes // per_row)
    best = 1
    for r in range(1, h + 1):
        if h % r == 0 and r <= max_rows:
            best = r
    return best


# --------------------------------------------------------------------------------------
# Kernel 1: LayerNorm (WithBias) + project_in (K-stacked temporal conv) + pooled-x1 accum
# --------------------------------------------------------------------------------------
def _ln_pin_kernel(x_ref, lnw_ref, lnb_ref, w_ref, b_ref, y_ref, pool_ref, *,
                   t, rows, w, cin, cout2, hidden):
    ri = pl.program_id(1)                                      # row-tile index (last axis)

    x = x_ref[0]                                               # (t, rows, w, cin) f32

    # WithBias LayerNorm over the channel (lane) axis; statistics kept in f32
    mu = jnp.mean(x, axis=-1, keepdims=True)
    var = jnp.mean((x - mu) ** 2, axis=-1, keepdims=True)      # unbiased=False
    xn = (x - mu) * jax.lax.rsqrt(var + 1e-5) * lnw_ref[0] + lnb_ref[0]

    # project_in temporal conv as ONE K-stacked matmul: columns [x(t-1) | x(t) | x(t+1)]
    zf = jnp.zeros((1, rows, w, cin), xn.dtype)
    xm1 = jnp.concatenate([zf, xn[:-1]], axis=0)               # frame t-1 (zero at t=0)
    xp1 = jnp.concatenate([xn[1:], zf], axis=0)                # frame t+1 (zero at t=T-1)
    stacked = jnp.concatenate([xm1, xn, xp1], axis=-1)
    stacked = stacked.reshape(t * rows * w, 3 * cin).astype(w_ref.dtype)

    y = jnp.dot(stacked, w_ref[...], preferred_element_type=jnp.float32) + b_ref[0]
    y = y.reshape(t, rows, w, cout2)                           # f32
    y_ref[0] = y.astype(y_ref.dtype)

    # partial global-average-pool of x1 (first `hidden` channels), accumulated over tiles
    part = jnp.sum(y[..., :hidden], axis=(1, 2))               # (t, hidden) f32

    @pl.when(ri == 0)
    def _():
        pool_ref[0] = jnp.zeros_like(pool_ref[0])

    pool_ref[0] += part


def ln_project_in(x_cl, ln_w, ln_b, w_cat, b_in, hidden, rows, act_dtype):
    b, t, h, w, c = x_cl.shape
    cout2 = w_cat.shape[1]
    n_tiles = h // rows
    kern = partial(_ln_pin_kernel, t=t, rows=rows, w=w, cin=c, cout2=cout2, hidden=hidden)
    return pl.pallas_call(
        kern,
        out_shape=(jax.ShapeDtypeStruct((b, t, h, w, cout2), act_dtype),
                   jax.ShapeDtypeStruct((b, t, hidden), jnp.float32)),
        grid_spec=pltpu.PrefetchScalarGridSpec(
            num_scalar_prefetch=0,
            grid=(b, n_tiles),
            in_specs=[
                pl.BlockSpec((1, t, rows, w, c), lambda bi, ri: (bi, 0, ri, 0, 0)),
                pl.BlockSpec((1, c), lambda bi, ri: (0, 0)),
                pl.BlockSpec((1, c), lambda bi, ri: (0, 0)),
                pl.BlockSpec((3 * c, cout2), lambda bi, ri: (0, 0)),
                pl.BlockSpec((1, cout2), lambda bi, ri: (0, 0)),
            ],
            out_specs=[
                pl.BlockSpec((1, t, rows, w, cout2), lambda bi, ri: (bi, 0, ri, 0, 0)),
                pl.BlockSpec((1, t, hidden), lambda bi, ri: (bi, 0, 0)),     # accumulator
            ],
        ),
        compiler_params=pltpu.CompilerParams(
            dimension_semantics=("parallel", "arbitrary"),
            vmem_limit_bytes=_VMEM_LIMIT),
    )(x_cl, ln_w.reshape(1, c), ln_b.reshape(1, c), w_cat, b_in.reshape(1, cout2))


# --------------------------------------------------------------------------------------
# Kernel 2 (fused): dynamic depthwise 3x3 conv + x1*x2 gate + project_out + residual add
# --------------------------------------------------------------------------------------
def _dwgate_pout_kernel(y_ref, top_ref, bot_ref, dwk_ref, bdw_ref, w_ref, b_ref,
                        idn_ref, o_ref, *, t, rows, w, hidden, cout):
    yv = y_ref[0]                                              # (t, rows, w, 2*hidden)
    x1 = yv[..., :hidden].astype(jnp.float32)
    x2 = yv[..., hidden:].astype(jnp.float32)
    top = top_ref[0][:, 0].astype(jnp.float32)                 # (t, w, hidden) row above
    bot = bot_ref[0][:, 0].astype(jnp.float32)                 # (t, w, hidden) row below
    dwk = dwk_ref[0]                                           # (t, 9, hidden) f32

    # h-halo from neighbour rows (zeros at the frame border), w-halo = zero columns
    xh = jnp.concatenate([top[:, None], x1, bot[:, None]], axis=1)   # (t, rows+2, w, hid)
    zc = jnp.zeros((t, rows + 2, 1, hidden), jnp.float32)
    xpad = jnp.concatenate([zc, xh, zc], axis=2)                     # (t, rows+2, w+2, hid)

    # dynamic depthwise 3x3 conv; 9-tap accumulator stays register/VMEM-tile resident
    acc = jnp.zeros((t, rows, w, hidden), jnp.float32) + bdw_ref[0]
    for ky in range(3):
        for kx in range(3):
            k = ky * 3 + kx
            tap = dwk[:, k, :][:, None, None, :]                     # (t, 1, 1, hidden)
            acc = acc + xpad[:, ky:ky + rows, kx:kx + w, :] * tap    # 4-D slices, no reshape

    g = acc * x2                                                     # gate: dwconv(x1) * x2

    # project_out temporal conv as ONE K-stacked matmul, then residual add (g never hits HBM)
    zf = jnp.zeros((1, rows, w, hidden), g.dtype)
    gm1 = jnp.concatenate([zf, g[:-1]], axis=0)
    gp1 = jnp.concatenate([g[1:], zf], axis=0)
    stacked = jnp.concatenate([gm1, g, gp1], axis=-1)
    stacked = stacked.reshape(t * rows * w, 3 * hidden).astype(w_ref.dtype)

    z = jnp.dot(stacked, w_ref[...], preferred_element_type=jnp.float32) + b_ref[0]
    o_ref[0] = (z.reshape(t, rows, w, cout) + idn_ref[0]).astype(o_ref.dtype)


def dwgate_project_out(y, top_halo, bot_halo, dwk, dw_bias, w_cat, b_out, identity,
                       hidden, rows):
    b, t, h, w, cout2 = y.shape
    c = identity.shape[-1]
    n_tiles = h // rows
    kern = partial(_dwgate_pout_kernel, t=t, rows=rows, w=w, hidden=hidden, cout=c)
    return pl.pallas_call(
        kern,
        out_shape=jax.ShapeDtypeStruct((b, t, h, w, c), jnp.float32),
        grid_spec=pltpu.PrefetchScalarGridSpec(
            num_scalar_prefetch=0,
            grid=(b, n_tiles),
            in_specs=[
                pl.BlockSpec((1, t, rows, w, cout2), lambda bi, ri: (bi, 0, ri, 0, 0)),
                pl.BlockSpec((1, t, 1, w, hidden), lambda bi, ri: (bi, 0, ri, 0, 0)),
                pl.BlockSpec((1, t, 1, w, hidden), lambda bi, ri: (bi, 0, ri, 0, 0)),
                pl.BlockSpec((1, t, 9, hidden), lambda bi, ri: (bi, 0, 0, 0)),
                pl.BlockSpec((1, hidden), lambda bi, ri: (0, 0)),
                pl.BlockSpec((3 * hidden, c), lambda bi, ri: (0, 0)),
                pl.BlockSpec((1, c), lambda bi, ri: (0, 0)),
                pl.BlockSpec((1, t, rows, w, c), lambda bi, ri: (bi, 0, ri, 0, 0)),
            ],
            out_specs=pl.BlockSpec((1, t, rows, w, c), lambda bi, ri: (bi, 0, ri, 0, 0)),
        ),
        compiler_params=pltpu.CompilerParams(
            dimension_semantics=("parallel", "parallel"),
            vmem_limit_bytes=_VMEM_LIMIT),
    )(y, top_halo, bot_halo, dwk, dw_bias.reshape(1, hidden), w_cat,
      b_out.reshape(1, c), identity)


# --------------------------------------------------------------------------------------
# Full TransformerBlock forward
# --------------------------------------------------------------------------------------
def transformer_block_forward(x, params, *, rows_per_block=None, act_dtype=jnp.float32):
    """x: (b, t, c, h, w) float32 (PyTorch layout). Returns same shape, float32."""
    b, t, c, h, w = x.shape
    P = h * w
    hidden = params['w_in'].shape[0] // 2
    x = x.astype(jnp.float32)

    rows = rows_per_block or _auto_rows(h, w, t, hidden)
    assert h % rows == 0, "rows_per_block must divide h"
    n_tiles = h // rows

    # channel-last view; also serves as the residual
    x_cl = jnp.transpose(x, (0, 1, 3, 4, 2))                            # (b, t, h, w, c)

    # temporal-tap weights stacked along the K dim: rows ordered [tap0 | tap1 | tap2]
    w_in_cat = jnp.transpose(params['w_in'], (2, 1, 0)).reshape(3 * c, 2 * hidden)
    w_out_cat = jnp.transpose(params['w_out'], (2, 1, 0)).reshape(3 * hidden, c)
    w_in_cat = w_in_cat.astype(act_dtype)
    w_out_cat = w_out_cat.astype(act_dtype)

    # LayerNorm + project_in (+ pooled-x1 accumulation across row tiles), one pallas_call
    y, pool_sum = ln_project_in(x_cl, params['ln_w'], params['ln_b'],
                                w_in_cat, params['b_in'], hidden, rows, act_dtype)
    pooled = pool_sum * (1.0 / P)                                        # (b, t, hidden) f32

    # dynamic depthwise-kernel generation, batched over all b*t samples (tiny matmuls)
    bn_scale = 1.0 / np.sqrt(1.0 + 1e-5)
    zt = jnp.maximum((pooled.reshape(b * t, hidden) @ params['dw_w1']
                      + params['dw_b1']) * bn_scale, 0.0)                # (b*t, H//r)
    w2r = jnp.transpose(params['dw_w2'], (1, 0, 2)).reshape(params['dw_w2'].shape[1],
                                                            9 * hidden)
    dwk = ((zt @ w2r).reshape(b, t, 9, hidden)
           + params['dw_b2'][None, None, :, :]).astype(jnp.float32)     # (b, t, 9, H)

    # thin h-halo rows of x1 for each row tile (strided slice; zeros at the frame border)
    zrow = jnp.zeros((b, t, 1, w, hidden), y.dtype)
    if n_tiles > 1:
        th = y[:, :, rows - 1:h - 1:rows, :, :hidden]                   # rows above tiles 1..n-1
        bh = y[:, :, rows::rows, :, :hidden]                            # rows below tiles 0..n-2
        top_halo = jnp.concatenate([zrow, th], axis=2)                  # (b, t, n_tiles, w, H)
        bot_halo = jnp.concatenate([bh, zrow], axis=2)
    else:
        top_halo = zrow
        bot_halo = zrow

    # dwconv + gate + project_out + residual, fused (g never goes to HBM)
    out_cl = dwgate_project_out(y, top_halo, bot_halo, dwk, params['dw_bias'],
                                w_out_cat, params['b_out'], x_cl, hidden, rows)

    return jnp.transpose(out_cl, (0, 1, 4, 2, 3))                        # (b, t, c, h, w)


# --------------------------------------------------------------------------------------
# Deterministic synthetic parameters (shapes implied by the module __init__)
# --------------------------------------------------------------------------------------
def init_params(key, dim, ffn_expansion_factor, reduction=4):
    hidden = int(dim * ffn_expansion_factor)
    ks = jax.random.split(key, 10)
    nrm = lambda k, shape, s=0.1: s * jax.random.normal(k, shape, jnp.float32)
    return {
        'ln_w': 1.0 + nrm(ks[0], (dim,)),                 # LayerNorm weight
        'ln_b': nrm(ks[1], (dim,)),                       # LayerNorm bias
        'w_in': nrm(ks[2], (hidden * 2, dim, 3)),         # Conv3d (Cout, Cin, kt) squeezed
        'b_in': nrm(ks[3], (hidden * 2,)),
        'w_out': nrm(ks[4], (dim, hidden, 3)),
        'b_out': nrm(ks[5], (dim,)),
        'dw_w1': nrm(ks[6], (hidden, hidden // reduction)),        # pooled MLP layer 1
        'dw_b1': nrm(ks[7], (hidden // reduction,)),
        'dw_w2': nrm(ks[8], (9, hidden // reduction, hidden)),     # per-tap layer 2
        'dw_b2': nrm(ks[9], (9, hidden)),
        'dw_bias': jnp.zeros((hidden,), jnp.float32),              # static dw-conv bias
    }


# --------------------------------------------------------------------------------------
# Pure-JAX reference (same math) for a numerical sanity check of the Pallas kernels
# --------------------------------------------------------------------------------------
def reference_forward(x, params):
    b, t, c, h, w = x.shape
    hidden = params['w_in'].shape[0] // 2
    xcl = jnp.transpose(x, (0, 1, 3, 4, 2)).astype(jnp.float32)          # (b, t, h, w, c)
    mu = jnp.mean(xcl, axis=-1, keepdims=True)
    var = jnp.mean((xcl - mu) ** 2, axis=-1, keepdims=True)
    xn = (xcl - mu) / jnp.sqrt(var + 1e-5) * params['ln_w'] + params['ln_b']

    def tconv(xv, wgt, bias):
        xp = jnp.pad(xv, ((0, 0), (1, 1), (0, 0), (0, 0), (0, 0)))
        out = 0.0
        for k in range(3):
            out = out + jnp.einsum('bthwc,dc->bthwd', xp[:, k:k + t], wgt[:, :, k])
        return out + bias

    y = tconv(xn, params['w_in'], params['b_in'])
    x1, x2 = y[..., :hidden], y[..., hidden:]
    pooled = jnp.mean(x1, axis=(2, 3))
    z = jnp.maximum((pooled @ params['dw_w1'] + params['dw_b1']) / np.sqrt(1 + 1e-5), 0.0)
    dw = jnp.einsum('btr,krd->btkd', z, params['dw_w2']) + params['dw_b2']
    x1p = jnp.pad(x1, ((0, 0), (0, 0), (1, 1), (1, 1), (0, 0)))
    conv = 0.0
    for k in range(9):
        ky, kx = divmod(k, 3)
        conv = conv + x1p[:, :, ky:ky + h, kx:kx + w, :] * dw[:, :, k][:, :, None, None, :]
    g = (conv + params['dw_bias']) * x2
    out = tconv(g, params['w_out'], params['b_out']) + xcl
    return jnp.transpose(out, (0, 1, 4, 2, 3))


if __name__ == "__main__":
    b, t, dim, h, w = 2, 4, 8, 8, 8
    ffn_expansion_factor = 2

    key = jax.random.PRNGKey(0)
    kx, kp = jax.random.split(key)
    x = jax.random.normal(kx, (b, t, dim, h, w), jnp.float32)
    params = init_params(kp, dim, ffn_expansion_factor)

    ref = reference_forward(x, params)

    # f32 path (bit-faithful to the module), 2 row tiles so halo + pool accumulation run
    fwd = jax.jit(partial(transformer_block_forward, rows_per_block=4))
    out = jax.block_until_ready(fwd(x, params))
    np.testing.assert_allclose(np.asarray(out), np.asarray(ref), rtol=2e-3, atol=2e-3)

    # bf16 activation path (halves HBM traffic for y and the MXU operands); loose check
    fwd_bf16 = jax.jit(partial(transformer_block_forward, rows_per_block=4,
                               act_dtype=jnp.bfloat16))
    out_bf16 = jax.block_until_ready(fwd_bf16(x, params))
    assert float(jnp.max(jnp.abs(out_bf16 - ref))) < 1e-1

    print("KERNEL_OK")
</pallas_src>

<mosaic_0001>
module attributes {stable_mosaic.version = 11 : i64} {
  func.func @_ln_pin_kernel(%arg0: i32, %arg1: i32, %arg2: memref<1x4x4x8x8xf32, #tpu.memory_space<vmem>>, %arg3: memref<1x8xf32, #tpu.memory_space<vmem>>, %arg4: memref<1x8xf32, #tpu.memory_space<vmem>>, %arg5: memref<24x32xf32, #tpu.memory_space<vmem>>, %arg6: memref<1x32xf32, #tpu.memory_space<vmem>>, %arg7: memref<1x4x4x8x32xf32, #tpu.memory_space<vmem>>, %arg8: memref<1x4x16xf32, #tpu.memory_space<vmem>>) attributes {dimension_semantics = [#tpu.dimension_semantics<parallel>, #tpu.dimension_semantics<arbitrary>], iteration_bounds = array<i64: 2, 2>, scalar_prefetch = 0 : i64, scratch_operands = 0 : i64, tpu.core_type = #tpu.core_type<tc>, window_params = [{transform_indices = @transform_0, window_bounds = array<i64: 1, 4, 4, 8, 8>}, {pipeline_mode = #tpu.pipeline_mode<synchronous>, transform_indices = @transform_1, window_bounds = array<i64: 1, 8>}, {pipeline_mode = #tpu.pipeline_mode<synchronous>, transform_indices = @transform_2, window_bounds = array<i64: 1, 8>}, {pipeline_mode = #tpu.pipeline_mode<synchronous>, transform_indices = @transform_3, window_bounds = array<i64: 24, 32>}, {pipeline_mode = #tpu.pipeline_mode<synchronous>, transform_indices = @transform_4, window_bounds = array<i64: 1, 32>}, {transform_indices = @transform_5, window_bounds = array<i64: 1, 4, 4, 8, 32>}, {transform_indices = @transform_6, window_bounds = array<i64: 1, 4, 16>}]} {
    %c0 = arith.constant 0 : index
    %c0_0 = arith.constant 0 : index
    %c0_1 = arith.constant 0 : index
    %c0_2 = arith.constant 0 : index
    %c0_3 = arith.constant 0 : index
    %0 = vector.load %arg2[%c0, %c0_0, %c0_1, %c0_2, %c0_3] : memref<1x4x4x8x8xf32, #tpu.memory_space<vmem>>, vector<1x4x4x8x8xf32>
    %1 = vector.shape_cast %0 : vector<1x4x4x8x8xf32> to vector<4x4x8x8xf32>
    %cst = arith.constant dense<0.000000e+00> : vector<4x4x8xf32>
    %2 = vector.multi_reduction <add>, %1, %cst [3] : vector<4x4x8x8xf32> to vector<4x4x8xf32>
    %3 = vector.shape_cast %2 : vector<4x4x8xf32> to vector<4x4x8x1xf32>
    %cst_4 = arith.constant 8.000000e+00 : f32
    %4 = vector.broadcast %cst_4 : f32 to vector<4x4x8x1xf32>
    %5 = arith.divf %3, %4 : vector<4x4x8x1xf32>
    %6 = vector.broadcast %5 : vector<4x4x8x1xf32> to vector<4x4x8x8xf32>
    %7 = arith.subf %1, %6 : vector<4x4x8x8xf32>
    %8 = arith.mulf %7, %7 : vector<4x4x8x8xf32>
    %cst_5 = arith.constant dense<0.000000e+00> : vector<4x4x8xf32>
    %9 = vector.multi_reduction <add>, %8, %cst_5 [3] : vector<4x4x8x8xf32> to vector<4x4x8xf32>
    %10 = vector.shape_cast %9 : vector<4x4x8xf32> to vector<4x4x8x1xf32>
    %cst_6 = arith.constant 8.000000e+00 : f32
    %11 = vector.broadcast %cst_6 : f32 to vector<4x4x8x1xf32>
    %12 = arith.divf %10, %11 : vector<4x4x8x1xf32>
    %13 = vector.broadcast %5 : vector<4x4x8x1xf32> to vector<4x4x8x8xf32>
    %14 = arith.subf %1, %13 : vector<4x4x8x8xf32>
    %cst_7 = arith.constant 9.99999974E-6 : f32
    %15 = vector.broadcast %cst_7 : f32 to vector<4x4x8x1xf32>
    %16 = arith.addf %12, %15 : vector<4x4x8x1xf32>
    %17 = math.rsqrt %16 : vector<4x4x8x1xf32>
    %18 = vector.broadcast %17 : vector<4x4x8x1xf32> to vector<4x4x8x8xf32>
    %19 = arith.mulf %14, %18 : vector<4x4x8x8xf32>
    %c0_8 = arith.constant 0 : index
    %c0_9 = arith.constant 0 : index
    %20 = vector.load %arg3[%c0_8, %c0_9] : memref<1x8xf32, #tpu.memory_space<vmem>>, vector<1x8xf32>
    %21 = vector.shape_cast %20 : vector<1x8xf32> to vector<8xf32>
    %22 = vector.shape_cast %21 : vector<8xf32> to vector<1x1x1x8xf32>
    %23 = vector.broadcast %22 : vector<1x1x1x8xf32> to vector<4x4x8x8xf32>
    %24 = arith.mulf %19, %23 : vector<4x4x8x8xf32>
    %c0_10 = arith.constant 0 : index
    %c0_11 = arith.constant 0 : index
    %25 = vector.load %arg4[%c0_10, %c0_11] : memref<1x8xf32, #tpu.memory_space<vmem>>, vector<1x8xf32>
    %26 = vector.shape_cast %25 : vector<1x8xf32> to vector<8xf32>
    %27 = vector.shape_cast %26 : vector<8xf32> to vector<1x1x1x8xf32>
    %28 = vector.broadcast %27 : vector<1x1x1x8xf32> to vector<4x4x8x8xf32>
    %29 = arith.addf %24, %28 : vector<4x4x8x8xf32>
    %cst_12 = arith.constant 0.000000e+00 : f32
    %30 = vector.broadcast %cst_12 : f32 to vector<1x4x8x8xf32>
    %31 = vector.extract_strided_slice %29 {offsets = [0, 0, 0, 0], sizes = [3, 4, 8, 8], strides = [1, 1, 1, 1]} : vector<4x4x8x8xf32> to vector<3x4x8x8xf32>
    %32 = tpu.concatenate %30, %31 in 0 : vector<1x4x8x8xf32>, vector<3x4x8x8xf32> -> vector<4x4x8x8xf32>
    %33 = vector.extract_strided_slice %29 {offsets = [1, 0, 0, 0], sizes = [3, 4, 8, 8], strides = [1, 1, 1, 1]} : vector<4x4x8x8xf32> to vector<3x4x8x8xf32>
    %34 = tpu.concatenate %33, %30 in 0 : vector<3x4x8x8xf32>, vector<1x4x8x8xf32> -> vector<4x4x8x8xf32>
    %35 = tpu.concatenate %32, %29, %34 in 3 : vector<4x4x8x8xf32>, vector<4x4x8x8xf32>, vector<4x4x8x8xf32> -> vector<4x4x8x24xf32>
    %36 = vector.shape_cast %35 : vector<4x4x8x24xf32> to vector<128x24xf32>
    %c0_13 = arith.constant 0 : index
    %c0_14 = arith.constant 0 : index
    %37 = vector.load %arg5[%c0_13, %c0_14] : memref<24x32xf32, #tpu.memory_space<vmem>>, vector<24x32xf32>
    %cst_15 = arith.constant dense<0.000000e+00> : vector<128x32xf32>
    %38 = tpu.matmul %36, %37, %cst_15 {dimension_numbers = #tpu.dot_dimension_numbers<[1], [0], [0], [1], [0, 0, 1, 1], [], []>} : vector<128x24xf32>, vector<24x32xf32>, vector<128x32xf32> -> vector<128x32xf32>
    %c0_16 = arith.constant 0 : index
    %c0_17 = arith.constant 0 : index
    %39 = vector.load %arg6[%c0_16, %c0_17] : memref<1x32xf32, #tpu.memory_space<vmem>>, vector<1x32xf32>
    %40 = vector.shape_cast %39 : vector<1x32xf32> to vector<32xf32>
    %41 = vector.shape_cast %40 : vector<32xf32> to vector<1x32xf32>
    %42 = vector.broadcast %41 : vector<1x32xf32> to vector<128x32xf32>
    %43 = arith.addf %38, %42 : vector<128x32xf32>
    %44 = vector.shape_cast %43 : vector<128x32xf32> to vector<4x4x8x32xf32>
    %c0_18 = arith.constant 0 : index
    %c0_19 = arith.constant 0 : index
    %c0_20 = arith.constant 0 : index
    %c0_21 = arith.constant 0 : index
    %c0_22 = arith.constant 0 : index
    %45 = vector.load %arg7[%c0_18, %c0_19, %c0_20, %c0_21, %c0_22] : memref<1x4x4x8x32xf32, #tpu.memory_space<vmem>>, vector<1x4x4x8x32xf32>
    %46 = vector.shape_cast %45 : vector<1x4x4x8x32xf32> to vector<4x4x8x32xf32>
    %47 = vector.shape_cast %44 : vector<4x4x8x32xf32> to vector<1x4x4x8x32xf32>
    tpu.vector_store %arg7[%c0_18, %c0_19, %c0_20, %c0_21, %c0_22], %47 {strides = array<i32>} : memref<1x4x4x8x32xf32, #tpu.memory_space<vmem>>, vector<1x4x4x8x32xf32>,
    %48 = vector.extract_strided_slice %44 {offsets = [0, 0, 0, 0], sizes = [4, 4, 8, 16], strides = [1, 1, 1, 1]} : vector<4x4x8x32xf32> to vector<4x4x8x16xf32>
    %cst_23 = arith.constant dense<0.000000e+00> : vector<4x16xf32>
    %49 = vector.multi_reduction <add>, %48, %cst_23 [1, 2] : vector<4x4x8x16xf32> to vector<4x16xf32>
    %c0_i32 = arith.constant 0 : i32
    %50 = arith.cmpi eq, %arg1, %c0_i32 : i32
    %51 = arith.extui %50 : i1 to i32
    %c0_i32_24 = arith.constant 0 : i32
    %52 = arith.cmpi ne, %51, %c0_i32_24 : i32
    scf.if %52 {
      %cst_31 = arith.constant 0.000000e+00 : f32
      %59 = vector.broadcast %cst_31 : f32 to vector<4x16xf32>
      %c0_32 = arith.constant 0 : index
      %c0_33 = arith.constant 0 : index
      %c0_34 = arith.constant 0 : index
      %60 = vector.load %arg8[%c0_32, %c0_33, %c0_34] : memref<1x4x16xf32, #tpu.memory_space<vmem>>, vector<1x4x16xf32>
      %61 = vector.shape_cast %60 : vector<1x4x16xf32> to vector<4x16xf32>
      %62 = vector.shape_cast %59 : vector<4x16xf32> to vector<1x4x16xf32>
      tpu.vector_store %arg8[%c0_32, %c0_33, %c0_34], %62 {strides = array<i32>} : memref<1x4x16xf32, #tpu.memory_space<vmem>>, vector<1x4x16xf32>,
    } else {
    }
    %c0_25 = arith.constant 0 : index
    %c0_26 = arith.constant 0 : index
    %c0_27 = arith.constant 0 : index
    %53 = vector.load %arg8[%c0_25, %c0_26, %c0_27] : memref<1x4x16xf32, #tpu.memory_space<vmem>>, vector<1x4x16xf32>
    %54 = vector.shape_cast %53 : vector<1x4x16xf32> to vector<4x16xf32>
    %55 = arith.addf %54, %49 : vector<4x16xf32>
    %c0_28 = arith.constant 0 : index
    %c0_29 = arith.constant 0 : index
    %c0_30 = arith.constant 0 : index
    %56 = vector.load %arg8[%c0_28, %c0_29, %c0_30] : memref<1x4x16xf32, #tpu.memory_space<vmem>>, vector<1x4x16xf32>
    %57 = vector.shape_cast %56 : vector<1x4x16xf32> to vector<4x16xf32>
    %58 = vector.shape_cast %55 : vector<4x16xf32> to vector<1x4x16xf32>
    tpu.vector_store %arg8[%c0_28, %c0_29, %c0_30], %58 {strides = array<i32>} : memref<1x4x16xf32, #tpu.memory_space<vmem>>, vector<1x4x16xf32>,
    return
  }
  func.func @transform_0(%arg0: i32, %arg1: i32) -> (i32, i32, i32, i32, i32) {
    %c0_i32 = arith.constant 0 : i32
    %c0_i32_0 = arith.constant 0 : i32
    %c0_i32_1 = arith.constant 0 : i32
    %c0_i32_2 = arith.constant 0 : i32
    return %arg0, %c0_i32, %arg1, %c0_i32_0, %c0_i32_1 : i32, i32, i32, i32, i32
  }
  func.func @transform_1(%arg0: i32, %arg1: i32) -> (i32, i32) {
    %c0_i32 = arith.constant 0 : i32
    %c0_i32_0 = arith.constant 0 : i32
    %c0_i32_1 = arith.constant 0 : i32
    return %c0_i32, %c0_i32_0 : i32, i32
  }
  func.func @transform_2(%arg0: i32, %arg1: i32) -> (i32, i32) {
    %c0_i32 = arith.constant 0 : i32
    %c0_i32_0 = arith.constant 0 : i32
    %c0_i32_1 = arith.constant 0 : i32
    return %c0_i32, %c0_i32_0 : i32, i32
  }
  func.func @transform_3(%arg0: i32, %arg1: i32) -> (i32, i32) {
    %c0_i32 = arith.constant 0 : i32
    %c0_i32_0 = arith.constant 0 : i32
    %c0_i32_1 = arith.constant 0 : i32
    return %c0_i32, %c0_i32_0 : i32, i32
  }
  func.func @transform_4(%arg0: i32, %arg1: i32) -> (i32, i32) {
    %c0_i32 = arith.constant 0 : i32
    %c0_i32_0 = arith.constant 0 : i32
    %c0_i32_1 = arith.constant 0 : i32
    return %c0_i32, %c0_i32_0 : i32, i32
  }
  func.func @transform_5(%arg0: i32, %arg1: i32) -> (i32, i32, i32, i32, i32) {
    %c0_i32 = arith.constant 0 : i32
    %c0_i32_0 = arith.constant 0 : i32
    %c0_i32_1 = arith.constant 0 : i32
    %c0_i32_2 = arith.constant 0 : i32
    return %arg0, %c0_i32, %arg1, %c0_i32_0, %c0_i32_1 : i32, i32, i32, i32, i32
  }
  func.func @transform_6(%arg0: i32, %arg1: i32) -> (i32, i32, i32) {
    %c0_i32 = arith.constant 0 : i32
    %c0_i32_0 = arith.constant 0 : i32
    %c0_i32_1 = arith.constant 0 : i32
    return %arg0, %c0_i32, %c0_i32_0 : i32, i32, i32
  }
}

module attributes {stable_mosaic.version = 11 : i64} {
  func.func @_dwgate_pout_kernel(%arg0: i32, %arg1: i32, %arg2: memref<1x4x4x8x32xf32, #tpu.memory_space<vmem>>, %arg3: memref<1x4x1x8x16xf32, #tpu.memory_space<vmem>>, %arg4: memref<1x4x1x8x16xf32, #tpu.memory_space<vmem>>, %arg5: memref<1x4x9x16xf32, #tpu.memory_space<vmem>>, %arg6: memref<1x16xf32, #tpu.memory_space<vmem>>, %arg7: memref<48x8xf32, #tpu.memory_space<vmem>>, %arg8: memref<1x8xf32, #tpu.memory_space<vmem>>, %arg9: memref<1x4x4x8x8xf32, #tpu.memory_space<vmem>>, %arg10: memref<1x4x4x8x8xf32, #tpu.memory_space<vmem>>) attributes {dimension_semantics = [#tpu.dimension_semantics<parallel>, #tpu.dimension_semantics<parallel>], iteration_bounds = array<i64: 2, 2>, scalar_prefetch = 0 : i64, scratch_operands = 0 : i64, tpu.core_type = #tpu.core_type<tc>, window_params = [{transform_indices = @transform_0, window_bounds = array<i64: 1, 4, 4, 8, 32>}, {transform_indices = @transform_1, window_bounds = array<i64: 1, 4, 1, 8, 16>}, {transform_indices = @transform_2, window_bounds = array<i64: 1, 4, 1, 8, 16>}, {transform_indices = @transform_3, window_bounds = array<i64: 1, 4, 9, 16>}, {pipeline_mode = #tpu.pipeline_mode<synchronous>, transform_indices = @transform_4, window_bounds = array<i64: 1, 16>}, {pipeline_mode = #tpu.pipeline_mode<synchronous>, transform_indices = @transform_5, window_bounds = array<i64: 48, 8>}, {pipeline_mode = #tpu.pipeline_mode<synchronous>, transform_indices = @transform_6, window_bounds = array<i64: 1, 8>}, {transform_indices = @transform_7, window_bounds = array<i64: 1, 4, 4, 8, 8>}, {transform_indices = @transform_8, window_bounds = array<i64: 1, 4, 4, 8, 8>}]} {
    %c0 = arith.constant 0 : index
    %c0_0 = arith.constant 0 : index
    %c0_1 = arith.constant 0 : index
    %c0_2 = arith.constant 0 : index
    %c0_3 = arith.constant 0 : index
    %0 = vector.load %arg2[%c0, %c0_0, %c0_1, %c0_2, %c0_3] : memref<1x4x4x8x32xf32, #tpu.memory_space<vmem>>, vector<1x4x4x8x32xf32>
    %1 = vector.shape_cast %0 : vector<1x4x4x8x32xf32> to vector<4x4x8x32xf32>
    %2 = vector.extract_strided_slice %1 {offsets = [0, 0, 0, 0], sizes = [4, 4, 8, 16], strides = [1, 1, 1, 1]} : vector<4x4x8x32xf32> to vector<4x4x8x16xf32>
    %3 = vector.extract_strided_slice %1 {offsets = [0, 0, 0, 16], sizes = [4, 4, 8, 16], strides = [1, 1, 1, 1]} : vector<4x4x8x32xf32> to vector<4x4x8x16xf32>
    %c0_4 = arith.constant 0 : index
    %c0_5 = arith.constant 0 : index
    %c0_6 = arith.constant 0 : index
    %c0_7 = arith.constant 0 : index
    %c0_8 = arith.constant 0 : index
    %4 = vector.load %arg3[%c0_4, %c0_5, %c0_6, %c0_7, %c0_8] : memref<1x4x1x8x16xf32, #tpu.memory_space<vmem>>, vector<1x4x1x8x16xf32>
    %5 = vector.shape_cast %4 : vector<1x4x1x8x16xf32> to vector<4x1x8x16xf32>
    %6 = vector.shape_cast %5 : vector<4x1x8x16xf32> to vector<4x8x16xf32>
    %c0_9 = arith.constant 0 : index
    %c0_10 = arith.constant 0 : index
    %c0_11 = arith.constant 0 : index
    %c0_12 = arith.constant 0 : index
    %c0_13 = arith.constant 0 : index
    %7 = vector.load %arg4[%c0_9, %c0_10, %c0_11, %c0_12, %c0_13] : memref<1x4x1x8x16xf32, #tpu.memory_space<vmem>>, vector<1x4x1x8x16xf32>
    %8 = vector.shape_cast %7 : vector<1x4x1x8x16xf32> to vector<4x1x8x16xf32>
    %9 = vector.shape_cast %8 : vector<4x1x8x16xf32> to vector<4x8x16xf32>
    %c0_14 = arith.constant 0 : index
    %c0_15 = arith.constant 0 : index
    %c0_16 = arith.constant 0 : index
    %c0_17 = arith.constant 0 : index
    %10 = vector.load %arg5[%c0_14, %c0_15, %c0_16, %c0_17] : memref<1x4x9x16xf32, #tpu.memory_space<vmem>>, vector<1x4x9x16xf32>
    %11 = vector.shape_cast %10 : vector<1x4x9x16xf32> to vector<4x9x16xf32>
    %12 = vector.shape_cast %6 : vector<4x8x16xf32> to vector<4x1x8x16xf32>
    %13 = vector.shape_cast %9 : vector<4x8x16xf32> to vector<4x1x8x16xf32>
    %14 = tpu.concatenate %12, %2, %13 in 1 : vector<4x1x8x16xf32>, vector<4x4x8x16xf32>, vector<4x1x8x16xf32> -> vector<4x6x8x16xf32>
    %cst = arith.constant 0.000000e+00 : f32
    %15 = vector.broadcast %cst : f32 to vector<4x6x1x16xf32>
    %16 = tpu.concatenate %15, %14, %15 in 2 : vector<4x6x1x16xf32>, vector<4x6x8x16xf32>, vector<4x6x1x16xf32> -> vector<4x6x10x16xf32>
    %cst_18 = arith.constant 0.000000e+00 : f32
    %17 = vector.broadcast %cst_18 : f32 to vector<4x4x8x16xf32>
    %c0_19 = arith.constant 0 : index
    %c0_20 = arith.constant 0 : index
    %18 = vector.load %arg6[%c0_19, %c0_20] : memref<1x16xf32, #tpu.memory_space<vmem>>, vector<1x16xf32>
    %19 = vector.shape_cast %18 : vector<1x16xf32> to vector<16xf32>
    %20 = vector.shape_cast %19 : vector<16xf32> to vector<1x1x1x16xf32>
    %21 = vector.broadcast %20 : vector<1x1x1x16xf32> to vector<4x4x8x16xf32>
    %22 = arith.addf %17, %21 : vector<4x4x8x16xf32>
    %23 = vector.extract_strided_slice %11 {offsets = [0, 0, 0], sizes = [4, 1, 16], strides = [1, 1, 1]} : vector<4x9x16xf32> to vector<4x1x16xf32>
    %24 = vector.shape_cast %23 : vector<4x1x16xf32> to vector<4x16xf32>
    %25 = vector.shape_cast %24 : vector<4x16xf32> to vector<4x1x1x16xf32>
    %26 = vector.extract_strided_slice %16 {offsets = [0, 0, 0, 0], sizes = [4, 4, 8, 16], strides = [1, 1, 1, 1]} : vector<4x6x10x16xf32> to vector<4x4x8x16xf32>
    %27 = vector.broadcast %25 : vector<4x1x1x16xf32> to vector<4x4x8x16xf32>
    %28 = arith.mulf %26, %27 : vector<4x4x8x16xf32>
    %29 = arith.addf %22, %28 : vector<4x4x8x16xf32>
    %30 = vector.extract_strided_slice %11 {offsets = [0, 1, 0], sizes = [4, 1, 16], strides = [1, 1, 1]} : vector<4x9x16xf32> to vector<4x1x16xf32>
    %31 = vector.shape_cast %30 : vector<4x1x16xf32> to vector<4x16xf32>
    %32 = vector.shape_cast %31 : vector<4x16xf32> to vector<4x1x1x16xf32>
    %33 = vector.extract_strided_slice %16 {offsets = [0, 0, 1, 0], sizes = [4, 4, 8, 16], strides = [1, 1, 1, 1]} : vector<4x6x10x16xf32> to vector<4x4x8x16xf32>
    %34 = vector.broadcast %32 : vector<4x1x1x16xf32> to vector<4x4x8x16xf32>
    %35 = arith.mulf %33, %34 : vector<4x4x8x16xf32>
    %36 = arith.addf %29, %35 : vector<4x4x8x16xf32>
    %37 = vector.extract_strided_slice %11 {offsets = [0, 2, 0], sizes = [4, 1, 16], strides = [1, 1, 1]} : vector<4x9x16xf32> to vector<4x1x16xf32>
    %38 = vector.shape_cast %37 : vector<4x1x16xf32> to vector<4x16xf32>
    %39 = vector.shape_cast %38 : vector<4x16xf32> to vector<4x1x1x16xf32>
    %40 = vector.extract_strided_slice %16 {offsets = [0, 0, 2, 0], sizes = [4, 4, 8, 16], strides = [1, 1, 1, 1]} : vector<4x6x10x16xf32> to vector<4x4x8x16xf32>
    %41 = vector.broadcast %39 : vector<4x1x1x16xf32> to vector<4x4x8x16xf32>
    %42 = arith.mulf %40, %41 : vector<4x4x8x16xf32>
    %43 = arith.addf %36, %42 : vector<4x4x8x16xf32>
    %44 = vector.extract_strided_slice %11 {offsets = [0, 3, 0], sizes = [4, 1, 16], strides = [1, 1, 1]} : vector<4x9x16xf32> to vector<4x1x16xf32>
    %45 = vector.shape_cast %44 : vector<4x1x16xf32> to vector<4x16xf32>
    %46 = vector.shape_cast %45 : vector<4x16xf32> to vector<4x1x1x16xf32>
    %47 = vector.extract_strided_slice %16 {offsets = [0, 1, 0, 0], sizes = [4, 4, 8, 16], strides = [1, 1, 1, 1]} : vector<4x6x10x16xf32> to vector<4x4x8x16xf32>
    %48 = vector.broadcast %46 : vector<4x1x1x16xf32> to vector<4x4x8x16xf32>
    %49 = arith.mulf %47, %48 : vector<4x4x8x16xf32>
    %50 = arith.addf %43, %49 : vector<4x4x8x16xf32>
    %51 = vector.extract_strided_slice %11 {offsets = [0, 4, 0], sizes = [4, 1, 16], strides = [1, 1, 1]} : vector<4x9x16xf32> to vector<4x1x16xf32>
    %52 = vector.shape_cast %51 : vector<4x1x16xf32> to vector<4x16xf32>
    %53 = vector.shape_cast %52 : vector<4x16xf32> to vector<4x1x1x16xf32>
    %54 = vector.extract_strided_slice %16 {offsets = [0, 1, 1, 0], sizes = [4, 4, 8, 16], strides = [1, 1, 1, 1]} : vector<4x6x10x16xf32> to vector<4x4x8x16xf32>
    %55 = vector.broadcast %53 : vector<4x1x1x16xf32> to vector<4x4x8x16xf32>
    %56 = arith.mulf %54, %55 : vector<4x4x8x16xf32>
    %57 = arith.addf %50, %56 : vector<4x4x8x16xf32>
    %58 = vector.extract_strided_slice %11 {offsets = [0, 5, 0], sizes = [4, 1, 16], strides = [1, 1, 1]} : vector<4x9x16xf32> to vector<4x1x16xf32>
    %59 = vector.shape_cast %58 : vector<4x1x16xf32> to vector<4x16xf32>
    %60 = vector.shape_cast %59 : vector<4x16xf32> to vector<4x1x1x16xf32>
    %61 = vector.extract_strided_slice %16 {offsets = [0, 1, 2, 0], sizes = [4, 4, 8, 16], strides = [1, 1, 1, 1]} : vector<4x6x10x16xf32> to vector<4x4x8x16xf32>
    %62 = vector.broadcast %60 : vector<4x1x1x16xf32> to vector<4x4x8x16xf32>
    %63 = arith.mulf %61, %62 : vector<4x4x8x16xf32>
    %64 = arith.addf %57, %63 : vector<4x4x8x16xf32>
    %65 = vector.extract_strided_slice %11 {offsets = [0, 6, 0], sizes = [4, 1, 16], strides = [1, 1, 1]} : vector<4x9x16xf32> to vector<4x1x16xf32>
    %66 = vector.shape_cast %65 : vector<4x1x16xf32> to vector<4x16xf32>
    %67 = vector.shape_cast %66 : vector<4x16xf32> to vector<4x1x1x16xf32>
    %68 = vector.extract_strided_slice %16 {offsets = [0, 2, 0, 0], sizes = [4, 4, 8, 16], strides = [1, 1, 1, 1]} : vector<4x6x10x16xf32> to vector<4x4x8x16xf32>
    %69 = vector.broadcast %67 : vector<4x1x1x16xf32> to vector<4x4x8x16xf32>
    %70 = arith.mulf %68, %69 : vector<4x4x8x16xf32>
    %71 = arith.addf %64, %70 : vector<4x4x8x16xf32>
    %72 = vector.extract_strided_slice %11 {offsets = [0, 7, 0], sizes = [4, 1, 16], strides = [1, 1, 1]} : vector<4x9x16xf32> to vector<4x1x16xf32>
    %73 = vector.shape_cast %72 : vector<4x1x16xf32> to vector<4x16xf32>
    %74 = vector.shape_cast %73 : vector<4x16xf32> to vector<4x1x1x16xf32>
    %75 = vector.extract_strided_slice %16 {offsets = [0, 2, 1, 0], sizes = [4, 4, 8, 16], strides = [1, 1, 1, 1]} : vector<4x6x10x16xf32> to vector<4x4x8x16xf32>
    %76 = vector.broadcast %74 : vector<4x1x1x16xf32> to vector<4x4x8x16xf32>
    %77 = arith.mulf %75, %76 : vector<4x4x8x16xf32>
    %78 = arith.addf %71, %77 : vector<4x4x8x16xf32>
    %79 = vector.extract_strided_slice %11 {offsets = [0, 8, 0], sizes = [4, 1, 16], strides = [1, 1, 1]} : vector<4x9x16xf32> to vector<4x1x16xf32>
    %80 = vector.shape_cast %79 : vector<4x1x16xf32> to vector<4x16xf32>
    %81 = vector.shape_cast %80 : vector<4x16xf32> to vector<4x1x1x16xf32>
    %82 = vector.extract_strided_slice %16 {offsets = [0, 2, 2, 0], sizes = [4, 4, 8, 16], strides = [1, 1, 1, 1]} : vector<4x6x10x16xf32> to vector<4x4x8x16xf32>
    %83 = vector.broadcast %81 : vector<4x1x1x16xf32> to vector<4x4x8x16xf32>
    %84 = arith.mulf %82, %83 : vector<4x4x8x16xf32>
    %85 = arith.addf %78, %84 : vector<4x4x8x16xf32>
    %86 = arith.mulf %85, %3 : vector<4x4x8x16xf32>
    %cst_21 = arith.constant 0.000000e+00 : f32
    %87 = vector.broadcast %cst_21 : f32 to vector<1x4x8x16xf32>
    %88 = vector.extract_strided_slice %86 {offsets = [0, 0, 0, 0], sizes = [3, 4, 8, 16], strides = [1, 1, 1, 1]} : vector<4x4x8x16xf32> to vector<3x4x8x16xf32>
    %89 = tpu.concatenate %87, %88 in 0 : vector<1x4x8x16xf32>, vector<3x4x8x16xf32> -> vector<4x4x8x16xf32>
    %90 = vector.extract_strided_slice %86 {offsets = [1, 0, 0, 0], sizes = [3, 4, 8, 16], strides = [1, 1, 1, 1]} : vector<4x4x8x16xf32> to vector<3x4x8x16xf32>
    %91 = tpu.concatenate %90, %87 in 0 : vector<3x4x8x16xf32>, vector<1x4x8x16xf32> -> vector<4x4x8x16xf32>
    %92 = tpu.concatenate %89, %86, %91 in 3 : vector<4x4x8x16xf32>, vector<4x4x8x16xf32>, vector<4x4x8x16xf32> -> vector<4x4x8x48xf32>
    %93 = vector.shape_cast %92 : vector<4x4x8x48xf32> to vector<128x48xf32>
    %c0_22 = arith.constant 0 : index
    %c0_23 = arith.constant 0 : index
    %94 = vector.load %arg7[%c0_22, %c0_23] : memref<48x8xf32, #tpu.memory_space<vmem>>, vector<48x8xf32>
    %cst_24 = arith.constant dense<0.000000e+00> : vector<128x8xf32>
    %95 = tpu.matmul %93, %94, %cst_24 {dimension_numbers = #tpu.dot_dimension_numbers<[1], [0], [0], [1], [0, 0, 1, 1], [], []>} : vector<128x48xf32>, vector<48x8xf32>, vector<128x8xf32> -> vector<128x8xf32>
    %c0_25 = arith.constant 0 : index
    %c0_26 = arith.constant 0 : index
    %96 = vector.load %arg8[%c0_25, %c0_26] : memref<1x8xf32, #tpu.memory_space<vmem>>, vector<1x8xf32>
    %97 = vector.shape_cast %96 : vector<1x8xf32> to vector<8xf32>
    %98 = vector.shape_cast %97 : vector<8xf32> to vector<1x8xf32>
    %99 = vector.broadcast %98 : vector<1x8xf32> to vector<128x8xf32>
    %100 = arith.addf %95, %99 : vector<128x8xf32>
    %101 = vector.shape_cast %100 : vector<128x8xf32> to vector<4x4x8x8xf32>
    %c0_27 = arith.constant 0 : index
    %c0_28 = arith.constant 0 : index
    %c0_29 = arith.constant 0 : index
    %c0_30 = arith.constant 0 : index
    %c0_31 = arith.constant 0 : index
    %102 = vector.load %arg9[%c0_27, %c0_28, %c0_29, %c0_30, %c0_31] : memref<1x4x4x8x8xf32, #tpu.memory_space<vmem>>, vector<1x4x4x8x8xf32>
    %103 = vector.shape_cast %102 : vector<1x4x4x8x8xf32> to vector<4x4x8x8xf32>
    %104 = arith.addf %101, %103 : vector<4x4x8x8xf32>
    %c0_32 = arith.constant 0 : index
    %c0_33 = arith.constant 0 : index
    %c0_34 = arith.constant 0 : index
    %c0_35 = arith.constant 0 : index
    %c0_36 = arith.constant 0 : index
    %105 = vector.load %arg10[%c0_32, %c0_33, %c0_34, %c0_35, %c0_36] : memref<1x4x4x8x8xf32, #tpu.memory_space<vmem>>, vector<1x4x4x8x8xf32>
    %106 = vector.shape_cast %105 : vector<1x4x4x8x8xf32> to vector<4x4x8x8xf32>
    %107 = vector.shape_cast %104 : vector<4x4x8x8xf32> to vector<1x4x4x8x8xf32>
    tpu.vector_store %arg10[%c0_32, %c0_33, %c0_34, %c0_35, %c0_36], %107 {strides = array<i32>} : memref<1x4x4x8x8xf32, #tpu.memory_space<vmem>>, vector<1x4x4x8x8xf32>,
    return
  }
  func.func @transform_0(%arg0: i32, %arg1: i32) -> (i32, i32, i32, i32, i32) {
    %c0_i32 = arith.constant 0 : i32
    %c0_i32_0 = arith.constant 0 : i32
    %c0_i32_1 = arith.constant 0 : i32
    %c0_i32_2 = arith.constant 0 : i32
    return %arg0, %c0_i32, %arg1, %c0_i32_0, %c0_i32_1 : i32, i32, i32, i32, i32
  }
  func.func @transform_1(%arg0: i32, %arg1: i32) -> (i32, i32, i32, i32, i32) {
    %c0_i32 = arith.constant 0 : i32
    %c0_i32_0 = arith.constant 0 : i32
    %c0_i32_1 = arith.constant 0 : i32
    %c0_i32_2 = arith.constant 0 : i32
    return %arg0, %c0_i32, %arg1, %c0_i32_0, %c0_i32_1 : i32, i32, i32, i32, i32
  }
  func.func @transform_2(%arg0: i32, %arg1: i32) -> (i32, i32, i32, i32, i32) {
    %c0_i32 = arith.constant 0 : i32
    %c0_i32_0 = arith.constant 0 : i32
    %c0_i32_1 = arith.constant 0 : i32
    %c0_i32_2 = arith.constant 0 : i32
    return %arg0, %c0_i32, %arg1, %c0_i32_0, %c0_i32_1 : i32, i32, i32, i32, i32
  }
  func.func @transform_3(%arg0: i32, %arg1: i32) -> (i32, i32, i32, i32) {
    %c0_i32 = arith.constant 0 : i32
    %c0_i32_0 = arith.constant 0 : i32
    %c0_i32_1 = arith.constant 0 : i32
    %c0_i32_2 = arith.constant 0 : i32
    return %arg0, %c0_i32, %c0_i32_0, %c0_i32_1 : i32, i32, i32, i32
  }
  func.func @transform_4(%arg0: i32, %arg1: i32) -> (i32, i32) {
    %c0_i32 = arith.constant 0 : i32
    %c0_i32_0 = arith.constant 0 : i32
    %c0_i32_1 = arith.constant 0 : i32
    return %c0_i32, %c0_i32_0 : i32, i32
  }
  func.func @transform_5(%arg0: i32, %arg1: i32) -> (i32, i32) {
    %c0_i32 = arith.constant 0 : i32
    %c0_i32_0 = arith.constant 0 : i32
    %c0_i32_1 = arith.constant 0 : i32
    return %c0_i32, %c0_i32_0 : i32, i32
  }
  func.func @transform_6(%arg0: i32, %arg1: i32) -> (i32, i32) {
    %c0_i32 = arith.constant 0 : i32
    %c0_i32_0 = arith.constant 0 : i32
    %c0_i32_1 = arith.constant 0 : i32
    return %c0_i32, %c0_i32_0 : i32, i32
  }
  func.func @transform_7(%arg0: i32, %arg1: i32) -> (i32, i32, i32, i32, i32) {
    %c0_i32 = arith.constant 0 : i32
    %c0_i32_0 = arith.constant 0 : i32
    %c0_i32_1 = arith.constant 0 : i32
    %c0_i32_2 = arith.constant 0 : i32
    return %arg0, %c0_i32, %arg1, %c0_i32_0, %c0_i32_1 : i32, i32, i32, i32, i32
  }
  func.func @transform_8(%arg0: i32, %arg1: i32) -> (i32, i32, i32, i32, i32) {
    %c0_i32 = arith.constant 0 : i32
    %c0_i32_0 = arith.constant 0 : i32
    %c0_i32_1 = arith.constant 0 : i32
    %c0_i32_2 = arith.constant 0 : i32
    return %arg0, %c0_i32, %arg1, %c0_i32_0, %c0_i32_1 : i32, i32, i32, i32, i32
  }
}

</mosaic_0001>

<bundles_post_ra>
// kernel: transformer_block_forward.2
= control target key start
LH: loop header
LB: loop body
LE: loop exit
PB: predicated region body
PF: predicated region fallthrough
CT: control target
= control target key end

     0   :  { %s1566_s21 = smov 0   ;;  %s1568_s22 = smov 0   ;;  %s2137_s0 = inlined_call_operand.vmem [shape: f32[2,4,8,8,8], index: 0, kind: input, shape index: {}]   ;;  %s2138_s1 = inlined_call_operand.vmem [shape: f32[1,8], index: 1, kind: input, shape index: {}]   ;;  %s2139_s2 = inlined_call_operand.vmem [shape: f32[1,8], index: 2, kind: input, shape index: {}]   ;;  %s2140_s3 = inlined_call_operand.vmem [shape: f32[24,32], index: 3, kind: input, shape index: {}]   ;;  %s2141_s4 = inlined_call_operand.vmem [shape: f32[1,32], index: 4, kind: input, shape index: {}]   ;;  %s2142_s5 = inlined_call_operand.vmem [shape: f32[2,4,8,8,32], index: 5, kind: output, shape index: {0}]   ;;  %s2143_s6 = inlined_call_operand.vmem [shape: f32[2,4,16], index: 6, kind: output, shape index: {1}]  }
   0x1   :  { %s1570_s23 = smov 0   ;;  %s1572_s24 = smov 0  }
   0x2   :  { %s1574_s25 = smov 0   ;;  %s1576_s26 = smov 0  }
   0x3   :  { %s1578_s27 = smov 0  }
   0x4 LB: > { %s26_s28 = sadd.s32 1, %s1517_s25  ;;  %s29_s29 = sadd.s32 1, %s1521_s26  ;;  %s1525_s27 = sphi %s1578_s27, %s17_s27   ;;  %s1521_s26 = sphi %s1576_s26, %s2150_s26   ;;  %s1517_s25 = sphi %s1574_s25, %s2149_s25   ;;  %s1513_s24 = sphi %s1572_s24, %s2148_s24   ;;  %s1509_s23 = sphi %s1570_s23, %s2147_s23   ;;  %s1505_s22 = sphi %s1568_s22, %s2146_s22   ;;  %s1501_s21 = sphi %s1566_s21, %s2145_s21  }
   0x5   : > { %p27_p0 = scmp.ge.s32.totalorder %s26_s28, 2  ;;  %s1284_s30 = sadd.s32 4294967295, %s1525_s27  }
   0x6   : > { %p45_p1 = scmp.ne.s32.totalorder %s1505_s22, %s1501_s21  ;;  %p46_p2 = scmp.eq.s32.totalorder %s1525_s27, 0 }
   0x7   : > { %s2152_s28 = smov (%p27_p0, %s26_s28), 0  ;;  %s2154_s29 = smov (!%p27_p0, %s29_s29), %s1521_s26 }
   0x8   : > { %p31_p3 = scmp.ge.s32.totalorder %s2154_s29, 2  ;;  %p161_p4 = scmp.eq.s32.totalorder %s1284_s30, 3 }
   0x9   : > { %s34_s7 = ssub.s32 %s1517_s25, %s2152_s28  ;;  %p47_p5 = por %p46_p2, %p45_p1 }
   0xa   : > { %s2156_s29 = smov (%p31_p3, %s2154_s29), 0  ;;  %p1614_p6 = por %p161_p4, %p45_p1 }
   0xb   : > { %s33_s9 = ssub.s32 %s1521_s26, %s2156_s29  ;;  %s38_s11 = sadd.s32 1, %s1505_s22 }
   0xc   : > { %s35_s10 = sor.u32 %s34_s7, %s33_s9  ;;  %p1287_p8 = scmp.ge.s32.totalorder %s1525_s27, 4 }
   0xd   : > { %p36_p7 = scmp.eq.s32.totalorder %s35_s10, 0 }
   0xe   : > { %221 = sbr.rel (%p1287_p8) target bundleno = 36 (0x24), region = 32 }
   0xf   : > { %s1622_s12 = scalar_select %p36_p7, %s1505_s22, %s38_s11  }
  0x15   : > { %224 = sbr.rel (!%p47_p5) target bundleno = 36 (0x24), region = 36  ;;  %s226_s13 = sand.u32 (%p47_p5), 1, %s1505_s22  }
  0x16   : > { %s1289_s14 = sshll.u32 (%p47_p5), %s1517_s25, 2  ;;  %s1288_s15 = sshll.u32 (%p47_p5), %s226_s13, 7 }
  0x17   : > { %s1290_s16 = sshll.u32 (%p47_p5), %s1521_s26, 5  ;;  %s228_s7 = scalar_lea.vmem (%p47_p5), [#allocation2], %s1288_s15 }
  0x18   : > { %s231_s17 = sadd.s32 (%p47_p5), %s1290_s16, %s1289_s14 }
  0x19   : > { %s1291_s18 = sshll.u32 (%p47_p5), %s231_s17, 3 }
  0x1a   : > { %s1631_s30 = scalar_lea.vmem (%p47_p5), %s2137_s0, %s1291_s18 }
  0x1b   : > { %v291_v0 = vld [vmem:[%s1631_s30] sm:$0xff] (%p47_p5)  ;;  %v293_v1 = vld [vmem:[%s1631_s30 + $0x8] sm:$0xff] (%p47_p5)  ;;  %v295_v2 = vld [vmem:[%s1631_s30 + $0x10] sm:$0xff] (%p47_p5) }
  0x1c   : > { %292 = vst [vmem:[%s228_s7] sm:$0xff] %v291_v0  ;;  %294 = vst [vmem:[%s228_s7 + $0x8] sm:$0xff] %v293_v1  ;;  %v297_v3 = vld [vmem:[%s1631_s30 + $0x18] sm:$0xff]  ;;  %v299_v4 = vld [vmem:[%s1631_s30 + $0x40] sm:$0xff] }
  0x1d   : > { %296 = vst [vmem:[%s228_s7 + $0x10] sm:$0xff] %v295_v2  ;;  %v301_v5 = vld [vmem:[%s1631_s30 + $0x48] sm:$0xff]  ;;  %298 = vst [vmem:[%s228_s7 + $0x18] sm:$0xff] %v297_v3  ;;  %v303_v6 = vld [vmem:[%s1631_s30 + $0x50] sm:$0xff] }
  0x1e   : > { %300 = vst [vmem:[%s228_s7 + $0x20] sm:$0xff] %v299_v4  ;;  %302 = vst [vmem:[%s228_s7 + $0x28] sm:$0xff] %v301_v5  ;;  %v305_v7 = vld [vmem:[%s1631_s30 + $0x58] sm:$0xff]  ;;  %v307_v8 = vld [vmem:[%s1631_s30 + $0x80] sm:$0xff] }
  0x1f   : > { %304 = vst [vmem:[%s228_s7 + $0x30] sm:$0xff] %v303_v6  ;;  %306 = vst [vmem:[%s228_s7 + $0x38] sm:$0xff] %v305_v7  ;;  %v309_v9 = vld [vmem:[%s1631_s30 + $0x88] sm:$0xff]  ;;  %v311_v10 = vld [vmem:[%s1631_s30 + $0x90] sm:$0xff] }
  0x20   : > { %308 = vst [vmem:[%s228_s7 + $0x40] sm:$0xff] %v307_v8  ;;  %v313_v11 = vld [vmem:[%s1631_s30 + $0x98] sm:$0xff]  ;;  %310 = vst [vmem:[%s228_s7 + $0x48] sm:$0xff] %v309_v9  ;;  %v315_v12 = vld [vmem:[%s1631_s30 + $0xc0] sm:$0xff] }
  0x21   : > { %312 = vst [vmem:[%s228_s7 + $0x50] sm:$0xff] %v311_v10  ;;  %314 = vst [vmem:[%s228_s7 + $0x58] sm:$0xff] %v313_v11  ;;  %v317_v13 = vld [vmem:[%s1631_s30 + $0xc8] sm:$0xff]  ;;  %v319_v14 = vld [vmem:[%s1631_s30 + $0xd0] sm:$0xff] }
  0x22   : > { %316 = vst [vmem:[%s228_s7 + $0x60] sm:$0xff] %v315_v12  ;;  %318 = vst [vmem:[%s228_s7 + $0x68] sm:$0xff] %v317_v13  ;;  %v321_v15 = vld [vmem:[%s1631_s30 + $0xd8] sm:$0xff] }
  0x23   : > { %320 = vst [vmem:[%s228_s7 + $0x70] sm:$0xff] %v319_v14  ;;  %322 = vst [vmem:[%s228_s7 + $0x78] sm:$0xff] %v321_v15 }
  0x24 PF: > { %p1292_p9 = scmp.ge.s32.totalorder %s1525_s27, 1  ;;  %p327_p10 = scmp.lt.s32.totalorder %s1525_s27, 5 }
  0x26   : > { %p328_p11 = pnand %p1292_p9, %p327_p10 }
  0x27   : > { %s334_s9 = sand.u32 (!%p328_p11), 1, %s1501_s21   ;;  %vm388_vm0 = vcmask (!%p328_p11), 64512   ;;  %s1528_s21 = smov (!%p328_p11), 16   ;;  %vm764_vm1 = vcmask (!%p328_p11), 130048   ;;  %vm791_vm2 = vcmask (!%p328_p11), 195584   ;;  %vm985_vm3 = vcmask (!%p328_p11), 261120  }
  0x28   : > { %331 = sbr.rel (%p328_p11) target bundleno = 775 (0x307), region = 74  ;;  %s1652_s10 = sshll.u32 (!%p328_p11), %s334_s9, 7 }
  0x29   : > { %s1655_s11 = scalar_lea.vmem (!%p328_p11), [#allocation2], %s1652_s10  ;;  %p368_p12 = scmp.lt.s32.totalorder (!%p328_p11), %s1513_s24, 1 }
  0x2a   : > { %v372_v16 = vld [vmem:[%s1655_s11] sm:$0xff] (!%p328_p11)  ;;  %v373_v17 = vld [vmem:[%s1655_s11 + $0x8] sm:$0xff] (!%p328_p11)  ;;  %v1680_v32 = vld [vmem:[%s1655_s11 + $0x10] sm:$0xff] (!%p328_p11)  ;;  %s1529_s16 = smov (!%p328_p11), 8   ;;  %s2025_s18 = scalar_lea.vmem (!%p328_p11), [#allocation3], %s1652_s10 }
  0x2b   : > { %v380_v18 = vld [vmem:[%s1655_s11 + $0x40] sm:$0xff] (!%p328_p11)  ;;  %v389_v19 = vsel (!%p328_p11), %vm388_vm0, %v372_v16, 0.0  ;;  %v392_v20 = vsel (!%p328_p11), %vm388_vm0, %v373_v17, 0.0  ;;  %v381_v24 = vld [vmem:[%s1655_s11 + $0x48] sm:$0xff] (!%p328_p11)  ;;  %v1683_v33 = vld [vmem:[%s1655_s11 + $0x50] sm:$0xff] (!%p328_p11)  ;;  %v395_v34 = vsel (!%p328_p11), %vm388_vm0, %v1680_v32, 0.0 }
  0x2c   : > { %v376_v21 = vld [vmem:[%s1655_s11 + $0x20] sm:$0xff] (!%p328_p11)  ;;  %390 = vadd.xlane.f32.xlu0 (!%p328_p11), %v389_v19  ;;  %393 = vadd.xlane.f32.xlu1 (!%p328_p11), %v392_v20  ;;  %v413_v22 = vsel (!%p328_p11), %vm388_vm0, %v380_v18, 0.0  ;;  %v416_v26 = vsel (!%p328_p11), %vm388_vm0, %v381_v24, 0.0  ;;  %v1670_v28 = vld [vmem:[%s1655_s11 + $0x28] sm:$0xff] (!%p328_p11)  ;;  %v419_v35 = vsel (!%p328_p11), %vm388_vm0, %v1683_v33, 0.0  ;;  %v1690_v36 = vld [vmem:[%s1655_s11 + $0x18] sm:$0xff] (!%p328_p11) }
  0x2d   : > { %v401_v23 = vsel (!%p328_p11), %vm388_vm0, %v376_v21, 0.0  ;;  %v384_v25 = vld [vmem:[%s1655_s11 + $0x60] sm:$0xff] (!%p328_p11)  ;;  %v1673_v29 = vld [vmem:[%s1655_s11 + $0x68] sm:$0xff] (!%p328_p11)  ;;  %v404_v30 = vsel (!%p328_p11), %vm388_vm0, %v1670_v28, 0.0  ;;  %v1693_v37 = vld [vmem:[%s1655_s11 + $0x30] sm:$0xff] (!%p328_p11)  ;;  %v398_v38 = vsel (!%p328_p11), %vm388_vm0, %v1690_v36, 0.0 }
  0x2e   : > { %v425_v27 = vsel (!%p328_p11), %vm388_vm0, %v384_v25, 0.0  ;;  %v428_v31 = vsel (!%p328_p11), %vm388_vm0, %v1673_v29, 0.0  ;;  %v407_v39 = vsel (!%p328_p11), %vm388_vm0, %v1693_v37, 0.0  ;;  %v1700_v40 = vld [vmem:[%s1655_s11 + $0x58] sm:$0xff] (!%p328_p11)  ;;  %v1703_v41 = vld [vmem:[%s1655_s11 + $0x70] sm:$0xff] (!%p328_p11)  ;;  %p1315_p13 = scmp.ne.s32.totalorder (!%p328_p11), %s1509_s23, 0 }
  0x2f   : > { %v422_v42 = vsel %vm388_vm0, %v1700_v40, 0.0  ;;  %v431_v43 = vsel %vm388_vm0, %v1703_v41, 0.0  ;;  %v1710_v44 = vld [vmem:[%s1655_s11 + $0x38] sm:$0xff]  ;;  %s369_s19 = scalar_select %p368_p12, %s1513_s24, 1 }
  0x30   : > { %414 = vadd.xlane.f32.xlu0 %v413_v22  ;;  %402 = vadd.xlane.f32.xlu1 %v401_v23  ;;  %v1713_v45 = vld [vmem:[%s1655_s11 + $0x78] sm:$0xff]  ;;  %v410_v46 = vsel %vm388_vm0, %v1710_v44, 0.0  ;;  %vm1058_vm4 = vcmask (!%p1315_p13), 125952  }
  0x31   : > { %v434_v47 = vsel %vm388_vm0, %v1713_v45, 0.0  ;;  %s1295_s7 = sshll.u32 %s369_s19, 2 }
  0x32   : > { %s1833_s13 = scalar_lea.vmem %s2143_s6, %s1295_s7 }
  0x34   : > { %417 = vadd.xlane.f32.xlu0 %v416_v26  ;;  %426 = vadd.xlane.f32.xlu1 %v425_v27 }
  0x38   : > { %405 = vadd.xlane.f32.xlu0 %v404_v30  ;;  %429 = vadd.xlane.f32.xlu1 %v428_v31 }
  0x3c   : > { %396 = vadd.xlane.f32.xlu0 %v395_v34  ;;  %420 = vadd.xlane.f32.xlu1 %v419_v35 }
  0x40   : > { %399 = vadd.xlane.f32.xlu0 %v398_v38  ;;  %408 = vadd.xlane.f32.xlu1 %v407_v39 }
  0x44   : > { %423 = vadd.xlane.f32.xlu0 %v422_v42  ;;  %432 = vadd.xlane.f32.xlu1 %v431_v43 }
  0x48   : > { %411 = vadd.xlane.f32.xlu0 %v410_v46  ;;  %435 = vadd.xlane.f32.xlu1 %v434_v47 }
  0xb9   : > { %v391_v48 = vpop.xlane.xlu0 %390  ;;  %v394_v49 = vpop.xlane.xlu1 %393 }
  0xba   : > { %v438_v50 = vmul.f32 0.125, %v391_v48  ;;  %v439_v51 = vmul.f32 0.125, %v394_v49 }
  0xbc   : > { %v1719_v52 = vsub.f32 %v372_v16, %v438_v50  ;;  %v1721_v53 = vsub.f32 %v373_v17, %v439_v51 }
  0xbd   : > { %v415_v54 = vpop.xlane.xlu0 %414  ;;  %v403_v55 = vpop.xlane.xlu1 %402 }
  0xbe   : > { %v446_v56 = vmul.f32 0.125, %v415_v54  ;;  %v442_v57 = vmul.f32 0.125, %v403_v55  ;;  %v470_v58 = vmul.f32 %v1719_v52, %v1719_v52  ;;  %v471_v59 = vmul.f32 %v1721_v53, %v1721_v53 }
  0xc0   : > { %v1727_v60 = vsub.f32 %v380_v18, %v446_v56  ;;  %v1729_v61 = vsub.f32 %v376_v21, %v442_v57  ;;  %v486_v62 = vsel %vm388_vm0, %v470_v58, 0.0  ;;  %v489_v1 = vsel %vm388_vm0, %v471_v59, 0.0 }
  0xc1   : > { %487 = vadd.xlane.f32.xlu0 %v486_v62  ;;  %v418_v63 = vpop.xlane.xlu0 %417  ;;  %v427_v0 = vpop.xlane.xlu1 %426 }
  0xc2   : > { %v447_v2 = vmul.f32 0.125, %v418_v63  ;;  %v450_v3 = vmul.f32 0.125, %v427_v0  ;;  %v478_v4 = vmul.f32 %v1727_v60, %v1727_v60  ;;  %v474_v5 = vmul.f32 %v1729_v61, %v1729_v61 }
  0xc4   : > { %v1737_v6 = vsub.f32 %v381_v24, %v447_v2  ;;  %v1739_v7 = vsub.f32 %v384_v25, %v450_v3  ;;  %v510_v8 = vsel %vm388_vm0, %v478_v4, 0.0  ;;  %v498_v11 = vsel %vm388_vm0, %v474_v5, 0.0 }
  0xc5   : > { %490 = vadd.xlane.f32.xlu0 %v489_v1  ;;  %511 = vadd.xlane.f32.xlu1 %v510_v8  ;;  %v406_v9 = vpop.xlane.xlu0 %405  ;;  %v430_v10 = vpop.xlane.xlu1 %429 }
  0xc6   : > { %v443_v12 = vmul.f32 0.125, %v406_v9  ;;  %v451_v13 = vmul.f32 0.125, %v430_v10  ;;  %v479_v14 = vmul.f32 %v1737_v6, %v1737_v6  ;;  %v482_v15 = vmul.f32 %v1739_v7, %v1739_v7 }
  0xc8   : > { %v1748_v16 = vsub.f32 %v1670_v28, %v443_v12  ;;  %v1751_v17 = vsub.f32 %v1673_v29, %v451_v13  ;;  %v513_v18 = vsel %vm388_vm0, %v479_v14, 0.0  ;;  %v522_v21 = vsel %vm388_vm0, %v482_v15, 0.0 }
  0xc9   : > { %499 = vadd.xlane.f32.xlu1 %v498_v11  ;;  %514 = vadd.xlane.f32.xlu0 %v513_v18  ;;  %v397_v19 = vpop.xlane.xlu0 %396  ;;  %v421_v20 = vpop.xlane.xlu1 %420 }
  0xca   : > { %v440_v22 = vmul.f32 0.125, %v397_v19  ;;  %v448_v23 = vmul.f32 0.125, %v421_v20  ;;  %v475_v24 = vmul.f32 %v1748_v16, %v1748_v16  ;;  %v483_v25 = vmul.f32 %v1751_v17, %v1751_v17 }
  0xcc   : > { %v1760_v26 = vsub.f32 %v1680_v32, %v440_v22  ;;  %v1763_v27 = vsub.f32 %v1683_v33, %v448_v23  ;;  %v501_v28 = vsel %vm388_vm0, %v475_v24, 0.0  ;;  %v525_v31 = vsel %vm388_vm0, %v483_v25, 0.0 }
  0xcd   : > { %523 = vadd.xlane.f32.xlu1 %v522_v21  ;;  %502 = vadd.xlane.f32.xlu0 %v501_v28  ;;  %v400_v29 = vpop.xlane.xlu0 %399  ;;  %v409_v30 = vpop.xlane.xlu1 %408 }
  0xce   : > { %v441_v34 = vmul.f32 0.125, %v400_v29  ;;  %v444_v35 = vmul.f32 0.125, %v409_v30  ;;  %v472_v38 = vmul.f32 %v1760_v26, %v1760_v26  ;;  %v480_v32 = vmul.f32 %v1763_v27, %v1763_v27  ;;  %v781_v30 = vld [vmem:[%s2140_s3] sm:$0xff] }
  0xd0   : > { %v1772_v39 = vsub.f32 %v1690_v36, %v441_v34  ;;  %v1775_v33 = vsub.f32 %v1693_v37, %v444_v35  ;;  %v492_v42 = vsel %vm388_vm0, %v472_v38, 0.0  ;;  %v516_v47 = vsel %vm388_vm0, %v480_v32, 0.0  ;;  %v1820_v34 = vld [vmem:[%s2138_s1] ss:$0 sm:$0xff] }
  0xd1   : > { %526 = vadd.xlane.f32.xlu1 %v525_v31  ;;  %493 = vadd.xlane.f32.xlu0 %v492_v42  ;;  %v424_v43 = vpop.xlane.xlu0 %423  ;;  %v433_v46 = vpop.xlane.xlu1 %432  ;;  %v782_v31 = vld [vmem:[%s2140_s3 + $0x8] sm:$0xff] }
  0xd2   : > { %v449_v48 = vmul.f32 0.125, %v424_v43  ;;  %v452_v49 = vmul.f32 0.125, %v433_v46  ;;  %v473_v50 = vmul.f32 %v1772_v39, %v1772_v39  ;;  %v476_v36 = vmul.f32 %v1775_v33, %v1775_v33 }
  0xd3   : > { %v1371_v35 = vpack.c.bf16 %v782_v31, %v781_v30 }
  0xd4   : > { %v1784_v51 = vsub.f32 %v1700_v40, %v449_v48  ;;  %v1787_v37 = vsub.f32 %v1703_v41, %v452_v49  ;;  %v495_v54 = vsel %vm388_vm0, %v473_v50, 0.0  ;;  %v504_v57 = vsel %vm388_vm0, %v476_v36, 0.0  ;;  %v1827_v50 = vld [vmem:[%s2139_s2] ss:$0 sm:$0xff] }
  0xd5   : > { %517 = vadd.xlane.f32.xlu1 %v516_v47  ;;  %496 = vadd.xlane.f32.xlu0 %v495_v54  ;;  %v412_v55 = vpop.xlane.xlu0 %411  ;;  %v436_v56 = vpop.xlane.xlu1 %435 }
  0xd6   : > { %v445_v58 = vmul.f32 0.125, %v412_v55  ;;  %v453_v59 = vmul.f32 0.125, %v436_v56  ;;  %v481_v62 = vmul.f32 %v1784_v51, %v1784_v51  ;;  %v484_v40 = vmul.f32 %v1787_v37, %v1787_v37  ;;  %1372 = vmatprep.subr.bf16.mxu0 %v1371_v35  ;;  %1375 = vmatprep.subr.bf16.mxu1 %v1371_v35 }
  0xd7   : > { %1374 = vmatpush3.bf16.msra.mxu0 %v1371_v35  ;;  %1377 = vmatpush3.bf16.msra.mxu1 %v1371_v35 }
  0xd8   : > { %v1796_v63 = vsub.f32 %v1710_v44, %v445_v58  ;;  %v1799_v41 = vsub.f32 %v1713_v45, %v453_v59  ;;  %v519_v0 = vsel %vm388_vm0, %v481_v62, 0.0  ;;  %v528_v1 = vsel %vm388_vm0, %v484_v40, 0.0 }
  0xd9   : > { %505 = vadd.xlane.f32.xlu1 %v504_v57  ;;  %520 = vadd.xlane.f32.xlu0 %v519_v0  ;;  %v1527_v45 = vmov 0.0  }
  0xda   : > { %v477_v2 = vmul.f32 %v1796_v63, %v1796_v63  ;;  %v485_v3 = vmul.f32 %v1799_v41, %v1799_v41 }
  0xdc   : > { %v507_v4 = vsel %vm388_vm0, %v477_v2, 0.0  ;;  %v531_v44 = vsel %vm388_vm0, %v485_v3, 0.0 }
  0xdd   : > { %529 = vadd.xlane.f32.xlu1 %v528_v1  ;;  %508 = vadd.xlane.f32.xlu0 %v507_v4 }
  0xe1   : > { %532 = vadd.xlane.f32.xlu1 %v531_v44 }
  0xf2   : > { %733 = vrot.lane.b32.xlu1 %v1527_v45, %s1528_s21 }
 0x14e   : > { %v488_v5 = vpop.xlane.xlu0 %487 }
 0x14f   : > { %v534_v8 = vmul.f32 0.125, %v488_v5 }
 0x151   : > { %v550_v9 = vadd.f32 1e-05, %v534_v8 }
 0x152   : > { %v512_v10 = vpop.xlane.xlu1 %511  ;;  %v491_v11 = vpop.xlane.xlu0 %490 }
 0x153   : > { %1439 = vrsqrt.f32 %v550_v9  ;;  %v542_v12 = vmul.f32 0.125, %v512_v10  ;;  %v535_v13 = vmul.f32 0.125, %v491_v11 }
 0x155   : > { %v558_v14 = vadd.f32 1e-05, %v542_v12  ;;  %v551_v15 = vadd.f32 1e-05, %v535_v13 }
 0x156   : > { %v500_v18 = vpop.xlane.xlu1 %499  ;;  %v515_v19 = vpop.xlane.xlu0 %514 }
 0x157   : > { %1441 = vrsqrt.f32 %v558_v14  ;;  %v538_v20 = vmul.f32 0.125, %v500_v18  ;;  %v543_v21 = vmul.f32 0.125, %v515_v19 }
 0x158   : > { %1443 = vrsqrt.f32 %v551_v15 }
 0x159   : > { %v554_v22 = vadd.f32 1e-05, %v538_v20  ;;  %v559_v23 = vadd.f32 1e-05, %v543_v21 }
 0x15a   : > { %v524_v24 = vpop.xlane.xlu1 %523  ;;  %v503_v25 = vpop.xlane.xlu0 %502 }
 0x15b   : > { %1445 = vrsqrt.f32 %v554_v22  ;;  %v546_v28 = vmul.f32 0.125, %v524_v24  ;;  %v539_v29 = vmul.f32 0.125, %v503_v25 }
 0x15c   : > { %1447 = vrsqrt.f32 %v559_v23 }
 0x15d   : > { %v1440_v38 = vpop.eup %1439  ;;  %v562_v32 = vadd.f32 1e-05, %v546_v28  ;;  %v555_v42 = vadd.f32 1e-05, %v539_v29 }
 0x15e   : > { %v527_v43 = vpop.xlane.xlu1 %526  ;;  %v494_v46 = vpop.xlane.xlu0 %493  ;;  %v582_v47 = vmul.f32 %v1440_v38, %v1719_v52  ;;  %v783_v52 = vld [vmem:[%s2140_s3 + $0x10] sm:$0xff] }
 0x15f   : > { %1449 = vrsqrt.f32 %v562_v32  ;;  %v547_v48 = vmul.f32 0.125, %v527_v43  ;;  %v536_v49 = vmul.f32 0.125, %v494_v46  ;;  %1345 = vmatprep.subr.mxu0 %v783_v52  ;;  %1376 = vmatprep.subr.mxu1 %v783_v52 }
 0x160   : > { %1451 = vrsqrt.f32 %v555_v42  ;;  %v605_v36 = vmul.f32 %v1820_v34, %v582_v47  ;;  %1346 = vmatpush3.msra.mxu0 %v783_v52  ;;  %1378 = vmatpush3.msra.mxu1 %v783_v52 }
 0x161   : > { %v1442_v54 = vpop.eup %1441  ;;  %v563_v55 = vadd.f32 1e-05, %v547_v48  ;;  %v552_v56 = vadd.f32 1e-05, %v536_v49 }
 0x162   : > { %v1444_v57 = vpop.eup %1443  ;;  %v518_v58 = vpop.xlane.xlu1 %517  ;;  %v1839_v62 = vadd.f32 %v1827_v50, %v605_v36  ;;  %v590_v40 = vmul.f32 %v1442_v54, %v1727_v60 }
 0x163   : > { %v497_v59 = vpop.xlane.xlu0 %496  ;;  %1453 = vrsqrt.f32 %v563_v55  ;;  %v544_v0 = vmul.f32 0.125, %v518_v58  ;;  %v583_v2 = vmul.f32 %v1444_v57, %v1721_v53 }
 0x164   : > { %v537_v1 = vmul.f32 0.125, %v497_v59  ;;  %1455 = vrsqrt.f32 %v552_v56  ;;  %660 = vrot.lane.b32.xlu0 %v1839_v62, %s1529_s16  ;;  %v613_v3 = vmul.f32 %v1820_v34, %v590_v40 }
 0x165   : > { %v1446_v4 = vpop.eup %1445  ;;  %v560_v44 = vadd.f32 1e-05, %v544_v0  ;;  %v606_v10 = vmul.f32 %v1820_v34, %v583_v2 }
 0x166   : > { %v553_v45 = vadd.f32 1e-05, %v537_v1  ;;  %v1448_v5 = vpop.eup %1447  ;;  %v506_v8 = vpop.xlane.xlu1 %505  ;;  %v1847_v9 = vadd.f32 %v1827_v50, %v613_v3  ;;  %v586_v53 = vmul.f32 %v1446_v4, %v1729_v61 }
 0x167   : > { %v521_v60 = vpop.xlane.xlu0 %520  ;;  %1457 = vrsqrt.f32 %v560_v44  ;;  %v540_v11 = vmul.f32 0.125, %v506_v8  ;;  %v591_v14 = vmul.f32 %v1448_v5, %v1737_v6  ;;  %v1859_v23 = vadd.f32 %v1827_v50, %v606_v10 }
 0x168   : > { %v545_v12 = vmul.f32 0.125, %v521_v60  ;;  %1459 = vrsqrt.f32 %v553_v45  ;;  %676 = vrot.lane.b32.xlu1 %v1847_v9, %s1529_s16  ;;  %v609_v13 = vmul.f32 %v1820_v34, %v586_v53 }
 0x169   : > { %v1450_v15 = vpop.eup %1449  ;;  %v556_v18 = vadd.f32 1e-05, %v540_v11  ;;  %v614_v24 = vmul.f32 %v1820_v34, %v591_v14 }
 0x16a   : > { %v561_v19 = vadd.f32 1e-05, %v545_v12  ;;  %v1452_v20 = vpop.eup %1451  ;;  %v530_v21 = vpop.xlane.xlu1 %529  ;;  %v1856_v61 = vadd.f32 %v1827_v50, %v609_v13  ;;  %v594_v25 = vmul.f32 %v1450_v15, %v1739_v7 }
 0x16b   : > { %v509_v22 = vpop.xlane.xlu0 %508  ;;  %1461 = vrsqrt.f32 %v556_v18  ;;  %v548_v28 = vmul.f32 0.125, %v530_v21  ;;  %v587_v6 = vmul.f32 %v1452_v20, %v1748_v16  ;;  %v1870_v7 = vadd.f32 %v1827_v50, %v614_v24 }
 0x16c   : > { %v541_v29 = vmul.f32 0.125, %v509_v22  ;;  %1463 = vrsqrt.f32 %v561_v19  ;;  %709 = vrot.lane.b32.xlu0 %v1856_v61, %s1528_s21  ;;  %662 = vrot.lane.b32.xlu1 %v1859_v23, %s1529_s16  ;;  %v617_v43 = vmul.f32 %v1820_v34, %v594_v25 }
 0x16d   : > { %v1454_v30 = vpop.eup %1453  ;;  %v564_v31 = vadd.f32 1e-05, %v548_v28  ;;  %v610_v38 = vmul.f32 %v1820_v34, %v587_v6 }
 0x16e   : > { %v557_v35 = vadd.f32 1e-05, %v541_v29  ;;  %v1456_v32 = vpop.eup %1455  ;;  %v533_v42 = vpop.xlane.xlu1 %532  ;;  %v595_v16 = vmul.f32 %v1454_v30, %v1751_v17  ;;  %v640_v17 = vadd.f32 %v1827_v50, %v617_v43 }
 0x16f   : > { %1465 = vrsqrt.f32 %v564_v31  ;;  %v549_v46 = vmul.f32 0.125, %v533_v42  ;;  %v1875_v47 = vadd.f32 %v1827_v50, %v610_v38  ;;  %v584_v48 = vmul.f32 %v1456_v32, %v1760_v26 }
 0x170   : > { %1467 = vrsqrt.f32 %v557_v35  ;;  %678 = vrot.lane.b32.xlu1 %v1870_v7, %s1529_s16  ;;  %v618_v55 = vmul.f32 %v1820_v34, %v595_v16 }
 0x171   : > { %v1458_v49 = vpop.eup %1457  ;;  %v565_v36 = vadd.f32 1e-05, %v549_v46  ;;  %711 = vrot.lane.b32.xlu0 %v1875_v47, %s1528_s21  ;;  %v607_v52 = vmul.f32 %v1820_v34, %v584_v48 }
 0x172   : > { %v1460_v54 = vpop.eup %1459  ;;  %v592_v56 = vmul.f32 %v1458_v49, %v1763_v27  ;;  %v641_v0 = vadd.f32 %v1827_v50, %v618_v55 }
 0x173   : > { %1469 = vrsqrt.f32 %v565_v36  ;;  %v1887_v26 = vadd.f32 %v1827_v50, %v607_v52  ;;  %v585_v57 = vmul.f32 %v1460_v54, %v1772_v39 }
 0x174   : > { %725 = vrot.lane.b32.xlu1 %v640_v17, %s1528_s21  ;;  %v615_v1 = vmul.f32 %v1820_v34, %v592_v56 }
 0x175   : > { %v1462_v58 = vpop.eup %1461  ;;  %664 = vrot.lane.b32.xlu0 %v1887_v26, %s1529_s16  ;;  %v608_v59 = vmul.f32 %v1820_v34, %v585_v57 }
 0x176   : > { %v1464_v40 = vpop.eup %1463  ;;  %v588_v27 = vmul.f32 %v1462_v58, %v1775_v33  ;;  %v1906_v45 = vadd.f32 %v1827_v50, %v615_v1 }
 0x177   : > { %v1898_v2 = vadd.f32 %v1827_v50, %v608_v59  ;;  %v593_v39 = vmul.f32 %v1464_v40, %v1784_v51 }
 0x178   : > { %727 = vrot.lane.b32.xlu1 %v641_v0, %s1528_s21  ;;  %v611_v3 = vmul.f32 %v1820_v34, %v588_v27 }
 0x179   : > { %v1466_v4 = vpop.eup %1465  ;;  %666 = vrot.lane.b32.xlu0 %v1898_v2, %s1529_s16  ;;  %v616_v33 = vmul.f32 %v1820_v34, %v593_v39 }
 0x17a   : > { %v1468_v44 = vpop.eup %1467  ;;  %v1909_v5 = vadd.f32 %v1827_v50, %v611_v3  ;;  %v596_v8 = vmul.f32 %v1466_v4, %v1787_v37 }
 0x17b   : > { %v589_v51 = vmul.f32 %v1468_v44, %v1796_v63  ;;  %v1920_v10 = vadd.f32 %v1827_v50, %v616_v33 }
 0x17c   : > { %680 = vrot.lane.b32.xlu1 %v1906_v45, %s1529_s16  ;;  %v619_v11 = vmul.f32 %v1820_v34, %v596_v8 }
 0x17d   : > { %v1470_v60 = vpop.eup %1469  ;;  %713 = vrot.lane.b32.xlu0 %v1909_v5, %s1528_s21  ;;  %v612_v53 = vmul.f32 %v1820_v34, %v589_v51 }
 0x17e   : > { %v597_v12 = vmul.f32 %v1470_v60, %v1799_v41  ;;  %v642_v63 = vadd.f32 %v1827_v50, %v619_v11  ;;  %v1952_v41 = vpop.permute.xlu1 %733 }
 0x17f   : > { %v635_v37 = vadd.f32 %v1827_v50, %v612_v53 }
 0x180   : > { %682 = vrot.lane.b32.xlu1 %v1920_v10, %s1529_s16  ;;  %v620_v13 = vmul.f32 %v1820_v34, %v597_v12 }
 0x181   : > { %715 = vrot.lane.b32.xlu0 %v635_v37, %s1528_s21 }
 0x182   : > { %v643_v14 = vadd.f32 %v1827_v50, %v620_v13 }
 0x184   : > { %729 = vrot.lane.b32.xlu1 %v642_v63, %s1528_s21 }
 0x185   : > { %668 = vrot.lane.b32.xlu0 %v1856_v61, %s1529_s16 }
 0x188   : > { %731 = vrot.lane.b32.xlu1 %v643_v14, %s1528_s21 }
 0x189   : > { %670 = vrot.lane.b32.xlu0 %v1875_v47, %s1529_s16 }
 0x18c   : > { %684 = vrot.lane.b32.xlu1 %v640_v17, %s1529_s16 }
 0x18d   : > { %717 = vrot.lane.b32.xlu0 %v1847_v9, %s1528_s21 }
 0x190   : > { %686 = vrot.lane.b32.xlu1 %v641_v0, %s1529_s16 }
 0x191   : > { %719 = vrot.lane.b32.xlu0 %v1870_v7, %s1528_s21 }
 0x194   : > { %672 = vrot.lane.b32.xlu1 %v1909_v5, %s1529_s16 }
 0x195   : > { %688 = vrot.lane.b32.xlu0 %v642_v63, %s1529_s16 }
 0x198   : > { %674 = vrot.lane.b32.xlu1 %v635_v37, %s1529_s16 }
 0x199   : > { %690 = vrot.lane.b32.xlu0 %v643_v14, %s1529_s16 }
 0x19c   : > { %721 = vrot.lane.b32.xlu1 %v1906_v45, %s1528_s21 }
 0x19d   : > { %723 = vrot.lane.b32.xlu0 %v1920_v10, %s1528_s21 }
 0x1d6   : > { %v661_v34 = vpop.permute.xlu0 %660 }
 0x1d7   : > { %v748_v15 = vsel %vm388_vm0, 0.0, %v661_v34 }
 0x1da   : > { %v677_v50 = vpop.permute.xlu1 %676 }
 0x1db   : > { %v756_v28 = vsel %vm388_vm0, %v1856_v61, %v677_v50 }
 0x1de   : > { %v663_v18 = vpop.permute.xlu1 %662  ;;  %v710_v19 = vpop.permute.xlu0 %709 }
 0x1df   : > { %v765_v20 = vsel %vm764_vm1, %v748_v15, %v710_v19  ;;  %v749_v22 = vsel %vm388_vm0, 0.0, %v663_v18 }
 0x1e0   : > { %1347 = vmatprep.mubr.msk.f32.mxu0 %vm791_vm2, %v765_v20 }
 0x1e2   : > { %v679_v21 = vpop.permute.xlu1 %678 }
 0x1e3   : > { %v712_v24 = vpop.permute.xlu0 %711  ;;  %v757_v31 = vsel %vm388_vm0, %v1875_v47, %v679_v21 }
 0x1e4   : > { %v766_v25 = vsel %vm764_vm1, %v749_v22, %v712_v24 }
 0x1e5   : > { %1348 = vmatmul.mubr.msk.f32.vlgmr.msra.gmra.mrb[0].mxu0 %vm791_vm2, %v766_v25 }
 0x1e6   : > { %v726_v29 = vpop.permute.xlu1 %725 }
 0x1e7   : > { %v665_v6 = vpop.permute.xlu0 %664  ;;  %v773_v30 = vsel %vm764_vm1, %v756_v28, %v726_v29 }
 0x1e8   : > { %1359 = vmatprep.mubr.msk.f32.mxu1 %vm791_vm2, %v773_v30  ;;  %v750_v43 = vsel %vm388_vm0, 0.0, %v665_v6 }
 0x1ea   : > { %v728_v35 = vpop.permute.xlu1 %727 }
 0x1eb   : > { %v774_v38 = vsel %vm764_vm1, %v757_v31, %v728_v35  ;;  %v667_v32 = vpop.permute.xlu0 %666 }
 0x1ec   : > { %1360 = vmatmul.mubr.msk.f32.vlgmr.msra.gmra.mrb[0].mxu1 %vm791_vm2, %v774_v38  ;;  %v751_v48 = vsel %vm388_vm0, 0.0, %v667_v32 }
 0x1ee   : > { %v681_v42 = vpop.permute.xlu1 %680 }
 0x1ef   : > { %v714_v16 = vpop.permute.xlu0 %713  ;;  %v758_v36 = vsel %vm388_vm0, %v1909_v5, %v681_v42 }
 0x1f0   : > { %v767_v61 = vsel %vm764_vm1, %v750_v43, %v714_v16 }
 0x1f1   : > { %1350 = vmatprep.mubr.msk.f32.mxu0 %vm791_vm2, %v767_v61 }
 0x1f2   : > { %v683_v46 = vpop.permute.xlu1 %682 }
 0x1f3   : > { %v716_v49 = vpop.permute.xlu0 %715  ;;  %v759_v55 = vsel %vm388_vm0, %v635_v37, %v683_v46 }
 0x1f4   : > { %v768_v47 = vsel %vm764_vm1, %v751_v48, %v716_v49 }
 0x1f5   : > { %1351 = vmatmul.mubr.msk.f32.gmra.mrb[2].mxu0 %vm791_vm2, %v768_v47 }
 0x1f6   : > { %v730_v52 = vpop.permute.xlu1 %729 }
 0x1f7   : > { %v775_v54 = vsel %vm764_vm1, %v758_v36, %v730_v52  ;;  %v669_v17 = vpop.permute.xlu0 %668 }
 0x1f8   : > { %1362 = vmatprep.mubr.msk.f32.mxu1 %vm791_vm2, %v775_v54  ;;  %v752_v40 = vsel %vm388_vm0, %v1839_v62, %v669_v17 }
 0x1fa   : > { %v732_v56 = vpop.permute.xlu1 %731 }
 0x1fb   : > { %v776_v57 = vsel %vm764_vm1, %v759_v55, %v732_v56  ;;  %v671_v58 = vpop.permute.xlu0 %670 }
 0x1fc   : > { %1363 = vmatmul.mubr.msk.f32.gmra.mrb[2].mxu1 %vm791_vm2, %v776_v57  ;;  %v753_v4 = vsel %vm388_vm0, %v1859_v23, %v671_v58 }
 0x1fe   : > { %v685_v59 = vpop.permute.xlu1 %684 }
 0x1ff   : > { %v760_v0 = vsel %vm388_vm0, %v1847_v9, %v685_v59  ;;  %v718_v1 = vpop.permute.xlu0 %717 }
 0x200   : > { %v769_v27 = vsel %vm764_vm1, %v752_v40, %v718_v1  ;;  %v777_v39 = vsel %vm764_vm1, %v760_v0, %v1952_v41 }
 0x201   : > { %1353 = vmatprep.mubr.msk.f32.mxu0 %vm791_vm2, %v769_v27  ;;  %1365 = vmatprep.mubr.msk.f32.mxu1 %vm791_vm2, %v777_v39 }
 0x202   : > { %v687_v3 = vpop.permute.xlu1 %686 }
 0x203   : > { %v761_v62 = vsel %vm388_vm0, %v1870_v7, %v687_v3  ;;  %v720_v44 = vpop.permute.xlu0 %719 }
 0x204   : > { %v770_v9 = vsel %vm764_vm1, %v753_v4, %v720_v44  ;;  %v778_v5 = vsel %vm764_vm1, %v761_v62, %v1952_v41 }
 0x205   : > { %1354 = vmatmul.mubr.msk.f32.gmra.mrb[4].mxu0 %vm791_vm2, %v770_v9  ;;  %1366 = vmatmul.mubr.msk.f32.gmra.mrb[4].mxu1 %vm791_vm2, %v778_v5 }
 0x206   : > { %v673_v33 = vpop.permute.xlu1 %672 }
 0x207   : > { %v689_v8 = vpop.permute.xlu0 %688  ;;  %v754_v12 = vsel %vm388_vm0, %v1887_v26, %v673_v33 }
 0x208   : > { %v762_v51 = vsel %vm388_vm0, %v1906_v45, %v689_v8 }
 0x209   : > { %v779_v23 = vsel %vm764_vm1, %v762_v51, %v1952_v41 }
 0x20a   : > { %1368 = vmatprep.mubr.msk.f32.mxu1 %vm791_vm2, %v779_v23  ;;  %v675_v7 = vpop.permute.xlu1 %674 }
 0x20b   : > { %v691_v60 = vpop.permute.xlu0 %690  ;;  %v755_v37 = vsel %vm388_vm0, %v1898_v2, %v675_v7 }
 0x20c   : > { %v763_v53 = vsel %vm388_vm0, %v1920_v10, %v691_v60  ;;  %v2020_v10 = vld [vmem:[%s2141_s4] ss:$0 sm:$0xff] }
 0x20d   : > { %v780_v11 = vsel %vm764_vm1, %v763_v53, %v1952_v41 }
 0x20e   : > { %1369 = vmatmul.mubr.msk.f32.gmra.mrb[6].mxu1 %vm791_vm2, %v780_v11  ;;  %v722_v45 = vpop.permute.xlu1 %721 }
 0x20f   : > { %v771_v63 = vsel %vm764_vm1, %v754_v12, %v722_v45  ;;  %v724_v13 = vpop.permute.xlu0 %723 }
 0x210   : > { %v772_v14 = vsel %vm764_vm1, %v755_v37, %v724_v13  ;;  %1356 = vmatprep.mubr.msk.f32.mxu0 %vm791_vm2, %v771_v63 }
 0x211   : > { %1357 = vmatmul.mubr.msk.f32.gmra.mrb[6].mxu0 %vm791_vm2, %v772_v14 }
 0x2b8   : > { %v1349_v26 = vpop.f32.mrb[0].mxu0 }
 0x2b9   : > { %v912_v41 = vadd.f32 %v1349_v26, %v2020_v10  ;;  %v906_v34 = vpop.f32.mrb[1].mxu0 }
 0x2ba   : > { %v907_v2 = vadd.f32 %v2020_v10, %v906_v34 }
 0x2bb   : > { %987 = vst.msk [vmem:[%s2025_s18 + $0x8] sm:$0xff] %vm985_vm3, %v912_v41  ;;  %v1003_v50 = vsel %vm764_vm1, %v912_v41, 0.0 }
 0x2bc   : > { %986 = vst.msk [vmem:[%s2025_s18] sm:$0xff] %vm985_vm3, %v907_v2  ;;  %v1002_v15 = vsel %vm764_vm1, %v907_v2, 0.0 }
 0x2bd   : > { %v1004_v18 = vadd.f32 %v1003_v50, %v1002_v15 }
 0x2bf   : > { %v1361_v19 = vpop.f32.mrb[0].mxu1 }
 0x2c0   : > { %v952_v20 = vadd.f32 %v1361_v19, %v2020_v10  ;;  %v946_v21 = vpop.f32.mrb[1].mxu1 }
 0x2c1   : > { %v947_v22 = vadd.f32 %v2020_v10, %v946_v21 }
 0x2c2   : > { %995 = vst.msk [vmem:[%s2025_s18 + $0x48] sm:$0xff] %vm985_vm3, %v952_v20  ;;  %v1029_v24 = vsel %vm764_vm1, %v952_v20, 0.0 }
 0x2c3   : > { %994 = vst.msk [vmem:[%s2025_s18 + $0x40] sm:$0xff] %vm985_vm3, %v947_v22  ;;  %v1028_v25 = vsel %vm764_vm1, %v947_v22, 0.0 }
 0x2c4   : > { %v1030_v28 = vadd.f32 %v1029_v24, %v1028_v25 }
 0x2c8   : > { %v1352_v29 = vpop.f32.mrb[2].mxu0 }
 0x2c9   : > { %v922_v6 = vadd.f32 %v1352_v29, %v2020_v10  ;;  %v916_v30 = vpop.f32.mrb[3].mxu0 }
 0x2ca   : > { %v917_v31 = vadd.f32 %v2020_v10, %v916_v30 }
 0x2cb   : > { %989 = vst.msk [vmem:[%s2025_s18 + $0x18] sm:$0xff] %vm985_vm3, %v922_v6  ;;  %v1007_v32 = vsel %vm764_vm1, %v922_v6, 0.0 }
 0x2cc   : > { %988 = vst.msk [vmem:[%s2025_s18 + $0x10] sm:$0xff] %vm985_vm3, %v917_v31  ;;  %v1005_v35 = vsel %vm764_vm1, %v917_v31, 0.0 }
 0x2cd   : > { %v1006_v38 = vadd.f32 %v1005_v35, %v1004_v18 }
 0x2cf   : > { %v1008_v42 = vadd.f32 %v1007_v32, %v1006_v38  ;;  %v1364_v43 = vpop.f32.mrb[2].mxu1  ;;  %v1530_v32 = vmov (!%p1315_p13), 0.0  }
 0x2d0   : > { %v962_v16 = vadd.f32 %v1364_v43, %v2020_v10  ;;  %v956_v61 = vpop.f32.mrb[3].mxu1  ;;  %1059 = vst.msk [vmem:[%s1833_s13] sm:$0xf] (!%p1315_p13), %vm1058_vm4, %v1530_v32 }
 0x2d1   : > { %v1009_v46 = vrot.slane %v1008_v42, 4  ;;  %v957_v48 = vadd.f32 %v2020_v10, %v956_v61 }
 0x2d2   : > { %997 = vst.msk [vmem:[%s2025_s18 + $0x58] sm:$0xff] %vm985_vm3, %v962_v16  ;;  %v1033_v54 = vsel %vm764_vm1, %v962_v16, 0.0 }
 0x2d3   : > { %v1010_v49 = vadd.f32 %v1009_v46, %v1008_v42  ;;  %996 = vst.msk [vmem:[%s2025_s18 + $0x50] sm:$0xff] %vm985_vm3, %v957_v48  ;;  %v1031_v47 = vsel %vm764_vm1, %v957_v48, 0.0 }
 0x2d4   : > { %v1032_v36 = vadd.f32 %v1031_v47, %v1030_v28 }
 0x2d5   : > { %v1011_v52 = vrot.slane %v1010_v49, 2 }
 0x2d6   : > { %v1034_v17 = vadd.f32 %v1033_v54, %v1032_v36 }
 0x2d7   : > { %v1012_v55 = vadd.f32 %v1011_v52, %v1010_v49 }
 0x2d8   : > { %v1035_v56 = vrot.slane %v1034_v17, 4  ;;  %v1355_v57 = vpop.f32.mrb[4].mxu0  ;;  %v1367_v58 = vpop.f32.mrb[4].mxu1 }
 0x2d9   : > { %v1013_v59 = vrot.slane %v1012_v55, 1  ;;  %v932_v40 = vadd.f32 %v1355_v57, %v2020_v10  ;;  %v926_v0 = vpop.f32.mrb[5].mxu0  ;;  %v972_v1 = vadd.f32 %v1367_v58, %v2020_v10  ;;  %v966_v27 = vpop.f32.mrb[5].mxu1 }
 0x2da   : > { %v1036_v39 = vadd.f32 %v1035_v56, %v1034_v17  ;;  %v927_v3 = vadd.f32 %v2020_v10, %v926_v0  ;;  %v967_v4 = vadd.f32 %v2020_v10, %v966_v27 }
 0x2db   : > { %v1014_v62 = vadd.f32 %v1013_v59, %v1012_v55  ;;  %991 = vst.msk [vmem:[%s2025_s18 + $0x28] sm:$0xff] %vm985_vm3, %v932_v40  ;;  %v1016_v44 = vsel %vm764_vm1, %v932_v40, 0.0  ;;  %999 = vst.msk [vmem:[%s2025_s18 + $0x68] sm:$0xff] %vm985_vm3, %v972_v1  ;;  %v1042_v9 = vsel %vm764_vm1, %v972_v1, 0.0 }
 0x2dc   : > { %v1037_v5 = vrot.slane %v1036_v39, 2  ;;  %990 = vst.msk [vmem:[%s2025_s18 + $0x20] sm:$0xff] %vm985_vm3, %v927_v3  ;;  %v1015_v33 = vsel %vm764_vm1, %v927_v3, 0.0  ;;  %998 = vst.msk [vmem:[%s2025_s18 + $0x60] sm:$0xff] %vm985_vm3, %v967_v4  ;;  %v1041_v8 = vsel %vm764_vm1, %v967_v4, 0.0 }
 0x2dd   : > { %v1017_v51 = vadd.f32 %v1016_v44, %v1015_v33  ;;  %v1043_v23 = vadd.f32 %v1042_v9, %v1041_v8 }
 0x2de   : > { %v1038_v7 = vadd.f32 %v1037_v5, %v1036_v39 }
 0x2e0   : > { %v1039_v60 = vrot.slane %v1038_v7, 1 }
 0x2e1   : > { %v1370_v53 = vpop.f32.mrb[6].mxu1 }
 0x2e2   : > { %v1040_v11 = vadd.f32 %v1039_v60, %v1038_v7  ;;  %v982_v12 = vadd.f32 %v1370_v53, %v2020_v10  ;;  %v976_v45 = vpop.f32.mrb[7].mxu1 }
 0x2e3   : > { %v977_v37 = vadd.f32 %v2020_v10, %v976_v45 }
 0x2e4   : > { %1001 = vst.msk [vmem:[%s2025_s18 + $0x78] sm:$0xff] %vm985_vm3, %v982_v12  ;;  %v1358_v63 = vpop.f32.mrb[6].mxu0  ;;  %v1046_v2 = vsel %vm764_vm1, %v982_v12, 0.0 }
 0x2e5   : > { %1000 = vst.msk [vmem:[%s2025_s18 + $0x70] sm:$0xff] %vm985_vm3, %v977_v37  ;;  %v1044_v13 = vsel %vm764_vm1, %v977_v37, 0.0  ;;  %v942_v14 = vadd.f32 %v1358_v63, %v2020_v10  ;;  %v936_v26 = vpop.f32.mrb[7].mxu0 }
 0x2e6   : > { %v1045_v41 = vadd.f32 %v1044_v13, %v1043_v23  ;;  %v937_v34 = vadd.f32 %v2020_v10, %v936_v26 }
 0x2e7   : > { %993 = vst.msk [vmem:[%s2025_s18 + $0x38] sm:$0xff] %vm985_vm3, %v942_v14  ;;  %v1020_v20 = vsel %vm764_vm1, %v942_v14, 0.0 }
 0x2e8   : > { %v1047_v50 = vadd.f32 %v1046_v2, %v1045_v41  ;;  %992 = vst.msk [vmem:[%s2025_s18 + $0x30] sm:$0xff] %vm985_vm3, %v937_v34  ;;  %v1018_v15 = vsel %vm764_vm1, %v937_v34, 0.0 }
 0x2e9   : > { %v1019_v18 = vadd.f32 %v1018_v15, %v1017_v51 }
 0x2ea   : > { %v1048_v19 = vrot.slane %v1047_v50, 4 }
 0x2eb   : > { %v1021_v21 = vadd.f32 %v1020_v20, %v1019_v18 }
 0x2ec   : > { %v1049_v22 = vadd.f32 %v1048_v19, %v1047_v50 }
 0x2ed   : > { %v1022_v24 = vrot.slane %v1021_v21, 4 }
 0x2ee   : > { %v1050_v25 = vrot.slane %v1049_v22, 2 }
 0x2ef   : > { %v1023_v28 = vadd.f32 %v1022_v24, %v1021_v21 }
 0x2f0   : > { %v1051_v29 = vadd.f32 %v1050_v25, %v1049_v22 }
 0x2f1   : > { %v1024_v10 = vrot.slane %v1023_v28, 2  ;;  %1057 = sbr.rel (%p1315_p13) target bundleno = 760 (0x2f8), region = 82 }
 0x2f2   : > { %v1052_v6 = vrot.slane %v1051_v29, 1 }
 0x2f3   : > { %v1025_v30 = vadd.f32 %v1024_v10, %v1023_v28 }
 0x2f4   : > { %v1053_v31 = vadd.f32 %v1052_v6, %v1051_v29 }
 0x2f5   : > { %v1026_v35 = vrot.slane %v1025_v30, 1 }
 0x2f7   : > { %v1027_v38 = vadd.f32 %v1026_v35, %v1025_v30 }
 0x2f8 PF: > { %vm1065_vm5 = vcmask 1041409   ;;  %vm1067_vm6 = vcmask 1042434   ;;  %vm1069_vm7 = vcmask 1043459   ;;  %v1060_v42 = vld [vmem:[%s1833_s13] sm:$0xf]  ;;  %vm1073_vm8 = vcmask 125952  }
 0x2f9   : > { %v1066_v43 = vsel %vm1065_vm5, %v1027_v38, %v1014_v62  ;;  %1085 = sbr.rel (!%p1614_p6) target bundleno = 775 (0x307), region = 86  ;;  %s1317_s10 = sshll.u32 (%p1614_p6), %s1509_s23, 2  ;;  %v1148_v48 = vld [vmem:[%s2025_s18] sm:$0xff] (%p1614_p6)  ;;  %v1150_v49 = vld [vmem:[%s2025_s18 + $0x8] sm:$0xff] (%p1614_p6)  ;;  %v1152_v47 = vld [vmem:[%s2025_s18 + $0x10] sm:$0xff] (%p1614_p6) }
 0x2fa   : > { %v1068_v16 = vsel %vm1067_vm6, %v1040_v11, %v1066_v43  ;;  %s1318_s19 = sshll.u32 (%p1614_p6), %s1513_s24, 5  ;;  %v1154_v36 = vld [vmem:[%s2025_s18 + $0x18] sm:$0xff] (%p1614_p6)  ;;  %v1156_v52 = vld [vmem:[%s2025_s18 + $0x20] sm:$0xff] (%p1614_p6)  ;;  %v1158_v54 = vld [vmem:[%s2025_s18 + $0x28] sm:$0xff] (%p1614_p6) }
 0x2fb   : > { %v1070_v61 = vsel %vm1069_vm7, %v1053_v31, %v1068_v16  ;;  %s1088_s8 = sadd.s32 (%p1614_p6), %s1318_s19, %s1317_s10  ;;  %v1160_v17 = vld [vmem:[%s2025_s18 + $0x30] sm:$0xff] (%p1614_p6)  ;;  %v1162_v55 = vld [vmem:[%s2025_s18 + $0x38] sm:$0xff] (%p1614_p6)  ;;  %v1164_v56 = vld [vmem:[%s2025_s18 + $0x40] sm:$0xff] (%p1614_p6) }
 0x2fc   : > { %v1072_v46 = vadd.f32 %v1070_v61, %v1060_v42  ;;  %s1319_s20 = sshll.u32 (%p1614_p6), %s1088_s8, 3  ;;  %v1166_v57 = vld [vmem:[%s2025_s18 + $0x48] sm:$0xff] (%p1614_p6)  ;;  %v1168_v58 = vld [vmem:[%s2025_s18 + $0x50] sm:$0xff] (%p1614_p6)  ;;  %v1170_v59 = vld [vmem:[%s2025_s18 + $0x58] sm:$0xff] (%p1614_p6) }
 0x2fd   : > { %s1090_s9 = scalar_lea.vmem (%p1614_p6), %s2142_s5, %s1319_s20  ;;  %v1172_v40 = vld [vmem:[%s2025_s18 + $0x60] sm:$0xff] (%p1614_p6)  ;;  %v1174_v0 = vld [vmem:[%s2025_s18 + $0x68] sm:$0xff] (%p1614_p6)  ;;  %v1176_v1 = vld [vmem:[%s2025_s18 + $0x70] sm:$0xff] (%p1614_p6) }
 0x2fe   : > { %1074 = vst.msk [vmem:[%s1833_s13] sm:$0xf] %vm1073_vm8, %v1072_v46  ;;  %1149 = vst [vmem:[%s1090_s9] sm:$0xff] (%p1614_p6), %v1148_v48  ;;  %v1178_v27 = vld [vmem:[%s2025_s18 + $0x78] sm:$0xff] (%p1614_p6) }
 0x2ff   : > { %1151 = vst [vmem:[%s1090_s9 + $0x8] sm:$0xff] (%p1614_p6), %v1150_v49  ;;  %1153 = vst [vmem:[%s1090_s9 + $0x10] sm:$0xff] (%p1614_p6), %v1152_v47 }
 0x300   : > { %1155 = vst [vmem:[%s1090_s9 + $0x18] sm:$0xff] %v1154_v36  ;;  %1157 = vst [vmem:[%s1090_s9 + $0x40] sm:$0xff] %v1156_v52 }
 0x301   : > { %1159 = vst [vmem:[%s1090_s9 + $0x48] sm:$0xff] %v1158_v54  ;;  %1161 = vst [vmem:[%s1090_s9 + $0x50] sm:$0xff] %v1160_v17 }
 0x302   : > { %1163 = vst [vmem:[%s1090_s9 + $0x58] sm:$0xff] %v1162_v55  ;;  %1165 = vst [vmem:[%s1090_s9 + $0x80] sm:$0xff] %v1164_v56 }
 0x303   : > { %1167 = vst [vmem:[%s1090_s9 + $0x88] sm:$0xff] %v1166_v57  ;;  %1169 = vst [vmem:[%s1090_s9 + $0x90] sm:$0xff] %v1168_v58 }
 0x304   : > { %1171 = vst [vmem:[%s1090_s9 + $0x98] sm:$0xff] %v1170_v59  ;;  %1173 = vst [vmem:[%s1090_s9 + $0xc0] sm:$0xff] %v1172_v40 }
 0x305   : > { %1175 = vst [vmem:[%s1090_s9 + $0xc8] sm:$0xff] %v1174_v0  ;;  %1177 = vst [vmem:[%s1090_s9 + $0xd0] sm:$0xff] %v1176_v1 }
 0x306   : > { %1179 = vst [vmem:[%s1090_s9 + $0xd8] sm:$0xff] %v1178_v27 }
 0x307 PF: > { %s17_s27 = sadd.s32 1, %s1525_s27   ;;  %s2145_s21 = smov %s1505_s22 }
 0x308   : > { %p14_p0 = scmp.ge.s32.totalorder %s17_s27, 6   ;;  %s2146_s22 = smov %s1622_s12 }
 0x309   : > { %s2147_s23 = smov %s1517_s25  ;;  %s2148_s24 = smov %s1521_s26 }
 0x30a   : > { %s2149_s25 = smov %s2152_s28  ;;  %s2150_s26 = smov %s2156_s29 }
 0x30b   :  { %16 = sbr.rel (!%p14_p0) target bundleno = 4 (0x4), region = 167 }

// kernel: transformer_block_forward.3
= control target key start
LH: loop header
LB: loop body
LE: loop exit
PB: predicated region body
PF: predicated region fallthrough
CT: control target
= control target key end

     0   :  { %s4673_s0 = inlined_call_operand.vmem [shape: f32[2,4,8,8,32], index: 0, kind: input, shape index: {}]   ;;  %s4674_s1 = inlined_call_operand.vmem [shape: f32[2,4,2,8,16], index: 1, kind: input, shape index: {}]   ;;  %s4675_s2 = inlined_call_operand.vmem [shape: f32[2,4,2,8,16], index: 2, kind: input, shape index: {}]   ;;  %s4676_s3 = inlined_call_operand.vmem [shape: f32[2,4,9,16], index: 3, kind: input, shape index: {}]   ;;  %s4677_s4 = inlined_call_operand.vmem [shape: f32[1,16], index: 4, kind: input, shape index: {}]   ;;  %s4678_s5 = inlined_call_operand.vmem [shape: f32[48,8], index: 5, kind: input, shape index: {}]   ;;  %s4679_s6 = inlined_call_operand.vmem [shape: f32[1,8], index: 6, kind: input, shape index: {}]   ;;  %s4680_s7 = inlined_call_operand.vmem [shape: f32[2,4,8,8,8], index: 7, kind: input, shape index: {}]   ;;  %s4681_s8 = inlined_call_operand.vmem [shape: f32[2,4,8,8,8], index: 8, kind: output, shape index: {}]  }
   0x1   :  { %4794 = sst [smem:[#allocation109_spill]] %s4673_s0 }
   0x2   :  { %s2968_s27 = smov 0   ;;  %s2970_s28 = smov 0  }
   0x3   :  { %s2972_s29 = smov 0   ;;  %s2974_s30 = smov 0  }
   0x4   :  { %s2976_s9 = smov 0   ;;  %s2978_s10 = smov 0  }
   0x5   :  { %s2980_s11 = smov 0  }
   0x6 LB: > { %s27_s12 = sadd.s32 1, %s2909_s9  ;;  %s30_s13 = sadd.s32 1, %s2913_s10  ;;  %s2917_s11 = sphi %s2980_s11, %s18_s11   ;;  %s2913_s10 = sphi %s2978_s10, %s5085_s10   ;;  %s2909_s9 = sphi %s2976_s9, %s5084_s9   ;;  %s2905_s30 = sphi %s2974_s30, %s5083_s30   ;;  %s2901_s29 = sphi %s2972_s29, %s5082_s29   ;;  %s2897_s28 = sphi %s2970_s28, %s5081_s28   ;;  %s2893_s27 = sphi %s2968_s27, %s5080_s27  }
   0x7   : > { %p28_p0 = scmp.ge.s32.totalorder %s27_s12, 2  ;;  %s2671_s14 = sadd.s32 4294967295, %s2917_s11  }
   0x8   : > { %p46_p1 = scmp.ne.s32.totalorder %s2897_s28, %s2893_s27  ;;  %p47_p2 = scmp.eq.s32.totalorder %s2917_s11, 0 }
   0x9   : > { %s5087_s12 = smov (%p28_p0, %s27_s12), 0  ;;  %s5089_s13 = smov (!%p28_p0, %s30_s13), %s2913_s10 }
   0xa   : > { %p32_p3 = scmp.ge.s32.totalorder %s5089_s13, 2  ;;  %p251_p4 = scmp.eq.s32.totalorder %s2671_s14, 3 }
   0xb   : > { %s35_s15 = ssub.s32 %s2909_s9, %s5087_s12  ;;  %p3014_p5 = por %p47_p2, %p46_p1 }
   0xc   : > { %s5091_s13 = smov (%p32_p3, %s5089_s13), 0  ;;  %p3020_p6 = por %p251_p4, %p46_p1 }
   0xd   : > { %s34_s18 = ssub.s32 %s2913_s10, %s5091_s13  ;;  %s39_s20 = sadd.s32 1, %s2897_s28 }
   0xe   : > { %s36_s19 = sor.u32 %s35_s15, %s34_s18  ;;  %p2674_p8 = scmp.ge.s32.totalorder %s2917_s11, 4 }
   0xf   : > { %p37_p7 = scmp.eq.s32.totalorder %s36_s19, 0 }
  0x10   : > { %282 = sbr.rel (%p2674_p8) target bundleno = 72 (0x48), region = 28 }
  0x11   : > { %s3028_s21 = scalar_select %p37_p7, %s2897_s28, %s39_s20  }
  0x17   : > { %285 = sbr.rel (!%p3014_p5) target bundleno = 41 (0x29), region = 32  ;;  %s287_s22 = sand.u32 (%p3014_p5), 1, %s2897_s28  }
  0x18   : > { %s2676_s23 = sshll.u32 (%p3014_p5), %s2909_s9, 2  ;;  %s2675_s24 = sshll.u32 (%p3014_p5), %s287_s22, 7 }
  0x19   : > { %s2677_s25 = sshll.u32 (%p3014_p5), %s2913_s10, 5  ;;  %s4797_s0 = sld [smem:[#allocation109_spill]] (%p3014_p5) }
  0x1a   : > { %s292_s26 = sadd.s32 (%p3014_p5), %s2677_s25, %s2676_s23  ;;  %s289_s20 = scalar_lea.vmem (%p3014_p5), [#allocation2], %s2675_s24 }
  0x1b   : > { %s2678_s14 = sshll.u32 (%p3014_p5), %s292_s26, 3 }
  0x1f   : > { %s3039_s19 = scalar_lea.vmem %s4797_s0, %s2678_s14 }
  0x20   : > { %v352_v0 = vld [vmem:[%s3039_s19] sm:$0xff]  ;;  %v354_v1 = vld [vmem:[%s3039_s19 + $0x8] sm:$0xff]  ;;  %v356_v2 = vld [vmem:[%s3039_s19 + $0x10] sm:$0xff] }
  0x21   : > { %353 = vst [vmem:[%s289_s20] sm:$0xff] %v352_v0  ;;  %355 = vst [vmem:[%s289_s20 + $0x8] sm:$0xff] %v354_v1  ;;  %v358_v3 = vld [vmem:[%s3039_s19 + $0x18] sm:$0xff]  ;;  %v360_v4 = vld [vmem:[%s3039_s19 + $0x40] sm:$0xff] }
  0x22   : > { %357 = vst [vmem:[%s289_s20 + $0x10] sm:$0xff] %v356_v2  ;;  %v362_v5 = vld [vmem:[%s3039_s19 + $0x48] sm:$0xff]  ;;  %359 = vst [vmem:[%s289_s20 + $0x18] sm:$0xff] %v358_v3  ;;  %v364_v6 = vld [vmem:[%s3039_s19 + $0x50] sm:$0xff] }
  0x23   : > { %361 = vst [vmem:[%s289_s20 + $0x20] sm:$0xff] %v360_v4  ;;  %363 = vst [vmem:[%s289_s20 + $0x28] sm:$0xff] %v362_v5  ;;  %v366_v7 = vld [vmem:[%s3039_s19 + $0x58] sm:$0xff]  ;;  %v368_v8 = vld [vmem:[%s3039_s19 + $0x80] sm:$0xff] }
  0x24   : > { %365 = vst [vmem:[%s289_s20 + $0x30] sm:$0xff] %v364_v6  ;;  %367 = vst [vmem:[%s289_s20 + $0x38] sm:$0xff] %v366_v7  ;;  %v370_v9 = vld [vmem:[%s3039_s19 + $0x88] sm:$0xff]  ;;  %v372_v10 = vld [vmem:[%s3039_s19 + $0x90] sm:$0xff] }
  0x25   : > { %369 = vst [vmem:[%s289_s20 + $0x40] sm:$0xff] %v368_v8  ;;  %v374_v11 = vld [vmem:[%s3039_s19 + $0x98] sm:$0xff]  ;;  %371 = vst [vmem:[%s289_s20 + $0x48] sm:$0xff] %v370_v9  ;;  %v376_v12 = vld [vmem:[%s3039_s19 + $0xc0] sm:$0xff] }
  0x26   : > { %373 = vst [vmem:[%s289_s20 + $0x50] sm:$0xff] %v372_v10  ;;  %375 = vst [vmem:[%s289_s20 + $0x58] sm:$0xff] %v374_v11  ;;  %v378_v13 = vld [vmem:[%s3039_s19 + $0xc8] sm:$0xff]  ;;  %v380_v14 = vld [vmem:[%s3039_s19 + $0xd0] sm:$0xff] }
  0x27   : > { %377 = vst [vmem:[%s289_s20 + $0x60] sm:$0xff] %v376_v12  ;;  %379 = vst [vmem:[%s289_s20 + $0x68] sm:$0xff] %v378_v13  ;;  %v382_v15 = vld [vmem:[%s3039_s19 + $0xd8] sm:$0xff] }
  0x28   : > { %381 = vst [vmem:[%s289_s20 + $0x70] sm:$0xff] %v380_v14  ;;  %383 = vst [vmem:[%s289_s20 + $0x78] sm:$0xff] %v382_v15 }
  0x29 PF: > { %389 = sbr.rel (!%p3014_p5) target bundleno = 49 (0x31), region = 70  ;;  %s391_s22 = sand.u32 (%p3014_p5), 1, %s2897_s28  }
  0x2a   : > { %s2680_s23 = sshll.u32 (%p3014_p5), %s2913_s10, 3  ;;  %s2679_s24 = sshll.u32 (%p3014_p5), %s391_s22, 5 }
  0x2b   : > { %s395_s25 = sadd.s32 (%p3014_p5), %s2909_s9, %s2680_s23  ;;  %s393_s19 = scalar_lea.vmem (%p3014_p5), [#allocation3], %s2679_s24 }
  0x2c   : > { %s2681_s26 = sshll.u32 (%p3014_p5), %s395_s25, 3 }
  0x2d   : > { %s397_s18 = scalar_lea.vmem (%p3014_p5), %s4674_s1, %s2681_s26 }
  0x2e   : > { %v431_v16 = vld [vmem:[%s397_s18] sm:$0xff] (%p3014_p5)  ;;  %v433_v17 = vld [vmem:[%s397_s18 + $0x10] sm:$0xff] (%p3014_p5) }
  0x2f   : > { %v435_v18 = vld [vmem:[%s397_s18 + $0x20] sm:$0xff] (%p3014_p5)  ;;  %432 = vst [vmem:[%s393_s19] sm:$0xff] (%p3014_p5), %v431_v16  ;;  %434 = vst [vmem:[%s393_s19 + $0x8] sm:$0xff] (%p3014_p5), %v433_v17  ;;  %v437_v19 = vld [vmem:[%s397_s18 + $0x30] sm:$0xff] (%p3014_p5) }
  0x30   : > { %436 = vst [vmem:[%s393_s19 + $0x10] sm:$0xff] %v435_v18  ;;  %438 = vst [vmem:[%s393_s19 + $0x18] sm:$0xff] %v437_v19 }
  0x31 PF: > { %444 = sbr.rel (!%p3014_p5) target bundleno = 57 (0x39), region = 108  ;;  %s446_s20 = sand.u32 (%p3014_p5), 1, %s2897_s28  }
  0x32   : > { %s2683_s22 = sshll.u32 (%p3014_p5), %s2913_s10, 3  ;;  %s2682_s23 = sshll.u32 (%p3014_p5), %s446_s20, 5 }
  0x33   : > { %s450_s25 = sadd.s32 (%p3014_p5), %s2909_s9, %s2683_s22  ;;  %s448_s18 = scalar_lea.vmem (%p3014_p5), [#allocation4], %s2682_s23 }
  0x34   : > { %s2684_s26 = sshll.u32 (%p3014_p5), %s450_s25, 3 }
  0x35   : > { %s452_s24 = scalar_lea.vmem (%p3014_p5), %s4675_s2, %s2684_s26 }
  0x36   : > { %v486_v20 = vld [vmem:[%s452_s24] sm:$0xff] (%p3014_p5)  ;;  %v488_v21 = vld [vmem:[%s452_s24 + $0x10] sm:$0xff] (%p3014_p5) }
  0x37   : > { %v490_v22 = vld [vmem:[%s452_s24 + $0x20] sm:$0xff] (%p3014_p5)  ;;  %487 = vst [vmem:[%s448_s18] sm:$0xff] (%p3014_p5), %v486_v20  ;;  %489 = vst [vmem:[%s448_s18 + $0x8] sm:$0xff] (%p3014_p5), %v488_v21  ;;  %v492_v23 = vld [vmem:[%s452_s24 + $0x30] sm:$0xff] (%p3014_p5) }
  0x38   : > { %491 = vst [vmem:[%s448_s18 + $0x10] sm:$0xff] %v490_v22  ;;  %493 = vst [vmem:[%s448_s18 + $0x18] sm:$0xff] %v492_v23 }
  0x39 PF: > { %507 = sbr.rel (!%p3014_p5) target bundleno = 72 (0x48), region = 150  ;;  %s509_s19 = sand.u32 (%p3014_p5), 1, %s2897_s28  }
  0x3a   : > { %s2686_s20 = sshll.u32 (%p3014_p5), %s2909_s9, 2  ;;  %s2685_s22 = sshll.u32 (%p3014_p5), %s509_s19, 7 }
  0x3b   : > { %s2687_s25 = sshll.u32 (%p3014_p5), %s2913_s10, 5  ;;  %s511_s16 = scalar_lea.vmem (%p3014_p5), [#allocation5], %s2685_s22 }
  0x3c   : > { %s514_s26 = sadd.s32 (%p3014_p5), %s2687_s25, %s2686_s20 }
  0x3d   : > { %s2688_s14 = sshll.u32 (%p3014_p5), %s514_s26, 3 }
  0x3e   : > { %s3081_s0 = scalar_lea.vmem (%p3014_p5), %s4680_s7, %s2688_s14 }
  0x3f   : > { %v574_v24 = vld [vmem:[%s3081_s0] sm:$0xff] (%p3014_p5)  ;;  %v576_v25 = vld [vmem:[%s3081_s0 + $0x8] sm:$0xff] (%p3014_p5)  ;;  %v578_v26 = vld [vmem:[%s3081_s0 + $0x10] sm:$0xff] (%p3014_p5) }
  0x40   : > { %575 = vst [vmem:[%s511_s16] sm:$0xff] %v574_v24  ;;  %577 = vst [vmem:[%s511_s16 + $0x8] sm:$0xff] %v576_v25  ;;  %v580_v27 = vld [vmem:[%s3081_s0 + $0x18] sm:$0xff]  ;;  %v582_v28 = vld [vmem:[%s3081_s0 + $0x40] sm:$0xff] }
  0x41   : > { %579 = vst [vmem:[%s511_s16 + $0x10] sm:$0xff] %v578_v26  ;;  %v584_v29 = vld [vmem:[%s3081_s0 + $0x48] sm:$0xff]  ;;  %581 = vst [vmem:[%s511_s16 + $0x18] sm:$0xff] %v580_v27  ;;  %v586_v30 = vld [vmem:[%s3081_s0 + $0x50] sm:$0xff] }
  0x42   : > { %583 = vst [vmem:[%s511_s16 + $0x20] sm:$0xff] %v582_v28  ;;  %585 = vst [vmem:[%s511_s16 + $0x28] sm:$0xff] %v584_v29  ;;  %v588_v31 = vld [vmem:[%s3081_s0 + $0x58] sm:$0xff]  ;;  %v590_v32 = vld [vmem:[%s3081_s0 + $0x80] sm:$0xff] }
  0x43   : > { %587 = vst [vmem:[%s511_s16 + $0x30] sm:$0xff] %v586_v30  ;;  %589 = vst [vmem:[%s511_s16 + $0x38] sm:$0xff] %v588_v31  ;;  %v592_v33 = vld [vmem:[%s3081_s0 + $0x88] sm:$0xff]  ;;  %v594_v34 = vld [vmem:[%s3081_s0 + $0x90] sm:$0xff] }
  0x44   : > { %591 = vst [vmem:[%s511_s16 + $0x40] sm:$0xff] %v590_v32  ;;  %v596_v35 = vld [vmem:[%s3081_s0 + $0x98] sm:$0xff]  ;;  %593 = vst [vmem:[%s511_s16 + $0x48] sm:$0xff] %v592_v33  ;;  %v598_v36 = vld [vmem:[%s3081_s0 + $0xc0] sm:$0xff] }
  0x45   : > { %595 = vst [vmem:[%s511_s16 + $0x50] sm:$0xff] %v594_v34  ;;  %597 = vst [vmem:[%s511_s16 + $0x58] sm:$0xff] %v596_v35  ;;  %v600_v37 = vld [vmem:[%s3081_s0 + $0xc8] sm:$0xff]  ;;  %v602_v38 = vld [vmem:[%s3081_s0 + $0xd0] sm:$0xff] }
  0x46   : > { %599 = vst [vmem:[%s511_s16 + $0x60] sm:$0xff] %v598_v36  ;;  %601 = vst [vmem:[%s511_s16 + $0x68] sm:$0xff] %v600_v37  ;;  %v604_v39 = vld [vmem:[%s3081_s0 + $0xd8] sm:$0xff] }
  0x47   : > { %603 = vst [vmem:[%s511_s16 + $0x70] sm:$0xff] %v602_v38  ;;  %605 = vst [vmem:[%s511_s16 + $0x78] sm:$0xff] %v604_v39 }
  0x48 PF: > { %p2689_p9 = scmp.ge.s32.totalorder %s2917_s11, 1  ;;  %p610_p10 = scmp.lt.s32.totalorder %s2917_s11, 5 }
  0x4a   : > { %p611_p11 = pnand %p2689_p9, %p610_p10 }
  0x4c   : > { %614 = sbr.rel (%p611_p11) target bundleno = 674 (0x2a2), region = 188 }
  0x53   : > { %s617_s24 = sand.u32 1, %s2893_s27   ;;  %p688_p12 = scmp.lt.s32.totalorder %s2905_s30, 1  ;;  %v856_v40 = vlaneseq  ;;  %vm799_vm0 = vcmask 1040384   ;;  %vm984_vm1 = vcmask 1046528   ;;  %vm1145_vm2 = vcmask 1045504  }
  0x54   : > { %s3105_s18 = sshll.u32 %s617_s24, 7  ;;  %s2919_s20 = smov 112   ;;  %v3186_v6 = vld [vmem:[%s4677_s4] ss:$0 sm:$0xff]  ;;  %vm2130_vm3 = vcmask 130048   ;;  %vm2147_vm4 = vcmask 261120  }
  0x55   : > { %v3107_v41 = vshrl.u32 %v856_v40, 7  ;;  %s689_s0 = scalar_select %p688_p12, %s2905_s30, 1  ;;  %vm2177_vm5 = vcmask 392192   ;;  %vm2403_vm6 = vcmask 64512  }
  0x56   : > { %s3111_s19 = scalar_lea.vmem [#allocation2], %s3105_s18  ;;  %s2921_s16 = smov 32  }
  0x57   : > { %v695_v42 = vld [vmem:[%s3111_s19] sm:$0xff]  ;;  %v696_v43 = vld [vmem:[%s3111_s19 + $0x8] sm:$0xff]  ;;  %v3116_v44 = vsub.s32 0, %v3107_v41  ;;  %v3119_v45 = vsub.s32 1, %v3107_v41  ;;  %v3122_v46 = vsub.s32 2, %v3107_v41  ;;  %s2725_s22 = sshll.u32 %s689_s0, 6 }
  0x58   : > { %1962 = vrot.lane.b32.xlu0 %v695_v42, %s2919_s20  ;;  %1964 = vrot.lane.b32.xlu1 %v696_v43, %s2919_s20  ;;  %v3127_v47 = vsub.s32 4, %v3107_v41  ;;  %v752_v48 = vrot.slane %v695_v42, 7  ;;  %v703_v49 = vld [vmem:[%s3111_s19 + $0x40] sm:$0xff]  ;;  %s3133_s14 = scalar_lea.vmem %s4676_s3, %s2725_s22  ;;  %v3142_v52 = vsub.s32 3, %v3107_v41  ;;  %v3159_v58 = vsub.s32 5, %v3107_v41  ;;  %v3169_v61 = vld [vmem:[%s3111_s19 + $0x48] sm:$0xff] }
  0x59   : > { %v3136_v50 = vld [vmem:[%s3111_s19 + $0x20] sm:$0xff]  ;;  %v753_v60 = vrot.slane %v696_v43, 7  ;;  %v764_v5 = vrot.slane %v703_v49, 7  ;;  %v3204_v15 = vld [vmem:[%s3111_s19 + $0x28] sm:$0xff]  ;;  %v3253_v34 = vld [vmem:[%s3111_s19 + $0x10] sm:$0xff]  ;;  %s3637_s0 = sshll.u32 %s617_s24, 5 }
  0x5a   : > { %v3139_v51 = vld [vmem:[%s3133_s14] sm:$0xff]  ;;  %v801_v53 = vsel %vm799_vm0, 0.0, %v752_v48  ;;  %v825_v54 = vsel %vm799_vm0, %v752_v48, 0.0  ;;  %v758_v12 = vrot.slane %v3136_v50, 7  ;;  %v3214_v21 = vld [vmem:[%s3111_s19 + $0x68] sm:$0xff]  ;;  %v3269_v39 = vld [vmem:[%s3111_s19 + $0x50] sm:$0xff] }
  0x5b   : > { %v3148_v55 = vrot.slane %v3139_v51, %v3116_v44  ;;  %v3152_v56 = vrot.slane %v3139_v51, %v3119_v45  ;;  %v3156_v57 = vrot.slane %v3139_v51, %v3122_v46  ;;  %v3164_v59 = vrot.slane %v3139_v51, %v3127_v47  ;;  %v3176_v2 = vld [vmem:[%s3111_s19 + $0x60] sm:$0xff]  ;;  %v3356_v14 = vld [vmem:[%s3111_s19 + $0x70] sm:$0xff]  ;;  %s3708_s27 = scalar_lea.vmem [#allocation3], %s3637_s0  ;;  %s2922_s24 = smov 16  }
  0x5c   : > { %1978 = vrot.lane.b32.xlu0 %v703_v49, %s2919_s20  ;;  %1970 = vrot.lane.b32.xlu1 %v3136_v50, %s2919_s20  ;;  %v3180_v3 = vrot.slane %v3139_v51, %v3142_v52  ;;  %v3190_v7 = vrot.slane %v3139_v51, %v3159_v58  ;;  %v3208_v19 = vsel %vm799_vm0, 0.0, %v753_v60  ;;  %v3211_v20 = vld [vmem:[%s3133_s14 + $0x20] sm:$0xff]  ;;  %v3220_v23 = vsel %vm799_vm0, %v753_v60, 0.0  ;;  %v3344_v60 = vld [vmem:[%s3111_s19 + $0x58] sm:$0xff]  ;;  %s4181_s22 = scalar_lea.vmem [#allocation4], %s3637_s0  ;;  %s4567_s15 = scalar_lea.vmem [#allocation6], %s3105_s18 }
  0x5d   : > { %4798 = vst [vmem:[#allocation7_spill] sm:$0xff] %v3148_v55  ;;  %4799 = vst [vmem:[#allocation8_spill] sm:$0xff] %v3152_v56  ;;  %v873_v62 = vmul.f32 %v3148_v55, %v801_v53  ;;  %v922_v63 = vmul.f32 %v3152_v56, %v801_v53  ;;  %v923_v0 = vmul.f32 %v3152_v56, %v825_v54  ;;  %v3223_v24 = vsel %vm799_vm0, 0.0, %v764_v5  ;;  %s2721_s23 = sshll.u32 (%p3020_p6), %s2905_s30, 5 }
  0x5e   : > { %4800 = vst [vmem:[#allocation9_spill] sm:$0xff] %v3156_v57  ;;  %4801 = vst [vmem:[#allocation10_spill] sm:$0xff] %v3164_v59  ;;  %v1083_v1 = vmul.f32 %v3156_v57, %v801_v53  ;;  %v1084_v4 = vmul.f32 %v3156_v57, %v825_v54  ;;  %v3193_v10 = vmul.f32 %v3164_v59, %v801_v53  ;;  %v837_v25 = vsel %vm799_vm0, %v764_v5, 0.0 }
  0x5f   : > { %4802 = vst [vmem:[#allocation11_spill] sm:$0xff] %v3180_v3  ;;  %4803 = vst [vmem:[#allocation12_spill] sm:$0xff] %v3190_v7  ;;  %v988_v8 = vrot.slane %v922_v63, 1  ;;  %v989_v9 = vrot.slane %v923_v0, 1  ;;  %v889_v11 = vadd.f32 %v3186_v6, %v873_v62  ;;  %v3217_v22 = vmul.f32 %v3180_v3, %v801_v53 }
  0x60   : > { %4804 = vst [vmem:[#allocation13_spill] sm:$0xff] %v3193_v10  ;;  %1980 = vrot.lane.b32.xlu0 %v3169_v61, %s2919_s20  ;;  %1986 = vrot.lane.b32.xlu1 %v3176_v2, %s2919_s20  ;;  %v1149_v17 = vrot.slane %v1083_v1, 2  ;;  %v1150_v18 = vrot.slane %v1084_v4, 2  ;;  %4805 = vst [vmem:[#allocation14_spill] sm:$0xff] %v3208_v19  ;;  %v3227_v26 = vmul.f32 %v3164_v59, %v825_v54  ;;  %v3300_v1 = vld [vmem:[%s3111_s19 + $0x18] sm:$0xff]  ;;  %v831_v62 = vsel %vm799_vm0, %v758_v12, 0.0 }
  0x61   : > { %v990_v16 = vsel %vm984_vm1, %v988_v8, %v989_v9  ;;  %4806 = vst [vmem:[#allocation15_spill] sm:$0xff] %v3217_v22  ;;  %v3231_v28 = vmul.f32 %v3190_v7, %v801_v53  ;;  %v3234_v29 = vmul.f32 %v3190_v7, %v825_v54  ;;  %v3240_v31 = vmul.f32 %v3152_v56, %v3220_v23 }
  0x62   : > { %4807 = vst [vmem:[#allocation16_spill] sm:$0xff] %v3227_v26  ;;  %v1050_v30 = vadd.f32 %v990_v16, %v889_v11  ;;  %v3244_v32 = vmul.f32 %v3156_v57, %v3220_v23  ;;  %v3248_v33 = vrot.slane %v3211_v20, %v3119_v45  ;;  %v1151_v35 = vsel %vm1145_vm2, %v1149_v17, %v1150_v18  ;;  %v3306_v11 = vld [vmem:[%s3133_s14 + $0x10] sm:$0xff] }
  0x63   : > { %4808 = vst [vmem:[#allocation17_spill] sm:$0xff] %v3231_v28  ;;  %4809 = vst [vmem:[#allocation18_spill] sm:$0xff] %v3234_v29  ;;  %v3258_v36 = vmul.f32 %v3164_v59, %v3220_v23  ;;  %v3262_v37 = vmul.f32 %v3190_v7, %v3220_v23  ;;  %v3266_v38 = vrot.slane %v3211_v20, %v3116_v44  ;;  %v3309_v16 = vld [vmem:[%s3111_s19 + $0x30] sm:$0xff]  ;;  %v4827_v10 = vrot.slane %v3176_v2, 7 }
  0x64   : > { %1972 = vrot.lane.b32.xlu0 %v3204_v15, %s2919_s20  ;;  %4810 = vst [vmem:[#allocation19_spill] sm:$0xff] %v3240_v31  ;;  %4811 = vst [vmem:[#allocation20_spill] sm:$0xff] %v3244_v32  ;;  %1988 = vrot.lane.b32.xlu1 %v3214_v21, %s2919_s20  ;;  %v938_v40 = vmul.f32 %v3248_v33, %v3223_v24  ;;  %v939_v42 = vmul.f32 %v3248_v33, %v837_v25 }
  0x65   : > { %4812 = vst [vmem:[#allocation21_spill] sm:$0xff] %v3258_v36  ;;  %4813 = vst [vmem:[#allocation22_spill] sm:$0xff] %v3262_v37  ;;  %v3276_v43 = vrot.slane %v3211_v20, %v3122_v46  ;;  %v3280_v48 = vrot.slane %v3211_v20, %v3142_v52  ;;  %v881_v53 = vmul.f32 %v3266_v38, %v3223_v24  ;;  %v3387_v36 = vld [vmem:[%s3111_s19 + $0x38] sm:$0xff]  ;;  %v819_v26 = vsel %vm799_vm0, 0.0, %v4827_v10 }
  0x66   : > { %4814 = vst [vmem:[#allocation23_spill] sm:$0xff] %v3266_v38  ;;  %v3288_v54 = vrot.slane %v3211_v20, %v3127_v47  ;;  %v3302_v4 = vadd.f32 %v1151_v35, %v1050_v30  ;;  %v1012_v5 = vrot.slane %v938_v40, 1  ;;  %v1013_v8 = vrot.slane %v939_v42, 1 }
  0x67   : > { %v1099_v0 = vmul.f32 %v3276_v43, %v3223_v24  ;;  %v1100_v9 = vmul.f32 %v3276_v43, %v837_v25  ;;  %v3315_v63 = vmul.f32 %v3280_v48, %v3223_v24  ;;  %v3319_v30 = vrot.slane %v3211_v20, %v3159_v58 }
  0x68   : > { %1966 = vrot.lane.b32.xlu0 %v3253_v34, %s2919_s20  ;;  %1982 = vrot.lane.b32.xlu1 %v3269_v39, %s2919_s20  ;;  %4815 = vst [vmem:[#allocation24_spill] sm:$0xff] %v3302_v4  ;;  %v897_v35 = vadd.f32 %v3186_v6, %v881_v53  ;;  %v3324_v40 = vmul.f32 %v3288_v54, %v3223_v24  ;;  %v807_v42 = vsel %vm799_vm0, 0.0, %v758_v12 }
  0x69   : > { %4816 = vst [vmem:[#allocation25_spill] sm:$0xff] %v3315_v63  ;;  %v1173_v18 = vrot.slane %v1099_v0, 2  ;;  %v3331_v17 = vmul.f32 %v3288_v54, %v837_v25  ;;  %v3335_v50 = vrot.slane %v3306_v11, %v3116_v44  ;;  %v3339_v53 = vrot.slane %v3306_v11, %v3119_v45 }
  0x6a   : > { %4817 = vst [vmem:[#allocation26_spill] sm:$0xff] %v3324_v40  ;;  %v1014_v12 = vsel %vm984_vm1, %v1012_v5, %v1013_v8  ;;  %v1174_v27 = vrot.slane %v1100_v9, 2  ;;  %v3349_v0 = vrot.slane %v3306_v11, %v3122_v46  ;;  %v3353_v49 = vrot.slane %v3306_v11, %v3127_v47 }
  0x6b   : > { %4818 = vst [vmem:[#allocation27_spill] sm:$0xff] %v3331_v17  ;;  %4819 = vst [vmem:[#allocation28_spill] sm:$0xff] %v3335_v50  ;;  %v3359_v13 = vmul.f32 %v3319_v30, %v837_v25  ;;  %v877_v32 = vmul.f32 %v3335_v50, %v807_v42  ;;  %v930_v31 = vmul.f32 %v3339_v53, %v807_v42 }
  0x6c   : > { %1968 = vrot.lane.b32.xlu0 %v3300_v1, %s2919_s20  ;;  %1974 = vrot.lane.b32.xlu1 %v3309_v16, %s2919_s20  ;;  %v931_v5 = vmul.f32 %v3339_v53, %v831_v62  ;;  %v1091_v9 = vmul.f32 %v3349_v0, %v807_v42  ;;  %v1092_v63 = vmul.f32 %v3349_v0, %v831_v62 }
  0x6d   : > { %v3369_v38 = vrot.slane %v3306_v11, %v3142_v52  ;;  %v3376_v50 = vmul.f32 %v3319_v30, %v3223_v24  ;;  %v3379_v8 = vmul.f32 %v3353_v49, %v807_v42  ;;  %v3382_v37 = vmul.f32 %v3353_v49, %v831_v62  ;;  %v3396_v24 = vld [vmem:[%s3133_s14 + $0x30] sm:$0xff] }
  0x6e   : > { %v3389_v40 = vadd.f32 %v1014_v12, %v897_v35  ;;  %v1000_v4 = vrot.slane %v930_v31, 1  ;;  %v1001_v22 = vrot.slane %v931_v5, 1  ;;  %v3393_v25 = vrot.slane %v3306_v11, %v3159_v58 }
  0x6f   : > { %4820 = vst [vmem:[#allocation29_spill] sm:$0xff] %v3376_v50  ;;  %4821 = vst [vmem:[#allocation30_spill] sm:$0xff] %v3379_v8  ;;  %v3399_v50 = vld [vmem:[%s3111_s19 + $0x78] sm:$0xff]  ;;  %v3402_v17 = vsel %vm1145_vm2, %v1173_v18, %v1174_v27  ;;  %v893_v29 = vadd.f32 %v3186_v6, %v877_v32  ;;  %v4825_v35 = vrot.slane %v3169_v61, 7  ;;  %v1161_v12 = vrot.slane %v1091_v9, 2 }
  0x70   : > { %1984 = vrot.lane.b32.xlu0 %v3344_v60, %s2919_s20  ;;  %4822 = vst [vmem:[#allocation31_spill] sm:$0xff] %v3382_v37  ;;  %1990 = vrot.lane.b32.xlu1 %v3356_v14, %s2919_s20  ;;  %4823 = vst [vmem:[#allocation32_spill] sm:$0xff] %v3389_v40  ;;  %v1162_v5 = vrot.slane %v1092_v63, 2  ;;  %v3412_v40 = vmul.f32 %v3369_v38, %v807_v42  ;;  %v4828_v18 = vmov %v4827_v10 }
  0x71   : > { %4824 = vst [vmem:[#allocation33_spill] sm:$0xff] %v3402_v17  ;;  %v3409_v31 = vsel %vm799_vm0, 0.0, %v4825_v35  ;;  %v843_v35 = vsel %vm799_vm0, %v4828_v18, 0.0  ;;  %v3426_v63 = vrot.slane %v3396_v24, %v3116_v44  ;;  %v1002_v10 = vsel %vm984_vm1, %v1000_v4, %v1001_v22 }
  0x72   : > { %4826 = vst [vmem:[#allocation34_spill] sm:$0xff] %v3412_v40  ;;  %v3432_v9 = vmul.f32 %v3393_v25, %v807_v42  ;;  %v3436_v27 = vrot.slane %v3396_v24, %v3119_v45  ;;  %v3440_v2 = vrot.slane %v3396_v24, %v3122_v46  ;;  %v3443_v18 = vmul.f32 %v3393_v25, %v831_v62 }
  0x73   : > { %4829 = vst [vmem:[#allocation35_spill] sm:$0xff] %v3426_v63  ;;  %v4831_v44 = vrot.slane %v3169_v61, 7  ;;  %v885_v22 = vmul.f32 %v3426_v63, %v819_v26  ;;  %v3453_v4 = vrot.slane %v3396_v24, %v3127_v47  ;;  %v3459_v28 = vadd.f32 %v1002_v10, %v893_v29 }
  0x74   : > { %1976 = vrot.lane.b32.xlu0 %v3387_v36, %s2919_s20  ;;  %1992 = vrot.lane.b32.xlu1 %v3399_v50, %s2919_s20  ;;  %4830 = vst [vmem:[#allocation36_spill] sm:$0xff] %v3432_v9  ;;  %v946_v45 = vmul.f32 %v3436_v27, %v819_v26  ;;  %v947_v42 = vmul.f32 %v3436_v27, %v843_v35  ;;  %v2920_v63 = vmov 0.0  }
  0x75   : > { %v3448_v32 = vsel %vm799_vm0, %v4831_v44, 0.0  ;;  %4832 = vst [vmem:[#allocation37_spill] sm:$0xff] %v3453_v4  ;;  %v1107_v46 = vmul.f32 %v3440_v2, %v819_v26  ;;  %v1108_v62 = vmul.f32 %v3440_v2, %v843_v35  ;;  %4833 = vst [vmem:[#allocation38_spill] sm:$0xff] %v3459_v28  ;;  %v3462_v61 = vsel %vm1145_vm2, %v1161_v12, %v1162_v5 }
  0x76   : > { %4834 = vst [vmem:[#allocation39_spill] sm:$0xff] %v3462_v61  ;;  %v3466_v44 = vmul.f32 %v3248_v33, %v3448_v32  ;;  %v3470_v47 = vmul.f32 %v3276_v43, %v3448_v32  ;;  %v3475_v40 = vmul.f32 %v3288_v54, %v3448_v32  ;;  %v1024_v29 = vrot.slane %v946_v45, 1 }
  0x77   : > { %v1025_v10 = vrot.slane %v947_v42, 1  ;;  %v3479_v12 = vrot.slane %v3396_v24, %v3142_v52  ;;  %v901_v5 = vadd.f32 %v3186_v6, %v885_v22  ;;  %v3483_v61 = vmul.f32 %v3453_v4, %v819_v26 }
  0x78   : > { %4835 = vst [vmem:[#allocation40_spill] sm:$0xff] %v3466_v44  ;;  %4836 = vst [vmem:[#allocation41_spill] sm:$0xff] %v3470_v47  ;;  %2115 = vrot.lane.b32.xlu1 %v2920_v63, %s2921_s16  ;;  %v3487_v28 = vrot.slane %v3396_v24, %v3159_v58  ;;  %v759_v63 = vrot.slane %v3204_v15, 7  ;;  %v1185_v17 = vrot.slane %v1107_v46, 2  ;;  %v1186_v9 = vrot.slane %v1108_v62, 2 }
  0x79   : > { %4837 = vst [vmem:[#allocation42_spill] sm:$0xff] %v3479_v12  ;;  %4838 = vst [vmem:[#allocation43_spill] sm:$0xff] %v3483_v61  ;;  %v3491_v45 = vmul.f32 %v3453_v4, %v843_v35  ;;  %v771_v42 = vrot.slane %v3214_v21, 7  ;;  %v3498_v8 = vmul.f32 %v3319_v30, %v3448_v32  ;;  %v1026_v58 = vsel %vm984_vm1, %v1024_v29, %v1025_v10 }
  0x7a   : > { %4839 = vst [vmem:[#allocation44_spill] sm:$0xff] %v3487_v28  ;;  %v3504_v46 = vmul.f32 %v3479_v12, %v819_v26  ;;  %v3507_v62 = vsel %vm799_vm0, %v759_v63, 0.0  ;;  %v3511_v22 = vmul.f32 %v3487_v28, %v843_v35  ;;  %v754_v29 = vrot.slane %v3253_v34, 7 }
  0x7b   : > { %4840 = vst [vmem:[#allocation45_spill] sm:$0xff] %v3491_v45  ;;  %v3514_v52 = vsel %vm799_vm0, %v771_v42, 0.0  ;;  %v3517_v10 = vadd.f32 %v1026_v58, %v901_v5  ;;  %v3520_v37 = vsel %vm1145_vm2, %v1185_v17, %v1186_v9  ;;  %v3525_v47 = vmul.f32 %v3339_v53, %v3507_v62 }
  0x7c   : > { %4841 = vst [vmem:[#allocation46_spill] sm:$0xff] %v3504_v46  ;;  %4842 = vst [vmem:[#allocation47_spill] sm:$0xff] %v3511_v22  ;;  %v3528_v21 = vmul.f32 %v3487_v28, %v819_v26  ;;  %v3531_v35 = vsel %vm799_vm0, 0.0, %v759_v63  ;;  %v3535_v34 = vmul.f32 %v3349_v0, %v3507_v62  ;;  %v3539_v17 = vmul.f32 %v3353_v49, %v3507_v62 }
  0x7d   : > { %4843 = vst [vmem:[#allocation48_spill] sm:$0xff] %v3514_v52  ;;  %4844 = vst [vmem:[#allocation49_spill] sm:$0xff] %v3517_v10  ;;  %v3542_v9 = vsel %vm799_vm0, 0.0, %v771_v42  ;;  %v3546_v5 = vmul.f32 %v3436_v27, %v3514_v52  ;;  %v3550_v26 = vmul.f32 %v3440_v2, %v3514_v52  ;;  %v3554_v63 = vmul.f32 %v3453_v4, %v3514_v52 }
  0x7e   : > { %4845 = vst [vmem:[#allocation50_spill] sm:$0xff] %v3520_v37  ;;  %4846 = vst [vmem:[#allocation51_spill] sm:$0xff] %v3525_v47  ;;  %v3559_v15 = vmul.f32 %v3393_v25, %v3507_v62  ;;  %v3562_v42 = vsel %vm799_vm0, 0.0, %v754_v29  ;;  %v3565_v44 = vsel %vm799_vm0, %v754_v29, 0.0  ;;  %v766_v10 = vrot.slane %v3269_v39, 7 }
  0x7f   : > { %4847 = vst [vmem:[#allocation52_spill] sm:$0xff] %v3528_v21  ;;  %4848 = vst [vmem:[#allocation53_spill] sm:$0xff] %v3535_v34  ;;  %v3570_v37 = vmul.f32 %v3152_v56, %v3565_v44  ;;  %v755_v58 = vrot.slane %v3300_v1, 7  ;;  %v3582_v29 = vmul.f32 %v3164_v59, %v3565_v44  ;;  %v3589_v1 = vmul.f32 %v3487_v28, %v3514_v52 }
  0x80   : > { %4849 = vst [vmem:[#allocation54_spill] sm:$0xff] %v3539_v17  ;;  %4850 = vst [vmem:[#allocation55_spill] sm:$0xff] %v3542_v9  ;;  %v3578_v9 = vmul.f32 %v3156_v57, %v3565_v44  ;;  %v3593_v46 = vmul.f32 %v3190_v7, %v3565_v44  ;;  %v3599_v34 = vsub.s32 7, %v3107_v41  ;;  %v760_v12 = vrot.slane %v3309_v16, 7 }
  0x81   : > { %4851 = vst [vmem:[#allocation56_spill] sm:$0xff] %v3546_v5  ;;  %4852 = vst [vmem:[#allocation57_spill] sm:$0xff] %v3550_v26  ;;  %v3604_v39 = vsel %vm799_vm0, %v766_v10, 0.0  ;;  %v3607_v26 = vsel %vm799_vm0, %v755_v58, 0.0  ;;  %v767_v5 = vrot.slane %v3344_v60, 7 }
  0x82   : > { %4853 = vst [vmem:[#allocation58_spill] sm:$0xff] %v3554_v63  ;;  %4854 = vst [vmem:[#allocation59_spill] sm:$0xff] %v3559_v15  ;;  %v3596_v15 = vsel %vm799_vm0, 0.0, %v755_v58  ;;  %v3617_v16 = vmul.f32 %v3248_v33, %v3604_v39  ;;  %v3621_v47 = vmul.f32 %v3276_v43, %v3604_v39  ;;  %v3625_v58 = vmul.f32 %v3288_v54, %v3604_v39 }
  0x83   : > { %4855 = vst [vmem:[#allocation60_spill] sm:$0xff] %v3562_v42  ;;  %4856 = vst [vmem:[#allocation61_spill] sm:$0xff] %v3570_v37  ;;  %v3629_v60 = vmul.f32 %v3319_v30, %v3604_v39  ;;  %v3645_v63 = vmul.f32 %v3164_v59, %v3607_v26  ;;  %v3653_v37 = vrot.slane %v3139_v51, %v3599_v34  ;;  %v3666_v17 = vsel %vm799_vm0, %v767_v5, 0.0 }
  0x84   : > { %4857 = vst [vmem:[#allocation62_spill] sm:$0xff] %v3578_v9  ;;  %4858 = vst [vmem:[#allocation63_spill] sm:$0xff] %v3582_v29  ;;  %v3649_v9 = vmul.f32 %v3190_v7, %v3596_v15  ;;  %v3660_v29 = vsel %vm799_vm0, %v760_v12, 0.0  ;;  %v3698_v21 = vmul.f32 %v3288_v54, %v3666_v17 }
  0x85   : > { %4859 = vst [vmem:[#allocation64_spill] sm:$0xff] %v3589_v1  ;;  %4860 = vst [vmem:[#allocation65_spill] sm:$0xff] %v3593_v46  ;;  %v3613_v1 = vsel %vm799_vm0, 0.0, %v766_v10  ;;  %v3633_v10 = vmul.f32 %v3164_v59, %v3596_v15  ;;  %v3641_v46 = vmul.f32 %v3180_v3, %v3596_v15  ;;  %v3675_v52 = vmul.f32 %v3339_v53, %v3660_v29 }
  0x86   : > { %4861 = vst [vmem:[#allocation66_spill] sm:$0xff] %v3596_v15  ;;  %4862 = vst [vmem:[#allocation67_spill] sm:$0xff] %v3607_v26  ;;  %v3679_v22 = vmul.f32 %v3349_v0, %v3660_v29  ;;  %v3686_v15 = vmul.f32 %v3353_v49, %v3660_v29  ;;  %v3703_v61 = vmul.f32 %v3393_v25, %v3660_v29 }
  0x87   : > { %4863 = vst [vmem:[#allocation68_spill] sm:$0xff] %v3617_v16  ;;  %4864 = vst [vmem:[#allocation69_spill] sm:$0xff] %v3621_v47  ;;  %v772_v47 = vrot.slane %v3356_v14, 7  ;;  %v761_v16 = vrot.slane %v3387_v36, 7  ;;  %v3721_v14 = vmul.f32 %v3319_v30, %v3666_v17  ;;  %v3725_v36 = vrot.slane %v3211_v20, %v3599_v34 }
  0x88   : > { %4865 = vst [vmem:[#allocation70_spill] sm:$0xff] %v3625_v58  ;;  %4866 = vst [vmem:[#allocation71_spill] sm:$0xff] %v3629_v60  ;;  %v3657_v60 = vmul.f32 %v3190_v7, %v3607_v26 }
  0x89   : > { %4867 = vst [vmem:[#allocation72_spill] sm:$0xff] %v3633_v10  ;;  %4868 = vst [vmem:[#allocation73_spill] sm:$0xff] %v3641_v46  ;;  %v3663_v46 = vsel %vm799_vm0, 0.0, %v767_v5  ;;  %v3728_v10 = vsel %vm799_vm0, 0.0, %v761_v16 }
  0x8a   : > { %4869 = vst [vmem:[#allocation74_spill] sm:$0xff] %v3645_v63  ;;  %4870 = vst [vmem:[#allocation75_spill] sm:$0xff] %v3649_v9  ;;  %v3671_v9 = vmul.f32 %v3653_v37, %v3607_v26  ;;  %v3690_v26 = vsel %vm799_vm0, 0.0, %v760_v12  ;;  %v3694_v45 = vmul.f32 %v3288_v54, %v3663_v46  ;;  %v711_v12 = vld [vmem:[%s3708_s27] sm:$0xff]  ;;  %v3716_v5 = vmul.f32 %v3280_v48, %v3663_v46 }
  0x8b   : > { %4871 = vst [vmem:[#allocation76_spill] sm:$0xff] %v3653_v37  ;;  %4872 = vst [vmem:[#allocation77_spill] sm:$0xff] %v3657_v60  ;;  %v3748_v63 = vsel %vm799_vm0, %v761_v16, 0.0  ;;  %v3752_v58 = vmul.f32 %v3319_v30, %v3663_v46 }
  0x8c   : > { %4873 = vst [vmem:[#allocation78_spill] sm:$0xff] %v3663_v46  ;;  %4874 = vst [vmem:[#allocation79_spill] sm:$0xff] %v3666_v17  ;;  %v3769_v16 = vmul.f32 %v3353_v49, %v3748_v63  ;;  %v3777_v46 = vsel %vm799_vm0, 0.0, %v772_v47  ;;  %v3785_v60 = vmul.f32 %v3393_v25, %v3748_v63 }
  0x8d   : > { %4875 = vst [vmem:[#allocation80_spill] sm:$0xff] %v3671_v9  ;;  %4876 = vst [vmem:[#allocation81_spill] sm:$0xff] %v3675_v52  ;;  %v751_v52 = vrot.slane %v711_v12, 7 }
  0x8e   : > { %4877 = vst [vmem:[#allocation82_spill] sm:$0xff] %v3679_v22  ;;  %4878 = vst [vmem:[#allocation83_spill] sm:$0xff] %v3686_v15  ;;  %v3733_v22 = vsel %vm799_vm0, %v772_v47, 0.0  ;;  %v3793_v47 = vmul.f32 %v3369_v38, %v3728_v10 }
  0x8f   : > { %4879 = vst [vmem:[#allocation84_spill] sm:$0xff] %v3694_v45  ;;  %4880 = vst [vmem:[#allocation85_spill] sm:$0xff] %v3698_v21  ;;  %v3745_v15 = vmul.f32 %v3440_v2, %v3733_v22  ;;  %v3756_v12 = vmul.f32 %v3453_v4, %v3733_v22  ;;  %v3760_v45 = vmul.f32 %v3353_v49, %v3728_v10 }
  0x90   : > { %4881 = vst [vmem:[#allocation86_spill] sm:$0xff] %v3703_v61  ;;  %4882 = vst [vmem:[#allocation87_spill] sm:$0xff] %v3716_v5  ;;  %v3737_v61 = vmul.f32 %v3725_v36, %v3666_v17  ;;  %v3741_v5 = vmul.f32 %v3436_v27, %v3733_v22  ;;  %v3764_v21 = vrot.slane %v3306_v11, %v3599_v34 }
  0x91   : > { %4883 = vst [vmem:[#allocation88_spill] sm:$0xff] %v3721_v14  ;;  %4884 = vst [vmem:[#allocation89_spill] sm:$0xff] %v3728_v10  ;;  %v3774_v17 = vrot.slane %v3396_v24, %v3599_v34  ;;  %v3781_v9 = vmul.f32 %v3487_v28, %v3733_v22  ;;  %v800_v14 = vsel %vm799_vm0, 0.0, %v751_v52  ;;  %v824_v34 = vsel %vm799_vm0, %v751_v52, 0.0 }
  0x92   : > { %4885 = vst [vmem:[#allocation90_spill] sm:$0xff] %v3733_v22  ;;  %4886 = vst [vmem:[#allocation91_spill] sm:$0xff] %v3737_v61  ;;  %v3803_v28 = vmul.f32 %v3764_v21, %v3748_v63  ;;  %v1081_v52 = vmul.f32 %v3156_v57, %v800_v14  ;;  %v3824_v22 = vsub.s32 6, %v3107_v41 }
  0x93   : > { %4887 = vst [vmem:[#allocation92_spill] sm:$0xff] %v3741_v5  ;;  %4888 = vst [vmem:[#allocation93_spill] sm:$0xff] %v3745_v15  ;;  %v920_v15 = vmul.f32 %v3152_v56, %v800_v14 }
  0x94   : > { %4889 = vst [vmem:[#allocation94_spill] sm:$0xff] %v3748_v63  ;;  %4890 = vst [vmem:[#allocation95_spill] sm:$0xff] %v3752_v58  ;;  %v773_v58 = vrot.slane %v3399_v50, 7  ;;  %v872_v50 = vmul.f32 %v3148_v55, %v800_v14  ;;  %v3837_v41 = vrot.slane %v3139_v51, %v3824_v22  ;;  %v4916_v55 = vld [vmem:[#allocation26_spill] sm:$0xff] }
  0x95   : > { %4891 = vst [vmem:[#allocation96_spill] sm:$0xff] %v3756_v12  ;;  %4892 = vst [vmem:[#allocation97_spill] sm:$0xff] %v3760_v45  ;;  %v921_v45 = vmul.f32 %v3152_v56, %v824_v34  ;;  %v4908_v56 = vld [vmem:[#allocation18_spill] sm:$0xff] }
  0x96   : > { %4893 = vst [vmem:[#allocation98_spill] sm:$0xff] %v3769_v16  ;;  %4894 = vst [vmem:[#allocation99_spill] sm:$0xff] %v3777_v46  ;;  %v3799_v46 = vmul.f32 %v3393_v25, %v3728_v10  ;;  %v3814_v5 = vsel %vm799_vm0, %v773_v58, 0.0  ;;  %v888_v4 = vadd.f32 %v3186_v6, %v872_v50  ;;  %v985_v16 = vrot.slane %v920_v15, 1 }
  0x97   : > { %4895 = vst [vmem:[#allocation100_spill] sm:$0xff] %v3781_v9  ;;  %4896 = vst [vmem:[#allocation101_spill] sm:$0xff] %v3785_v60  ;;  %v3811_v9 = vsel %vm799_vm0, 0.0, %v773_v58  ;;  %v986_v12 = vrot.slane %v921_v45, 1  ;;  %v1658_v60 = vmul.f32 %v3653_v37, %v3208_v19  ;;  %v1659_v58 = vmul.f32 %v3653_v37, %v3220_v23 }
  0x98   : > { %4897 = vst [vmem:[#allocation102_spill] sm:$0xff] %v3793_v47  ;;  %4898 = vst [vmem:[#allocation103_spill] sm:$0xff] %v3799_v46  ;;  %v3817_v47 = vld [vmem:[%s3133_s14 + $0x8] ss:$0 sm:$0xff]  ;;  %v1082_v46 = vmul.f32 %v3156_v57, %v824_v34 }
  0x99   : > { %4899 = vst [vmem:[#allocation104_spill] sm:$0xff] %v3803_v28  ;;  %4900 = vst [vmem:[#allocation105_spill] sm:$0xff] %v3811_v9  ;;  %v1818_v50 = vmul.f32 %v3817_v47, %v3208_v19  ;;  %v1819_v15 = vmul.f32 %v3817_v47, %v3220_v23  ;;  %v987_v14 = vsel %vm984_vm1, %v985_v16, %v986_v12  ;;  %v1722_v45 = vrot.slane %v1658_v60, 1  ;;  %v4904_v23 = vld [vmem:[#allocation16_spill] sm:$0xff]  ;;  %v4906_v12 = vld [vmem:[#allocation13_spill] sm:$0xff] }
  0x9a   : > { %4901 = vst [vmem:[#allocation106_spill] sm:$0xff] %v3814_v5  ;;  %4902 = vst [vmem:[#allocation107_spill] sm:$0xff] %v3817_v47  ;;  %v1146_v5 = vrot.slane %v1081_v52, 2  ;;  %v1147_v63 = vrot.slane %v1082_v46, 2  ;;  %v1723_v34 = vrot.slane %v1659_v58, 1  ;;  %v1049_v10 = vadd.f32 %v987_v14, %v888_v4  ;;  %v4910_v58 = vld [vmem:[#allocation17_spill] sm:$0xff] }
  0x9b   : > { %4903 = vst [vmem:[#allocation108_spill] sm:$0xff] %v3837_v41  ;;  %v1882_v52 = vrot.slane %v1818_v50, 2  ;;  %v1883_v46 = vrot.slane %v1819_v15, 2  ;;  %v1610_v9 = vmul.f32 %v3837_v41, %v3208_v19  ;;  %v4905_v28 = vrot.slane %v4904_v23, 1 }
  0x9c   : > { %v1148_v61 = vsel %vm1145_vm2, %v1146_v5, %v1147_v63  ;;  %v1724_v57 = vsel %vm984_vm1, %v1722_v45, %v1723_v34  ;;  %v4907_v16 = vrot.slane %v4906_v12, 1  ;;  %v4909_v60 = vrot.slane %v4908_v56, 2  ;;  %v4912_v34 = vld [vmem:[#allocation15_spill] sm:$0xff] }
  0x9d   : > { %v4911_v4 = vrot.slane %v4910_v58, 2  ;;  %v1210_v63 = vadd.f32 %v1148_v61, %v1049_v10  ;;  %v1884_v5 = vsel %vm1145_vm2, %v1882_v52, %v1883_v46  ;;  %v1611_v50 = vmul.f32 %v3837_v41, %v3562_v42  ;;  %v713_v10 = vld [vmem:[%s3708_s27 + $0x10] sm:$0xff] }
  0x9e   : > { %v1356_v51 = vsel %vm984_vm1, %v4907_v16, %v4905_v28  ;;  %v1660_v15 = vmul.f32 %v3653_v37, %v3562_v42  ;;  %v1661_v45 = vmul.f32 %v3653_v37, %v3565_v44  ;;  %v1820_v28 = vmul.f32 %v3817_v47, %v3562_v42 }
  0x9f   : > { %v1516_v14 = vsel %vm1145_vm2, %v4911_v4, %v4909_v60  ;;  %v1821_v56 = vmul.f32 %v3817_v47, %v3565_v44  ;;  %v1243_v61 = vmul.f32 %v3180_v3, %v3208_v19  ;;  %v1258_v52 = vadd.f32 %v4912_v34, %v1210_v63  ;;  %v4913_v4 = vld [vmem:[#allocation24_spill] sm:$0xff] }
  0xa0   : > { %v1725_v46 = vrot.slane %v1660_v15, 1  ;;  %v1292_v23 = vmul.f32 %v3164_v59, %v3208_v19  ;;  %v1452_v12 = vmul.f32 %v3190_v7, %v3208_v19  ;;  %v1726_v16 = vrot.slane %v1661_v45, 1  ;;  %v4914_v15 = vld [vmem:[#allocation27_spill] sm:$0xff]  ;;  %v4918_v45 = vld [vmem:[#allocation29_spill] sm:$0xff] }
  0xa1   : > { %v1885_v60 = vrot.slane %v1820_v28, 2  ;;  %v1886_v58 = vrot.slane %v1821_v56, 2  ;;  %v1259_v41 = vadd.f32 %v1243_v61, %v4913_v4  ;;  %v1418_v37 = vadd.f32 %v1356_v51, %v1258_v52  ;;  %v4919_v19 = vld [vmem:[#allocation21_spill] sm:$0xff]  ;;  %v4921_v52 = vld [vmem:[#allocation22_spill] sm:$0xff] }
  0xa2   : > { %v1357_v44 = vrot.slane %v1292_v23, 1  ;;  %v1517_v47 = vrot.slane %v1452_v12, 2  ;;  %v763_v42 = vrot.slane %v713_v10, 7  ;;  %v1727_v3 = vsel %vm984_vm1, %v1725_v46, %v1726_v16 }
  0xa3   : > { %v1887_v63 = vsel %vm1145_vm2, %v1885_v60, %v1886_v58  ;;  %v4915_v34 = vrot.slane %v4914_v15, 1  ;;  %v4917_v59 = vrot.slane %v4916_v55, 1  ;;  %v1538_v28 = vrot.slane %v4918_v45, 2  ;;  %v4923_v55 = vld [vmem:[#allocation23_spill] sm:$0xff] }
  0xa4   : > { %v1578_v56 = vadd.f32 %v1516_v14, %v1418_v37  ;;  %v4920_v61 = vrot.slane %v4919_v19, 1  ;;  %v4922_v10 = vrot.slane %v4921_v52, 2  ;;  %v812_v23 = vsel %vm799_vm0, 0.0, %v763_v42 }
  0xa5   : > { %v1380_v7 = vsel %vm984_vm1, %v4917_v59, %v4915_v34  ;;  %v836_v16 = vsel %vm799_vm0, %v763_v42, 0.0  ;;  %v880_v60 = vmul.f32 %v4923_v55, %v812_v23  ;;  %v936_v59 = vmul.f32 %v3248_v33, %v812_v23 }
  0xa6   : > { %v1359_v51 = vsel %vm984_vm1, %v1357_v44, %v4920_v61  ;;  %v1519_v46 = vsel %vm1145_vm2, %v1517_v47, %v4922_v10  ;;  %v1626_v58 = vadd.f32 %v1610_v9, %v1578_v56  ;;  %v937_v37 = vmul.f32 %v3248_v33, %v836_v16  ;;  %v3895_v44 = vld [vmem:[%s3133_s14 + $0x28] ss:$0 sm:$0xff] }
  0xa7   : > { %v1419_v12 = vadd.f32 %v1359_v51, %v1259_v41  ;;  %v1097_v19 = vmul.f32 %v3276_v43, %v812_v23  ;;  %v1098_v14 = vmul.f32 %v3276_v43, %v836_v16  ;;  %v896_v47 = vadd.f32 %v3186_v6, %v880_v60 }
  0xa8   : > { %v1009_v41 = vrot.slane %v936_v59, 1  ;;  %v4924_v42 = vrot.slane %v3359_v13, 2  ;;  %v1786_v34 = vadd.f32 %v1724_v57, %v1626_v58  ;;  %v1010_v45 = vrot.slane %v937_v37, 1 }
  0xa9   : > { %v1579_v4 = vadd.f32 %v1519_v46, %v1419_v12  ;;  %v1170_v9 = vrot.slane %v1097_v19, 2  ;;  %v1171_v56 = vrot.slane %v1098_v14, 2  ;;  %v3903_v51 = vrot.slane %v3211_v20, %v3824_v22  ;;  %v712_v46 = vld [vmem:[%s3708_s27 + $0x8] sm:$0xff]  ;;  %v4925_v14 = vld [vmem:[#allocation31_spill] sm:$0xff] }
  0xaa   : > { %v1540_v15 = vsel %vm1145_vm2, %v1538_v28, %v4924_v42  ;;  %v1674_v52 = vmul.f32 %v3725_v36, %v3409_v31  ;;  %v1675_v10 = vmul.f32 %v3725_v36, %v3448_v32  ;;  %v3910_v23 = vadd.f32 %v1884_v5, %v1786_v34 }
  0xab   : > { %v1627_v61 = vadd.f32 %v1611_v50, %v1579_v4  ;;  %v1011_v13 = vsel %vm984_vm1, %v1009_v41, %v1010_v45  ;;  %v1172_v57 = vsel %vm1145_vm2, %v1170_v9, %v1171_v56  ;;  %v1834_v50 = vmul.f32 %v3895_v44, %v3409_v31  ;;  %v4927_v41 = vld [vmem:[#allocation30_spill] sm:$0xff] }
  0xac   : > { %v1057_v12 = vadd.f32 %v1011_v13, %v896_v47  ;;  %v1618_v20 = vmul.f32 %v3903_v51, %v3409_v31  ;;  %v1746_v16 = vrot.slane %v1674_v52, 1  ;;  %v1747_v60 = vrot.slane %v1675_v10, 1  ;;  %v4929_v47 = vld [vmem:[#allocation36_spill] sm:$0xff] }
  0xad   : > { %v1787_v28 = vadd.f32 %v1727_v3, %v1627_v61  ;;  %v1835_v59 = vmul.f32 %v3895_v44, %v3448_v32  ;;  %v1906_v5 = vrot.slane %v1834_v50, 2  ;;  %v757_v58 = vrot.slane %v712_v46, 7  ;;  %v4930_v61 = vld [vmem:[#allocation25_spill] sm:$0xff]  ;;  %v3937_v50 = vld [vmem:[%s3133_s14 + $0x18] ss:$0 sm:$0xff] }
  0xae   : > { %v1218_v19 = vadd.f32 %v1172_v57, %v1057_v12  ;;  %v4926_v4 = vrot.slane %v4925_v14, 1  ;;  %v4928_v42 = vrot.slane %v4927_v41, 1  ;;  %v1526_v34 = vrot.slane %v4929_v47, 2 }
  0xaf   : > { %v3920_v37 = vadd.f32 %v1887_v63, %v1787_v28  ;;  %v1748_v45 = vsel %vm984_vm1, %v1746_v16, %v1747_v60  ;;  %v1907_v9 = vrot.slane %v1835_v59, 2  ;;  %v806_v56 = vsel %vm799_vm0, 0.0, %v757_v58  ;;  %v4931_v63 = vld [vmem:[#allocation28_spill] sm:$0xff] }
  0xb0   : > { %v1368_v3 = vsel %vm984_vm1, %v4928_v42, %v4926_v4  ;;  %v830_v32 = vsel %vm799_vm0, %v757_v58, 0.0  ;;  %v1266_v52 = vadd.f32 %v4930_v61, %v1218_v19  ;;  %v876_v10 = vmul.f32 %v4931_v63, %v806_v56 }
  0xb1   : > { %v928_v46 = vmul.f32 %v3339_v53, %v806_v56  ;;  %v929_v13 = vmul.f32 %v3339_v53, %v830_v32  ;;  %v1908_v57 = vsel %vm1145_vm2, %v1906_v5, %v1907_v9  ;;  %v1089_v28 = vmul.f32 %v3349_v0, %v806_v56 }
  0xb2   : > { %v1090_v12 = vmul.f32 %v3349_v0, %v830_v32  ;;  %v4932_v16 = vrot.slane %v3443_v18, 2  ;;  %v1426_v59 = vadd.f32 %v1380_v7, %v1266_v52  ;;  %v892_v58 = vadd.f32 %v3186_v6, %v876_v10 }
  0xb3   : > { %v997_v19 = vrot.slane %v928_v46, 1  ;;  %v998_v14 = vrot.slane %v929_v13, 1  ;;  %v1158_v4 = vrot.slane %v1089_v28, 2  ;;  %v3947_v5 = vrot.slane %v3306_v11, %v3824_v22  ;;  %v4933_v13 = vld [vmem:[#allocation32_spill] sm:$0xff]  ;;  %v4934_v28 = vld [vmem:[#allocation33_spill] sm:$0xff] }
  0xb4   : > { %v1528_v60 = vsel %vm1145_vm2, %v1526_v34, %v4932_v16  ;;  %v1159_v41 = vrot.slane %v1090_v12, 2  ;;  %v1666_v42 = vmul.f32 %v3764_v21, %v3531_v35  ;;  %v1586_v47 = vadd.f32 %v1540_v15, %v1426_v59 }
  0xb5   : > { %v999_v9 = vsel %vm984_vm1, %v997_v19, %v998_v14  ;;  %v1667_v18 = vmul.f32 %v3764_v21, %v3507_v62  ;;  %v1826_v7 = vmul.f32 %v3937_v50, %v3531_v35  ;;  %v1614_v32 = vmul.f32 %v3947_v5, %v3531_v35 }
  0xb6   : > { %v1053_v34 = vadd.f32 %v999_v9, %v892_v58  ;;  %v1160_v56 = vsel %vm1145_vm2, %v1158_v4, %v1159_v41  ;;  %v1734_v11 = vrot.slane %v1666_v42, 1  ;;  %v1634_v61 = vadd.f32 %v1618_v20, %v1586_v47 }
  0xb7   : > { %v1735_v52 = vrot.slane %v1667_v18, 1  ;;  %v1827_v15 = vmul.f32 %v3937_v50, %v3507_v62  ;;  %v1894_v10 = vrot.slane %v1826_v7, 2  ;;  %v1219_v12 = vadd.f32 %v4934_v28, %v4933_v13  ;;  %v4935_v62 = vld [vmem:[#allocation34_spill] sm:$0xff] }
  0xb8   : > { %v1214_v46 = vadd.f32 %v1160_v56, %v1053_v34  ;;  %v1251_v16 = vmul.f32 %v3280_v48, %v3409_v31  ;;  %v1308_v59 = vmul.f32 %v3288_v54, %v3409_v31  ;;  %v1794_v58 = vadd.f32 %v1748_v45, %v1634_v61  ;;  %v714_v34 = vld [vmem:[%s3708_s27 + $0x18] sm:$0xff] }
  0xb9   : > { %v1736_v19 = vsel %vm984_vm1, %v1734_v11, %v1735_v52  ;;  %v1895_v20 = vrot.slane %v1827_v15, 2  ;;  %v1468_v14 = vmul.f32 %v3319_v30, %v3409_v31  ;;  %v1542_v47 = vrot.slane %v3498_v8, 2 }
  0xba   : > { %v1262_v4 = vadd.f32 %v4935_v62, %v1214_v46  ;;  %v1267_v41 = vadd.f32 %v1251_v16, %v1219_v12  ;;  %v1381_v42 = vrot.slane %v1308_v59, 1  ;;  %v3972_v9 = vadd.f32 %v1908_v57, %v1794_v58  ;;  %v4937_v58 = vld [vmem:[#allocation45_spill] sm:$0xff] }
  0xbb   : > { %v1896_v18 = vsel %vm1145_vm2, %v1894_v10, %v1895_v20  ;;  %v1541_v7 = vrot.slane %v1468_v14, 2  ;;  %v1619_v45 = vmul.f32 %v3903_v51, %v3613_v1  ;;  %v4936_v11 = vrot.slane %v3475_v40, 1  ;;  %v4939_v14 = vld [vmem:[#allocation43_spill] sm:$0xff] }
  0xbc   : > { %v1422_v56 = vadd.f32 %v1368_v3, %v1262_v4  ;;  %v1676_v52 = vmul.f32 %v3725_v36, %v3613_v1  ;;  %v1677_v8 = vmul.f32 %v3725_v36, %v3604_v39  ;;  %v1836_v10 = vmul.f32 %v3895_v44, %v3613_v1 }
  0xbd   : > { %v1383_v61 = vsel %vm984_vm1, %v1381_v42, %v4936_v11  ;;  %v1543_v15 = vsel %vm1145_vm2, %v1541_v7, %v1542_v47  ;;  %v1837_v46 = vmul.f32 %v3895_v44, %v3604_v39  ;;  %v769_v28 = vrot.slane %v714_v34, 7  ;;  %v4941_v34 = vld [vmem:[#allocation35_spill] sm:$0xff] }
  0xbe   : > { %v1427_v57 = vadd.f32 %v1383_v61, %v1267_v41  ;;  %v1582_v3 = vadd.f32 %v1528_v60, %v1422_v56  ;;  %v1749_v13 = vrot.slane %v1676_v52, 1  ;;  %v1750_v40 = vrot.slane %v1677_v8, 1 }
  0xbf   : > { %v1909_v16 = vrot.slane %v1836_v10, 2  ;;  %v1910_v59 = vrot.slane %v1837_v46, 2  ;;  %v4938_v20 = vrot.slane %v4937_v58, 1  ;;  %v4940_v62 = vrot.slane %v4939_v14, 1  ;;  %v4947_v14 = vld [vmem:[#allocation55_spill] sm:$0xff] }
  0xc0   : > { %v1587_v12 = vadd.f32 %v1543_v15, %v1427_v57  ;;  %v1630_v41 = vadd.f32 %v1614_v32, %v1582_v3  ;;  %v1751_v42 = vsel %vm984_vm1, %v1749_v13, %v1750_v40  ;;  %v818_v47 = vsel %vm799_vm0, 0.0, %v769_v28  ;;  %v4005_v15 = vld [vmem:[%s3133_s14 + $0x38] ss:$0 sm:$0xff]  ;;  %s4560_s14 = scalar_lea.vmem [#allocation5], %s3105_s18  ;;  %s2720_s18 = sshll.u32 (%p3020_p6), %s2901_s29, 2 }
  0xc1   : > { %v1392_v4 = vsel %vm984_vm1, %v4940_v62, %v4938_v20  ;;  %v842_v39 = vsel %vm799_vm0, %v769_v28, 0.0  ;;  %v1911_v7 = vsel %vm1145_vm2, %v1909_v16, %v1910_v59  ;;  %v884_v56 = vmul.f32 %v4941_v34, %v818_v47  ;;  %4942 = vst [vmem:[#allocation16_spill] sm:$0xff] %v4005_v15  ;;  %s2429_s17 = sadd.s32 (%p3020_p6), %s2721_s23, %s2720_s18 }
  0xc2   : > { %v1635_v60 = vadd.f32 %v1619_v45, %v1587_v12  ;;  %v944_v11 = vmul.f32 %v3436_v27, %v818_v47  ;;  %v1790_v61 = vadd.f32 %v1736_v19, %v1630_v41  ;;  %v945_v52 = vmul.f32 %v3436_v27, %v842_v39  ;;  %v4943_v45 = vld [vmem:[#allocation52_spill] sm:$0xff]  ;;  %v4944_v19 = vld [vmem:[#allocation47_spill] sm:$0xff]  ;;  %s2722_s0 = sshll.u32 (%p3020_p6), %s2429_s17, 3 }
  0xc3   : > { %v1105_v8 = vmul.f32 %v3440_v2, %v818_v47  ;;  %v1106_v32 = vmul.f32 %v3440_v2, %v842_v39  ;;  %v900_v10 = vadd.f32 %v3186_v6, %v884_v56  ;;  %v1550_v3 = vrot.slane %v4943_v45, 2  ;;  %s2431_s20 = scalar_lea.vmem (%p3020_p6), %s4681_s8, %s2722_s0 }
  0xc4   : > { %v1795_v57 = vadd.f32 %v1751_v42, %v1635_v60  ;;  %v1021_v46 = vrot.slane %v944_v11, 1  ;;  %v1950_v13 = vadd.f32 %v1896_v18, %v1790_v61  ;;  %v1022_v40 = vrot.slane %v945_v52, 1  ;;  %v4948_v18 = vld [vmem:[#allocation48_spill] sm:$0xff]  ;;  %v4949_v52 = vld [vmem:[#allocation38_spill] sm:$0xff] }
  0xc5   : > { %v1182_v28 = vrot.slane %v1105_v8, 2  ;;  %v1183_v12 = vrot.slane %v1106_v32, 2  ;;  %v4945_v59 = vrot.slane %v4944_v19, 2  ;;  %v4014_v20 = vrot.slane %v3396_v24, %v3824_v22  ;;  %v4950_v8 = vld [vmem:[#allocation39_spill] sm:$0xff] }
  0xc6   : > { %v1955_v16 = vadd.f32 %v1911_v7, %v1795_v57  ;;  %v1682_v62 = vmul.f32 %v3774_v17, %v4947_v14  ;;  %v1023_v6 = vsel %vm984_vm1, %v1021_v46, %v1022_v40  ;;  %v1683_v42 = vmul.f32 %v3774_v17, %v4948_v18 }
  0xc7   : > { %v1552_v58 = vsel %vm1145_vm2, %v1550_v3, %v4945_v59  ;;  %4946 = vst [vmem:[#allocation13_spill] sm:$0xff] %v4014_v20  ;;  %v1184_v41 = vsel %vm1145_vm2, %v1182_v28, %v1183_v12  ;;  %v1842_v47 = vmul.f32 %v4005_v15, %v4947_v14  ;;  %v1061_v39 = vadd.f32 %v1023_v6, %v900_v10 }
  0xc8   : > { %v1622_v60 = vmul.f32 %v4014_v20, %v4947_v14  ;;  %v1758_v7 = vrot.slane %v1682_v62, 1  ;;  %v1843_v24 = vmul.f32 %v4005_v15, %v4948_v18  ;;  %v1759_v11 = vrot.slane %v1683_v42, 1  ;;  %v4954_v62 = vld [vmem:[#allocation59_spill] sm:$0xff] }
  0xc9   : > { %v1918_v61 = vrot.slane %v1842_v47, 2  ;;  %v1215_v32 = vadd.f32 %v4950_v8, %v4949_v52  ;;  %v1247_v57 = vmul.f32 %v3369_v38, %v3531_v35  ;;  %v1222_v45 = vadd.f32 %v1184_v41, %v1061_v39  ;;  %v4957_v8 = vld [vmem:[#allocation54_spill] sm:$0xff] }
  0xca   : > { %v1963_v22 = vpop.permute.xlu0 %1962  ;;  %v1965_v56 = vpop.permute.xlu1 %1964  ;;  %v1919_v3 = vrot.slane %v1843_v24, 2  ;;  %v1760_v40 = vsel %vm984_vm1, %v1758_v7, %v1759_v11  ;;  %v1300_v12 = vmul.f32 %v3353_v49, %v3531_v35  ;;  %v1460_v19 = vmul.f32 %v3393_v25, %v3531_v35 }
  0xcb   : > { %v4033_v46 = vmul.f32 %v1963_v22, %v3910_v23  ;;  %v4036_v10 = vmul.f32 %v1965_v56, %v3920_v37  ;;  %v1263_v28 = vadd.f32 %v1247_v57, %v1215_v32  ;;  %v4953_v23 = vld [vmem:[#allocation46_spill] sm:$0xff]  ;;  %v1530_v6 = vrot.slane %v4954_v62, 2 }
  0xcc   : > { %v1270_v59 = vadd.f32 %v4953_v23, %v1222_v45  ;;  %v1920_v37 = vsel %vm1145_vm2, %v1918_v61, %v1919_v3  ;;  %v1615_v41 = vmul.f32 %v3947_v5, %v3690_v26  ;;  %v1369_v42 = vrot.slane %v1300_v12, 1  ;;  %v4959_v23 = vld [vmem:[#allocation49_spill] sm:$0xff] }
  0xcd   : > { %4951 = vst [vmem:[#allocation18_spill] sm:$0xff] %v4033_v46  ;;  %4952 = vst [vmem:[#allocation17_spill] sm:$0xff] %v4036_v10  ;;  %2042 = vrot.lane.b32.xlu0 %v4033_v46, %s2922_s24  ;;  %v1529_v47 = vrot.slane %v1460_v19, 2  ;;  %v1668_v39 = vmul.f32 %v3764_v21, %v3690_v26  ;;  %v1669_v7 = vmul.f32 %v3764_v21, %v3660_v29  ;;  %v4958_v32 = vrot.slane %v4957_v8, 1 }
  0xce   : > { %v1979_v18 = vpop.permute.xlu0 %1978  ;;  %v1971_v22 = vpop.permute.xlu1 %1970  ;;  %v1430_v56 = vadd.f32 %v1392_v4, %v1270_v59  ;;  %v1828_v11 = vmul.f32 %v3937_v50, %v3690_v26  ;;  %v1829_v61 = vmul.f32 %v3937_v50, %v3660_v29  ;;  %v4960_v59 = vld [vmem:[#allocation50_spill] sm:$0xff] }
  0xcf   : > { %v4055_v24 = vmul.f32 %v1979_v18, %v3972_v9  ;;  %v4061_v52 = vmul.f32 %v1971_v22, %v1950_v13  ;;  %v1371_v57 = vsel %vm984_vm1, %v1369_v42, %v4958_v32  ;;  %v1531_v45 = vsel %vm1145_vm2, %v1529_v47, %v1530_v6  ;;  %v4961_v18 = vld [vmem:[#allocation42_spill] sm:$0xff]  ;;  %v4962_v6 = vld [vmem:[#allocation37_spill] sm:$0xff] }
  0xd0   : > { %v1737_v3 = vrot.slane %v1668_v39, 1  ;;  %v1590_v9 = vadd.f32 %v1552_v58, %v1430_v56  ;;  %v1423_v4 = vadd.f32 %v1371_v57, %v1263_v28  ;;  %v1738_v12 = vrot.slane %v1669_v7, 1  ;;  %v4965_v57 = vld [vmem:[#allocation64_spill] sm:$0xff] }
  0xd1   : > { %4955 = vst [vmem:[#allocation15_spill] sm:$0xff] %v4055_v24  ;;  %4956 = vst [vmem:[#allocation24_spill] sm:$0xff] %v4061_v52  ;;  %2058 = vrot.lane.b32.xlu1 %v4055_v24, %s2922_s24  ;;  %2044 = vrot.lane.b32.xlu0 %v4036_v10, %s2922_s24  ;;  %v1897_v19 = vrot.slane %v1828_v11, 2  ;;  %v1898_v13 = vrot.slane %v1829_v61, 2  ;;  %v1223_v62 = vadd.f32 %v4960_v59, %v4959_v23  ;;  %v4964_v11 = vld [vmem:[#allocation44_spill] sm:$0xff]  ;;  %v4969_v23 = vld [vmem:[#allocation90_spill] sm:$0xff] }
  0xd2   : > { %v1981_v29 = vpop.permute.xlu0 %1980  ;;  %v1255_v42 = vmul.f32 %v4961_v18, %v4947_v14  ;;  %v1316_v47 = vmul.f32 %v4962_v6, %v4947_v14  ;;  %v1638_v22 = vadd.f32 %v1622_v60, %v1590_v9  ;;  %v1583_v8 = vadd.f32 %v1531_v45, %v1423_v4  ;;  %v4966_v45 = vld [vmem:[#allocation99_spill] sm:$0xff]  ;;  %v1987_v9 = vpop.permute.xlu1 %1986  ;;  %v4967_v4 = vld [vmem:[#allocation58_spill] sm:$0xff] }
  0xd3   : > { %v4077_v39 = vmul.f32 %v1981_v29, %v1955_v16  ;;  %v1739_v58 = vsel %vm984_vm1, %v1737_v3, %v1738_v12  ;;  %v1899_v28 = vsel %vm1145_vm2, %v1897_v19, %v1898_v13  ;;  %v1476_v61 = vmul.f32 %v4964_v11, %v4947_v14 }
  0xd4   : > { %v1271_v7 = vadd.f32 %v1255_v42, %v1223_v62  ;;  %v1393_v56 = vrot.slane %v1316_v47, 1  ;;  %v1798_v32 = vadd.f32 %v1760_v40, %v1638_v22  ;;  %v1631_v16 = vadd.f32 %v1615_v41, %v1583_v8 }
  0xd5   : > { %4963 = vst [vmem:[#allocation27_spill] sm:$0xff] %v4077_v39  ;;  %2060 = vrot.lane.b32.xlu1 %v4077_v39, %s2922_s24  ;;  %2091 = vrot.lane.b32.xlu0 %v4061_v52, %s2921_s16  ;;  %v1554_v60 = vrot.slane %v4965_v57, 2  ;;  %v1623_v3 = vmul.f32 %v4014_v20, %v4966_v45  ;;  %v4968_v12 = vrot.slane %v4967_v4, 1  ;;  %v1553_v29 = vrot.slane %v1476_v61, 2  ;;  %v4988_v20 = vld [vmem:[#allocation105_spill] sm:$0xff] }
  0xd6   : > { %v1684_v13 = vmul.f32 %v3774_v17, %v4966_v45  ;;  %v1685_v59 = vmul.f32 %v3774_v17, %v4969_v23  ;;  %v1958_v62 = vadd.f32 %v1920_v37, %v1798_v32  ;;  %v1791_v40 = vadd.f32 %v1739_v58, %v1631_v16  ;;  %v1973_v47 = vpop.permute.xlu0 %1972  ;;  %v4972_v32 = vld [vmem:[#allocation7_spill] sm:$0xff] }
  0xd7   : > { %v1395_v19 = vsel %vm984_vm1, %v1393_v56, %v4968_v12  ;;  %v1844_v42 = vmul.f32 %v4005_v15, %v4966_v45  ;;  %v1555_v22 = vsel %vm1145_vm2, %v1553_v29, %v1554_v60  ;;  %v1845_v56 = vmul.f32 %v4005_v15, %v4969_v23  ;;  %v4974_v60 = vld [vmem:[#allocation104_spill] sm:$0xff]  ;;  %v4983_v29 = vld [vmem:[#allocation65_spill] sm:$0xff] }
  0xd8   : > { %v1431_v41 = vadd.f32 %v1395_v19, %v1271_v7  ;;  %v1761_v8 = vrot.slane %v1684_v13, 1  ;;  %v1762_v57 = vrot.slane %v1685_v59, 1  ;;  %v4102_v61 = vmul.f32 %v1987_v9, %v1958_v62  ;;  %v4971_v7 = vld [vmem:[#allocation14_spill] sm:$0xff]  ;;  %v4973_v19 = vld [vmem:[#allocation8_spill] sm:$0xff]  ;;  %v4120_v62 = vld [vmem:[%s4677_s4] ss:$0 sm:$0xff] }
  0xd9   : > { %v1951_v4 = vadd.f32 %v1899_v28, %v1791_v40  ;;  %v1921_v10 = vrot.slane %v1844_v42, 2  ;;  %v1922_v58 = vrot.slane %v1845_v56, 2  ;;  %v874_v16 = vmul.f32 %v4972_v32, %v4971_v7  ;;  %v4976_v28 = vld [vmem:[#allocation9_spill] sm:$0xff]  ;;  %v4977_v42 = vld [vmem:[#allocation60_spill] sm:$0xff] }
  0xda   : > { %4970 = vst [vmem:[#allocation26_spill] sm:$0xff] %v4102_v61  ;;  %v1591_v12 = vadd.f32 %v1555_v22, %v1431_v41  ;;  %v1763_v37 = vsel %vm984_vm1, %v1761_v8, %v1762_v57  ;;  %v924_v46 = vmul.f32 %v4973_v19, %v4971_v7  ;;  %2107 = vrot.lane.b32.xlu1 %v4102_v61, %s2921_s16  ;;  %v4979_v57 = vld [vmem:[#allocation11_spill] sm:$0xff]  ;;  %v1521_v39 = vrot.slane %v4983_v29, 2  ;;  %v4985_v61 = vld [vmem:[#allocation76_spill] sm:$0xff] }
  0xdb   : > { %v4110_v13 = vmul.f32 %v1973_v47, %v1951_v4  ;;  %v1085_v23 = vmul.f32 %v4976_v28, %v4971_v7  ;;  %v1923_v59 = vsel %vm1145_vm2, %v1921_v10, %v1922_v58  ;;  %v890_v40 = vadd.f32 %v4120_v62, %v874_v16  ;;  %v4978_v47 = vld [vmem:[#allocation10_spill] sm:$0xff]  ;;  %v4980_v10 = vld [vmem:[#allocation12_spill] sm:$0xff]  ;;  %v4981_v58 = vld [vmem:[#allocation19_spill] sm:$0xff] }
  0xdc   : > { %v1639_v9 = vadd.f32 %v1623_v3, %v1591_v12  ;;  %v991_v41 = vrot.slane %v924_v46, 1  ;;  %v1294_v22 = vmul.f32 %v4978_v47, %v4977_v42  ;;  %v1244_v56 = vmul.f32 %v4979_v57, %v4977_v42  ;;  %v1989_v12 = vpop.permute.xlu1 %1988  ;;  %v4984_v47 = vld [vmem:[#allocation66_spill] sm:$0xff] }
  0xdd   : > { %4975 = vst [vmem:[#allocation29_spill] sm:$0xff] %v4110_v13  ;;  %2093 = vrot.lane.b32.xlu0 %v4110_v13, %s2921_s16  ;;  %v1152_v8 = vrot.slane %v1085_v23, 2  ;;  %v1454_v4 = vmul.f32 %v4980_v10, %v4977_v42  ;;  %v4982_v7 = vrot.slane %v4981_v58, 1  ;;  %v1662_v24 = vmul.f32 %v4985_v61, %v4984_v47 }
  0xde   : > { %v1799_v3 = vadd.f32 %v1763_v37, %v1639_v9  ;;  %v1360_v46 = vrot.slane %v1294_v22, 1  ;;  %v4986_v9 = vld [vmem:[#allocation20_spill] sm:$0xff]  ;;  %v4142_v10 = vmul.f32 %v4961_v18, %v4988_v20 }
  0xdf   : > { %v993_v16 = vsel %vm984_vm1, %v991_v41, %v4982_v7  ;;  %v4987_v23 = vrot.slane %v4986_v9, 2  ;;  %v1520_v52 = vrot.slane %v1454_v4, 2  ;;  %v1728_v58 = vrot.slane %v1662_v24, 1  ;;  %v4990_v41 = vld [vmem:[#allocation107_spill] sm:$0xff] }
  0xe0   : > { %v1959_v13 = vadd.f32 %v1923_v59, %v1799_v3  ;;  %v1051_v37 = vadd.f32 %v993_v16, %v890_v40  ;;  %4989 = vst [vmem:[#allocation21_spill] sm:$0xff] %v4142_v10  ;;  %v1822_v22 = vmul.f32 %v4990_v41, %v4984_v47  ;;  %v4991_v7 = vld [vmem:[#allocation67_spill] sm:$0xff]  ;;  %v4993_v40 = vld [vmem:[#allocation108_spill] sm:$0xff] }
  0xe1   : > { %v1154_v57 = vsel %vm1145_vm2, %v1152_v8, %v4987_v23  ;;  %v1823_v29 = vmul.f32 %v4990_v41, %v4991_v7  ;;  %v1612_v3 = vmul.f32 %v4993_v40, %v4984_v47  ;;  %v882_v8 = vmul.f32 %v4923_v55, %v3409_v31  ;;  %v4994_v4 = vld [vmem:[#allocation63_spill] sm:$0xff]  ;;  %v4996_v23 = vld [vmem:[#allocation80_spill] sm:$0xff] }
  0xe2   : > { %v4148_v15 = vmul.f32 %v1989_v12, %v1959_v13  ;;  %v1212_v59 = vadd.f32 %v1154_v57, %v1051_v37  ;;  %v4995_v16 = vrot.slane %v4994_v4, 1  ;;  %v1522_v24 = vsel %vm1145_vm2, %v1520_v52, %v1521_v39  ;;  %v4998_v7 = vld [vmem:[#allocation71_spill] sm:$0xff]  ;;  %v4999_v4 = vld [vmem:[#allocation40_spill] sm:$0xff] }
  0xe3   : > { %v4997_v10 = vrot.slane %v4996_v23, 1  ;;  %v940_v13 = vmul.f32 %v3248_v33, %v3409_v31  ;;  %v1888_v37 = vrot.slane %v1822_v22, 2  ;;  %v898_v47 = vadd.f32 %v4120_v62, %v882_v8  ;;  %v5001_v23 = vld [vmem:[#allocation78_spill] sm:$0xff] }
  0xe4   : > { %4992 = vst [vmem:[#allocation22_spill] sm:$0xff] %v4148_v15  ;;  %v1362_v9 = vsel %vm984_vm1, %v1360_v46, %v4995_v16  ;;  %v1260_v12 = vadd.f32 %v1244_v56, %v1212_v59  ;;  %2109 = vrot.lane.b32.xlu1 %v4148_v15, %s2921_s16  ;;  %v1101_v46 = vmul.f32 %v3276_v43, %v3409_v31  ;;  %v1889_v57 = vrot.slane %v1823_v29, 2 }
  0xe5   : > { %v1730_v20 = vsel %vm984_vm1, %v1728_v58, %v4997_v10  ;;  %v1015_v52 = vrot.slane %v940_v13, 1  ;;  %v1310_v39 = vmul.f32 %v3288_v54, %v3613_v1  ;;  %v1470_v10 = vmul.f32 %v3319_v30, %v3613_v1  ;;  %v715_v54 = vld [vmem:[%s4181_s22] sm:$0xff] }
  0xe6   : > { %v1420_v58 = vadd.f32 %v1362_v9, %v1260_v12  ;;  %v1176_v56 = vrot.slane %v1101_v46, 2  ;;  %v1252_v22 = vmul.f32 %v3280_v48, %v3613_v1  ;;  %v1545_v59 = vrot.slane %v4998_v7, 2  ;;  %v5002_v12 = vld [vmem:[#allocation41_spill] sm:$0xff] }
  0xe7   : > { %v5000_v8 = vrot.slane %v4999_v4, 1  ;;  %v1384_v31 = vrot.slane %v1310_v39, 1  ;;  %v1544_v29 = vrot.slane %v1470_v10, 2  ;;  %v1678_v13 = vmul.f32 %v3725_v36, %v5001_v23  ;;  %v5004_v4 = vld [vmem:[#allocation79_spill] sm:$0xff] }
  0xe8   : > { %v1580_v30 = vadd.f32 %v1522_v24, %v1420_v58  ;;  %v5003_v46 = vrot.slane %v5002_v12, 2  ;;  %v1838_v7 = vmul.f32 %v3895_v44, %v5001_v23  ;;  %v1620_v39 = vmul.f32 %v3903_v51, %v5001_v23  ;;  %v5005_v58 = vld [vmem:[#allocation70_spill] sm:$0xff] }
  0xe9   : > { %v1017_v16 = vsel %vm984_vm1, %v1015_v52, %v5000_v8  ;;  %v1890_v52 = vsel %vm1145_vm2, %v1888_v37, %v1889_v57  ;;  %v1752_v10 = vrot.slane %v1678_v13, 1  ;;  %v1839_v8 = vmul.f32 %v3895_v44, %v5004_v4 }
  0xea   : > { %v1059_v9 = vadd.f32 %v1017_v16, %v898_v47  ;;  %v1178_v48 = vsel %vm1145_vm2, %v1176_v56, %v5003_v46  ;;  %v1628_v15 = vadd.f32 %v1612_v3, %v1580_v30  ;;  %v1912_v24 = vrot.slane %v1838_v7, 2  ;;  %v1967_v30 = vpop.permute.xlu0 %1966 }
  0xeb   : > { %v756_v47 = vrot.slane %v715_v54, 7  ;;  %v5006_v16 = vrot.slane %v5005_v58, 1  ;;  %v1913_v12 = vrot.slane %v1839_v8, 2  ;;  %v875_v46 = vmul.f32 %v4972_v32, %v4977_v42 }
  0xec   : > { %v1220_v18 = vadd.f32 %v1178_v48, %v1059_v9  ;;  %v926_v37 = vmul.f32 %v4973_v19, %v4977_v42  ;;  %v1788_v57 = vadd.f32 %v1730_v20, %v1628_v15  ;;  %v1546_v13 = vsel %vm1145_vm2, %v1544_v29, %v1545_v59  ;;  %v5007_v9 = vld [vmem:[#allocation91_spill] sm:$0xff]  ;;  %v5011_v29 = vld [vmem:[#allocation74_spill] sm:$0xff] }
  0xed   : > { %v1386_v56 = vsel %vm984_vm1, %v1384_v31, %v5006_v16  ;;  %v805_v3 = vsel %vm799_vm0, 0.0, %v756_v47  ;;  %v5008_v54 = vrot.slane %v5007_v9, 1  ;;  %v891_v31 = vadd.f32 %v4120_v62, %v875_v46 }
  0xee   : > { %v1268_v23 = vadd.f32 %v1252_v22, %v1220_v18  ;;  %v994_v7 = vrot.slane %v926_v37, 1  ;;  %v1087_v32 = vmul.f32 %v4976_v28, %v4977_v42  ;;  %v1948_v4 = vadd.f32 %v1890_v52, %v1788_v57  ;;  %v5009_v18 = vld [vmem:[#allocation61_spill] sm:$0xff] }
  0xef   : > { %v1754_v48 = vsel %vm984_vm1, %v1752_v10, %v5008_v54  ;;  %v1914_v15 = vsel %vm1145_vm2, %v1912_v24, %v1913_v12  ;;  %v829_v20 = vsel %vm799_vm0, %v756_v47, 0.0  ;;  %v5010_v19 = vrot.slane %v5009_v18, 1  ;;  %v5013_v10 = vld [vmem:[#allocation72_spill] sm:$0xff]  ;;  %v5015_v24 = vld [vmem:[#allocation75_spill] sm:$0xff]  ;;  %v5016_v47 = vld [vmem:[#allocation62_spill] sm:$0xff] }
  0xf0   : > { %v1428_v8 = vadd.f32 %v1386_v56, %v1268_v23  ;;  %v1155_v59 = vrot.slane %v1087_v32, 2  ;;  %v5012_v58 = vrot.slane %v5011_v29, 1  ;;  %v5014_v16 = vrot.slane %v5013_v10, 1 }
  0xf1   : > { %v996_v22 = vsel %vm984_vm1, %v994_v7, %v5010_v19  ;;  %v1664_v37 = vmul.f32 %v4985_v61, %v805_v3  ;;  %v4220_v28 = vmul.f32 %v1967_v30, %v1948_v4  ;;  %v1523_v56 = vrot.slane %v5015_v24, 2  ;;  %v5018_v19 = vld [vmem:[#allocation73_spill] sm:$0xff] }
  0xf2   : > { %v1365_v46 = vsel %vm984_vm1, %v5014_v16, %v5012_v58  ;;  %v1588_v42 = vadd.f32 %v1546_v13, %v1428_v8  ;;  %v1052_v52 = vadd.f32 %v996_v22, %v891_v31  ;;  %v5017_v12 = vrot.slane %v5016_v47, 2 }
  0xf3   : > { %v1665_v23 = vmul.f32 %v4985_v61, %v829_v20  ;;  %v1731_v9 = vrot.slane %v1664_v37, 1  ;;  %v1824_v54 = vmul.f32 %v4990_v41, %v805_v3  ;;  %2046 = vrot.lane.b32.xlu0 %v4220_v28, %s2922_s24  ;;  %v1825_v30 = vmul.f32 %v4990_v41, %v829_v20  ;;  %v1983_v20 = vpop.permute.xlu1 %1982 }
  0xf4   : > { %v1157_v57 = vsel %vm1145_vm2, %v1155_v59, %v5017_v12  ;;  %v1636_v7 = vadd.f32 %v1620_v39, %v1588_v42  ;;  %v878_v13 = vmul.f32 %v4931_v63, %v3531_v35  ;;  %v1613_v31 = vmul.f32 %v4993_v40, %v805_v3  ;;  %v5019_v59 = vld [vmem:[#allocation77_spill] sm:$0xff] }
  0xf5   : > { %v1213_v32 = vadd.f32 %v1157_v57, %v1052_v52  ;;  %v1732_v4 = vrot.slane %v1665_v23, 1  ;;  %v932_v8 = vmul.f32 %v3339_v53, %v3531_v35  ;;  %v1093_v61 = vmul.f32 %v3349_v0, %v3531_v35 }
  0xf6   : > { %v1796_v18 = vadd.f32 %v1754_v48, %v1636_v7  ;;  %v5020_v39 = vrot.slane %v5019_v59, 2  ;;  %v894_v41 = vadd.f32 %v4120_v62, %v878_v13  ;;  %v1891_v58 = vrot.slane %v1824_v54, 2  ;;  %v5021_v48 = vld [vmem:[#allocation51_spill] sm:$0xff]  ;;  %v5026_v13 = vld [vmem:[#allocation89_spill] sm:$0xff] }
  0xf7   : > { %v1261_v22 = vadd.f32 %v5018_v19, %v1213_v32  ;;  %v1892_v40 = vrot.slane %v1825_v30, 2  ;;  %v1003_v3 = vrot.slane %v932_v8, 1  ;;  %v1164_v10 = vrot.slane %v1093_v61, 2  ;;  %v5025_v32 = vld [vmem:[#allocation86_spill] sm:$0xff] }
  0xf8   : > { %v1525_v29 = vsel %vm1145_vm2, %v1523_v56, %v5020_v39  ;;  %v1956_v16 = vadd.f32 %v1914_v15, %v1796_v18  ;;  %v1733_v42 = vsel %vm984_vm1, %v1731_v9, %v1732_v4  ;;  %v1302_v35 = vmul.f32 %v3353_v49, %v3690_v26  ;;  %v5023_v56 = vld [vmem:[#allocation53_spill] sm:$0xff]  ;;  %v5027_v18 = vld [vmem:[#allocation94_spill] sm:$0xff] }
  0xf9   : > { %v1421_v37 = vadd.f32 %v1365_v46, %v1261_v22  ;;  %v5022_v52 = vrot.slane %v5021_v48, 1  ;;  %v5024_v47 = vrot.slane %v5023_v56, 2  ;;  %v1248_v57 = vmul.f32 %v3369_v38, %v3690_v26  ;;  %v717_v49 = vld [vmem:[%s4181_s22 + $0x10] sm:$0xff]  ;;  %v5028_v22 = vld [vmem:[#allocation83_spill] sm:$0xff] }
  0xfa   : > { %v1462_v15 = vmul.f32 %v3393_v25, %v3690_v26  ;;  %v4256_v46 = vmul.f32 %v1983_v20, %v1956_v16  ;;  %v1372_v54 = vrot.slane %v1302_v35, 1  ;;  %v1533_v30 = vrot.slane %v5025_v32, 2  ;;  %v5033_v32 = vld [vmem:[#allocation68_spill] sm:$0xff] }
  0xfb   : > { %v1005_v24 = vsel %vm984_vm1, %v1003_v3, %v5022_v52  ;;  %v1166_v12 = vsel %vm1145_vm2, %v1164_v10, %v5024_v47  ;;  %v1581_v23 = vadd.f32 %v1525_v29, %v1421_v37  ;;  %v1670_v4 = vmul.f32 %v3764_v21, %v5026_v13  ;;  %v5030_v47 = vld [vmem:[#allocation106_spill] sm:$0xff] }
  0xfc   : > { %v1055_v9 = vadd.f32 %v1005_v24, %v894_v41  ;;  %v1532_v7 = vrot.slane %v1462_v15, 2  ;;  %v1830_v8 = vmul.f32 %v3937_v50, %v5026_v13  ;;  %v1893_v38 = vsel %vm1145_vm2, %v1891_v58, %v1892_v40  ;;  %2062 = vrot.lane.b32.xlu1 %v4256_v46, %s2922_s24  ;;  %v1969_v58 = vpop.permute.xlu0 %1968 }
  0xfd   : > { %v1629_v61 = vadd.f32 %v1613_v31, %v1581_v23  ;;  %v1831_v19 = vmul.f32 %v3937_v50, %v5027_v18  ;;  %v5029_v59 = vrot.slane %v5028_v22, 1  ;;  %v1740_v29 = vrot.slane %v1670_v4, 1 }
  0xfe   : > { %v1216_v25 = vadd.f32 %v1166_v12, %v1055_v9  ;;  %v1900_v41 = vrot.slane %v1830_v8, 2  ;;  %v768_v20 = vrot.slane %v717_v49, 7  ;;  %v883_v31 = vmul.f32 %v4923_v55, %v3613_v1  ;;  %v5032_v49 = vld [vmem:[#allocation95_spill] sm:$0xff] }
  0xff   : > { %v1374_v39 = vsel %vm984_vm1, %v1372_v54, %v5029_v59  ;;  %v1789_v3 = vadd.f32 %v1733_v42, %v1629_v61  ;;  %v1901_v16 = vrot.slane %v1831_v19, 2  ;;  %v1534_v40 = vsel %vm1145_vm2, %v1532_v7, %v1533_v30  ;;  %v5035_v61 = vld [vmem:[#allocation85_spill] sm:$0xff] }
 0x100   : > { %v1264_v10 = vadd.f32 %v1248_v57, %v1216_v25  ;;  %v1616_v37 = vmul.f32 %v3947_v5, %v5026_v13  ;;  %v817_v35 = vsel %vm799_vm0, 0.0, %v768_v20  ;;  %v942_v48 = vmul.f32 %v3248_v33, %v3613_v1  ;;  %v5037_v25 = vld [vmem:[#allocation84_spill] sm:$0xff]  ;;  %v5039_v59 = vld [vmem:[#allocation69_spill] sm:$0xff] }
 0x101   : > { %v1949_v52 = vadd.f32 %v1893_v38, %v1789_v3  ;;  %v841_v42 = vsel %vm799_vm0, %v768_v20, 0.0  ;;  %v899_v56 = vadd.f32 %v4120_v62, %v883_v31  ;;  %v4284_v55 = vmul.f32 %v3774_v17, %v5030_v47 }
 0x102   : > { %v1424_v24 = vadd.f32 %v1374_v39, %v1264_v10  ;;  %v5031_v12 = vrot.slane %v4974_v60, 1  ;;  %v1018_v15 = vrot.slane %v942_v48, 1  ;;  %v1103_v23 = vmul.f32 %v3276_v43, %v3613_v1 }
 0x103   : > { %v4291_v9 = vmul.f32 %v1969_v58, %v1949_v52  ;;  %v1902_v54 = vsel %vm1145_vm2, %v1900_v41, %v1901_v16  ;;  %v1547_v7 = vrot.slane %v5032_v49, 2  ;;  %v5034_v30 = vrot.slane %v5033_v32, 1  ;;  %v5041_v16 = vld [vmem:[#allocation88_spill] sm:$0xff] }
 0x104   : > { %v1742_v57 = vsel %vm984_vm1, %v1740_v29, %v5031_v12  ;;  %v1584_v33 = vadd.f32 %v1534_v40, %v1424_v24  ;;  %v1179_v4 = vrot.slane %v1103_v23, 2  ;;  %v1680_v60 = vmul.f32 %v3725_v36, %v817_v35  ;;  %v5044_v32 = vld [vmem:[#allocation56_spill] sm:$0xff] }
 0x105   : > { %v1020_v13 = vsel %vm984_vm1, %v1018_v15, %v5034_v30  ;;  %v1681_v8 = vmul.f32 %v3725_v36, %v841_v42  ;;  %2048 = vrot.lane.b32.xlu0 %v4291_v9, %s2922_s24  ;;  %v5036_v38 = vrot.slane %v5035_v61, 1  ;;  %v5038_v18 = vrot.slane %v5037_v25, 1  ;;  %v5049_v61 = vld [vmem:[#allocation100_spill] sm:$0xff] }
 0x106   : > { %v1632_v43 = vadd.f32 %v1616_v37, %v1584_v33  ;;  %v1060_v1 = vadd.f32 %v1020_v13, %v899_v56  ;;  %v1840_v22 = vmul.f32 %v3895_v44, %v817_v35  ;;  %v5040_v39 = vrot.slane %v5039_v59, 2  ;;  %v1975_v37 = vpop.permute.xlu1 %1974  ;;  %v5051_v59 = vld [vmem:[#allocation16_spill] sm:$0xff] }
 0x107   : > { %v1389_v19 = vsel %vm984_vm1, %v5038_v18, %v5036_v38  ;;  %v1621_v41 = vmul.f32 %v3903_v51, %v817_v35  ;;  %v1841_v36 = vmul.f32 %v3895_v44, %v841_v42  ;;  %v886_v20 = vmul.f32 %v4941_v34, %v4947_v14  ;;  %v5043_v35 = vld [vmem:[#allocation87_spill] sm:$0xff] }
 0x108   : > { %v1181_v29 = vsel %vm1145_vm2, %v1179_v4, %v5040_v39  ;;  %v1792_v3 = vadd.f32 %v1742_v57, %v1632_v43  ;;  %v5042_v31 = vrot.slane %v5041_v16, 2  ;;  %v948_v40 = vmul.f32 %v3436_v27, %v4947_v14 }
 0x109   : > { %v1221_v10 = vadd.f32 %v1181_v29, %v1060_v1  ;;  %v1755_v48 = vrot.slane %v1680_v60, 1  ;;  %v1756_v52 = vrot.slane %v1681_v8, 1  ;;  %v902_v24 = vadd.f32 %v4120_v62, %v886_v20  ;;  %v5047_v60 = vld [vmem:[#allocation57_spill] sm:$0xff]  ;;  %v716_v29 = vld [vmem:[%s4181_s22 + $0x8] sm:$0xff] }
 0x10a   : > { %v1549_v58 = vsel %vm1145_vm2, %v1547_v7, %v5042_v31  ;;  %v1109_v44 = vmul.f32 %v3440_v2, %v4947_v14  ;;  %v1952_v51 = vadd.f32 %v1902_v54, %v1792_v3  ;;  %v1915_v56 = vrot.slane %v1840_v22, 2  ;;  %v5046_v54 = vld [vmem:[#allocation42_spill] sm:$0xff] }
 0x10b   : > { %v1269_v42 = vadd.f32 %v5043_v35, %v1221_v10  ;;  %v1027_v12 = vrot.slane %v948_v40, 1  ;;  %v1916_v57 = vrot.slane %v1841_v36, 2  ;;  %v1318_v23 = vmul.f32 %v4962_v6, %v4966_v45 }
 0x10c   : > { %v1188_v15 = vrot.slane %v1109_v44, 2  ;;  %v1478_v33 = vmul.f32 %v4964_v11, %v4966_v45  ;;  %v4328_v49 = vmul.f32 %v1975_v37, %v1952_v51  ;;  %v5045_v30 = vrot.slane %v5044_v32, 1 }
 0x10d   : > { %v1429_v7 = vadd.f32 %v1389_v19, %v1269_v42  ;;  %v1256_v13 = vmul.f32 %v5046_v54, %v4966_v45  ;;  %v5048_v8 = vrot.slane %v5047_v60, 2  ;;  %v1396_v1 = vrot.slane %v1318_v23, 1  ;;  %v5050_v19 = vld [vmem:[#allocation105_spill] sm:$0xff] }
 0x10e   : > { %v1029_v14 = vsel %vm984_vm1, %v1027_v12, %v5045_v30  ;;  %v1557_v38 = vrot.slane %v5049_v61, 2  ;;  %2095 = vrot.lane.b32.xlu0 %v4328_v49, %s2921_s16  ;;  %v1556_v18 = vrot.slane %v1478_v33, 2  ;;  %v1686_v22 = vmul.f32 %v3774_v17, %v5050_v19  ;;  %v1985_v12 = vpop.permute.xlu0 %1984 }
 0x10f   : > { %v1063_v4 = vadd.f32 %v1029_v14, %v902_v24  ;;  %v1190_v43 = vsel %vm1145_vm2, %v1188_v15, %v5048_v8  ;;  %v1589_v25 = vadd.f32 %v1549_v58, %v1429_v7  ;;  %v1846_v39 = vmul.f32 %v5051_v59, %v5050_v19  ;;  %v5052_v58 = vld [vmem:[#allocation96_spill] sm:$0xff]  ;;  %v5054_v24 = vld [vmem:[#allocation13_spill] sm:$0xff] }
 0x110   : > { %v1765_v36 = vrot.slane %v4284_v55, 1  ;;  %v1757_v20 = vsel %vm984_vm1, %v1755_v48, %v1756_v52  ;;  %v1847_v10 = vmul.f32 %v5051_v59, %v5030_v47  ;;  %v1917_v31 = vsel %vm1145_vm2, %v1915_v56, %v1916_v57 }
 0x111   : > { %v1224_v3 = vadd.f32 %v1190_v43, %v1063_v4  ;;  %v1637_v16 = vadd.f32 %v1621_v41, %v1589_v25  ;;  %v5053_v40 = vrot.slane %v5052_v58, 1  ;;  %v1624_v44 = vmul.f32 %v5054_v24, %v5050_v19  ;;  %v1991_v58 = vpop.permute.xlu1 %1990 }
 0x112   : > { %v762_v35 = vrot.slane %v716_v29, 7  ;;  %v879_v55 = vmul.f32 %v4931_v63, %v3690_v26  ;;  %v934_v48 = vmul.f32 %v3339_v53, %v3690_v26  ;;  %v1558_v41 = vsel %vm1145_vm2, %v1556_v18, %v1557_v38  ;;  %v5057_v38 = vld [vmem:[#allocation103_spill] sm:$0xff]  ;;  %v718_v18 = vld [vmem:[%s4181_s22 + $0x18] sm:$0xff] }
 0x113   : > { %v1398_v37 = vsel %vm984_vm1, %v1396_v1, %v5053_v40  ;;  %v1272_v51 = vadd.f32 %v1256_v13, %v1224_v3  ;;  %v1797_v52 = vadd.f32 %v1757_v20, %v1637_v16  ;;  %v1764_v42 = vrot.slane %v1686_v22, 1  ;;  %v5055_v13 = vld [vmem:[#allocation81_spill] sm:$0xff]  ;;  %v5058_v22 = vld [vmem:[#allocation82_spill] sm:$0xff] }
 0x114   : > { %v1924_v56 = vrot.slane %v1846_v39, 2  ;;  %v1925_v15 = vrot.slane %v1847_v10, 2  ;;  %v895_v23 = vadd.f32 %v4120_v62, %v879_v55  ;;  %v1006_v33 = vrot.slane %v934_v48, 1  ;;  %v5060_v40 = vld [vmem:[#allocation98_spill] sm:$0xff] }
 0x115   : > { %v1432_v57 = vadd.f32 %v1398_v37, %v1272_v51  ;;  %v4364_v7 = vmul.f32 %v4962_v6, %v5050_v19  ;;  %v4368_v63 = vmul.f32 %v4962_v6, %v5030_v47  ;;  %v1957_v53 = vadd.f32 %v1917_v31, %v1797_v52  ;;  %v5064_v52 = vld [vmem:[#allocation102_spill] sm:$0xff] }
 0x116   : > { %v1095_v32 = vmul.f32 %v3349_v0, %v3690_v26  ;;  %v811_v14 = vsel %vm799_vm0, 0.0, %v762_v35  ;;  %v835_v54 = vsel %vm799_vm0, %v762_v35, 0.0  ;;  %v5056_v4 = vrot.slane %v5055_v13, 1 }
 0x117   : > { %v1592_v30 = vadd.f32 %v1558_v41, %v1432_v57  ;;  %v4377_v8 = vmul.f32 %v1985_v12, %v1957_v53  ;;  %v1766_v43 = vsel %vm984_vm1, %v1764_v42, %v1765_v36  ;;  %v4382_v61 = vmul.f32 %v4964_v11, %v5050_v19 }
 0x118   : > { %v1008_v60 = vsel %vm984_vm1, %v1006_v33, %v5056_v4  ;;  %v1167_v6 = vrot.slane %v1095_v32, 2  ;;  %v1926_v26 = vsel %vm1145_vm2, %v1924_v56, %v1925_v15  ;;  %v1535_v25 = vrot.slane %v5057_v38, 2 }
 0x119   : > { %v1056_v1 = vadd.f32 %v1008_v60, %v895_v23  ;;  %v1640_v0 = vadd.f32 %v1624_v44, %v1592_v30  ;;  %2064 = vrot.lane.b32.xlu1 %v4377_v8, %s2922_s24  ;;  %v5059_v39 = vrot.slane %v5058_v22, 2  ;;  %v1672_v36 = vmul.f32 %v3764_v21, %v811_v14  ;;  %v5062_v44 = vld [vmem:[#allocation97_spill] sm:$0xff] }
 0x11a   : > { %v1673_v20 = vmul.f32 %v3764_v21, %v835_v54  ;;  %v887_v19 = vmul.f32 %v4941_v34, %v4966_v45  ;;  %v1481_v3 = vmul.f32 %v4964_v11, %v5030_v47  ;;  %v1832_v31 = vmul.f32 %v3937_v50, %v811_v14  ;;  %v5065_v11 = vld [vmem:[#allocation101_spill] sm:$0xff] }
 0x11b   : > { %v1169_v29 = vsel %vm1145_vm2, %v1167_v6, %v5059_v39  ;;  %v1800_v10 = vadd.f32 %v1766_v43, %v1640_v0  ;;  %v5061_v37 = vrot.slane %v5060_v40, 1  ;;  %v5063_v51 = vrot.slane %v5062_v44, 1  ;;  %v2165_v43 = vld [vmem:[%s4678_s5 + $0x8] sm:$0xff]  ;;  %v1977_v40 = vpop.permute.xlu0 %1976 }
 0x11c   : > { %v1217_v16 = vadd.f32 %v1169_v29, %v1056_v1  ;;  %v1617_v55 = vmul.f32 %v3947_v5, %v811_v14  ;;  %v1833_v21 = vmul.f32 %v3937_v50, %v835_v54  ;;  %v774_v48 = vrot.slane %v718_v18, 7  ;;  %v2166_v1 = vld [vmem:[%s4678_s5 + $0x10] sm:$0xff] }
 0x11d   : > { %v1377_v35 = vsel %vm984_vm1, %v5063_v51, %v5061_v37  ;;  %v1960_v34 = vadd.f32 %v1926_v26, %v1800_v10  ;;  %v5066_v47 = vrot.slane %v5065_v11, 2  ;;  %v950_v56 = vmul.f32 %v3436_v27, %v4966_v45  ;;  %v2164_v27 = vld [vmem:[%s4678_s5] sm:$0xff]  ;;  %v5069_v26 = vld [vmem:[#allocation93_spill] sm:$0xff] }
 0x11e   : > { %v1265_v41 = vadd.f32 %v5064_v52, %v1217_v16  ;;  %v1743_v12 = vrot.slane %v1672_v36, 1  ;;  %v1744_v57 = vrot.slane %v1673_v20, 1  ;;  %v903_v15 = vadd.f32 %v4120_v62, %v887_v19  ;;  %v5071_v37 = vld [vmem:[#allocation21_spill] sm:$0xff] }
 0x11f   : > { %v1537_v42 = vsel %vm1145_vm2, %v1535_v25, %v5066_v47  ;;  %v1111_v5 = vmul.f32 %v3440_v2, %v4966_v45  ;;  %v4415_v23 = vmul.f32 %v1991_v58, %v1960_v34  ;;  %v1903_v33 = vrot.slane %v1832_v31, 2  ;;  %v5067_v45 = vld [vmem:[#allocation92_spill] sm:$0xff] }
 0x120   : > { %v1425_v50 = vadd.f32 %v1377_v35, %v1265_v41  ;;  %v1030_v53 = vrot.slane %v950_v56, 1  ;;  %v1904_v32 = vrot.slane %v1833_v21, 2  ;;  %v823_v30 = vsel %vm799_vm0, 0.0, %v774_v48 }
 0x121   : > { %v847_v14 = vsel %vm799_vm0, %v774_v48, 0.0  ;;  %v1191_v54 = vrot.slane %v1111_v5, 2  ;;  %v1399_v62 = vrot.slane %v4364_v7, 1  ;;  %v1400_v13 = vrot.slane %v4368_v63, 1  ;;  %2111 = vrot.lane.b32.xlu1 %v4415_v23, %s2921_s16  ;;  %v2167_v7 = vld [vmem:[%s4678_s5 + $0x18] sm:$0xff] }
 0x122   : > { %v1585_v2 = vadd.f32 %v1537_v42, %v1425_v50  ;;  %v5068_v4 = vrot.slane %v5067_v45, 1  ;;  %v1560_v63 = vrot.slane %v1481_v3, 2  ;;  %v1745_v6 = vsel %vm984_vm1, %v1743_v12, %v1744_v57  ;;  %v1993_v57 = vpop.permute.xlu1 %1992 }
 0x123   : > { %v5070_v38 = vrot.slane %v5069_v26, 2  ;;  %v1559_v22 = vrot.slane %v4382_v61, 2  ;;  %v1688_v39 = vmul.f32 %v3774_v17, %v823_v30  ;;  %v1689_v29 = vmul.f32 %v3774_v17, %v847_v14  ;;  %v2168_v61 = vld [vmem:[%s4678_s5 + $0x20] sm:$0xff]  ;;  %v2169_v17 = vld [vmem:[%s4678_s5 + $0x28] sm:$0xff] }
 0x124   : > { %v1032_v60 = vsel %vm984_vm1, %v1030_v53, %v5068_v4  ;;  %v1633_v18 = vadd.f32 %v1617_v55, %v1585_v2  ;;  %v1905_v36 = vsel %vm1145_vm2, %v1903_v33, %v1904_v32  ;;  %v2784_v19 = vpack.c.bf16 %v2165_v43, %v2164_v27  ;;  %v5073_v33 = vld [vmem:[#allocation29_spill] sm:$0xff]  ;;  %v5074_v53 = vld [vmem:[#allocation15_spill] sm:$0xff]  ;;  %v5075_v32 = vld [vmem:[#allocation26_spill] sm:$0xff] }
 0x125   : > { %v1064_v0 = vadd.f32 %v1032_v60, %v903_v15  ;;  %v1193_v25 = vsel %vm1145_vm2, %v1191_v54, %v5070_v38  ;;  %v2788_v10 = vpack.c.bf16 %v2167_v7, %v2166_v1  ;;  %v1401_v16 = vsel %vm984_vm1, %v1399_v62, %v1400_v13  ;;  %v5072_v15 = vld [vmem:[#allocation24_spill] sm:$0xff] }
 0x126   : > { %v1793_v3 = vadd.f32 %v1745_v6, %v1633_v18  ;;  %v1848_v31 = vmul.f32 %v5051_v59, %v823_v30  ;;  %v1849_v58 = vmul.f32 %v5051_v59, %v847_v14  ;;  %2785 = vmatprep.subr.bf16.mxu0 %v2784_v19  ;;  %2796 = vmatprep.subr.bf16.mxu1 %v2784_v19  ;;  %v1767_v55 = vrot.slane %v1688_v39, 1  ;;  %v5077_v14 = vld [vmem:[#allocation22_spill] sm:$0xff]  ;;  %v4484_v54 = vpop.permute.xlu1 %2115 }
 0x127   : > { %v1225_v20 = vadd.f32 %v1193_v25, %v1064_v0  ;;  %v1561_v35 = vsel %vm1145_vm2, %v1559_v22, %v1560_v63  ;;  %v1768_v21 = vrot.slane %v1689_v29, 1  ;;  %2787 = vmatpush3.bf16.msra.mxu0 %v2784_v19  ;;  %2799 = vmatpush3.bf16.msra.mxu1 %v2784_v19  ;;  %v1625_v48 = vmul.f32 %v5054_v24, %v823_v30  ;;  %v5076_v30 = vld [vmem:[#allocation27_spill] sm:$0xff] }
 0x128   : > { %v1953_v51 = vadd.f32 %v1905_v36, %v1793_v3  ;;  %2789 = vmatprep.subr.bf16.mxu0 %v2788_v10  ;;  %2797 = vmatprep.subr.bf16.mxu1 %v2788_v10  ;;  %v2792_v34 = vpack.c.bf16 %v2169_v17, %v2168_v61  ;;  %v1927_v41 = vrot.slane %v1848_v31, 2  ;;  %v1928_v11 = vrot.slane %v1849_v58, 2 }
 0x129   : > { %v1273_v44 = vadd.f32 %v5071_v37, %v1225_v20  ;;  %v1769_v42 = vsel %vm984_vm1, %v1767_v55, %v1768_v21 }
 0x12a   : > { %v4458_v52 = vmul.f32 %v1977_v40, %v1953_v51  ;;  %v1929_v12 = vsel %vm1145_vm2, %v1927_v41, %v1928_v11 }
 0x12b   : > { %v1433_v59 = vadd.f32 %v1401_v16, %v1273_v44  ;;  %2791 = vmatpush3.bf16.msra.mxu0 %v2788_v10  ;;  %2800 = vmatpush3.bf16.msra.mxu1 %v2788_v10  ;;  %v5078_v44 = vld [vmem:[#allocation18_spill] sm:$0xff] }
 0x12c   : > { %2097 = vrot.lane.b32.xlu0 %v4458_v52, %s2921_s16  ;;  %2793 = vmatprep.subr.bf16.mxu0 %v2792_v34 }
 0x12d   : > { %v1593_v47 = vadd.f32 %v1561_v35, %v1433_v59  ;;  %2798 = vmatprep.subr.bf16.mxu1 %v2792_v34 }
 0x12f   : > { %v1641_v56 = vadd.f32 %v1625_v48, %v1593_v47  ;;  %2795 = vmatpush3.bf16.msra.mxu0 %v2792_v34  ;;  %2801 = vmatpush3.bf16.msra.mxu1 %v2792_v34  ;;  %v5079_v34 = vld [vmem:[#allocation17_spill] sm:$0xff] }
 0x130   : > { %2050 = vrot.lane.b32.xlu0 %v5072_v15, %s2922_s24 }
 0x131   : > { %v1801_v24 = vadd.f32 %v1769_v42, %v1641_v56 }
 0x133   : > { %v1961_v5 = vadd.f32 %v1929_v12, %v1801_v24 }
 0x134   : > { %2052 = vrot.lane.b32.xlu0 %v5073_v33, %s2922_s24 }
 0x135   : > { %v2025_v50 = vmul.f32 %v1993_v57, %v1961_v5 }
 0x137   : > { %2113 = vrot.lane.b32.xlu1 %v2025_v50, %s2921_s16 }
 0x138   : > { %2099 = vrot.lane.b32.xlu0 %v5074_v53, %s2921_s16 }
 0x13b   : > { %2066 = vrot.lane.b32.xlu1 %v5075_v32, %s2922_s24 }
 0x13c   : > { %2101 = vrot.lane.b32.xlu0 %v5076_v30, %s2921_s16 }
 0x13f   : > { %2068 = vrot.lane.b32.xlu1 %v5077_v14, %s2922_s24  ;;  %v2043_v27 = vpop.permute.xlu0 %2042 }
 0x140   : > { %2070 = vrot.lane.b32.xlu0 %v4415_v23, %s2922_s24  ;;  %v2131_v23 = vsel %vm2130_vm3, 0.0, %v2043_v27 }
 0x143   : > { %2054 = vrot.lane.b32.xlu1 %v4328_v49, %s2922_s24  ;;  %v2059_v62 = vpop.permute.xlu1 %2058  ;;  %v2045_v13 = vpop.permute.xlu0 %2044 }
 0x144   : > { %2072 = vrot.lane.b32.xlu0 %v2025_v50, %s2922_s24  ;;  %v2139_v60 = vsel %vm2130_vm3, %v5072_v15, %v2059_v62  ;;  %v2132_v7 = vsel %vm2130_vm3, 0.0, %v2045_v13 }
 0x147   : > { %2056 = vrot.lane.b32.xlu1 %v4458_v52, %s2922_s24  ;;  %v2061_v2 = vpop.permute.xlu1 %2060  ;;  %v2092_v45 = vpop.permute.xlu0 %2091 }
 0x148   : > { %2105 = vrot.lane.b32.xlu0 %v4377_v8, %s2921_s16  ;;  %v2148_v4 = vsel %vm2147_vm4, %v2131_v23, %v2092_v45  ;;  %v2140_v0 = vsel %vm2130_vm3, %v5073_v33, %v2061_v2  ;;  %v2371_v23 = vld [vmem:[%s4560_s14] sm:$0xff] }
 0x149   : > { %2760 = vmatprep.mubr.msk.f32.mxu0 %vm2177_vm5, %v2148_v4 }
 0x14b   : > { %2103 = vrot.lane.b32.xlu1 %v4256_v46, %s2921_s16 }
 0x14c   : > { %v2108_v43 = vpop.permute.xlu1 %2107 }
 0x14d   : > { %v2156_v1 = vsel %vm2147_vm4, %v2139_v60, %v2108_v43  ;;  %v2380_v43 = vld [vmem:[%s4560_s14 + $0x48] sm:$0xff] }
 0x14e   : > { %2772 = vmatprep.mubr.msk.f32.mxu1 %vm2177_vm5, %v2156_v1 }
 0x14f   : > { %v2094_v63 = vpop.permute.xlu0 %2093 }
 0x150   : > { %v2149_v6 = vsel %vm2147_vm4, %v2132_v7, %v2094_v63  ;;  %v2379_v63 = vld [vmem:[%s4560_s14 + $0x40] sm:$0xff] }
 0x151   : > { %2761 = vmatmul.mubr.msk.f32.vlgmr.msra.gmra.mrb[0].mxu0 %vm2177_vm5, %v2149_v6 }
 0x156   : > { %v2110_v26 = vpop.permute.xlu1 %2109 }
 0x157   : > { %v2157_v38 = vsel %vm2147_vm4, %v2140_v0, %v2110_v26 }
 0x158   : > { %2773 = vmatmul.mubr.msk.f32.vlgmr.msra.gmra.mrb[0].mxu1 %vm2177_vm5, %v2157_v38 }
 0x165   : > { %v2047_v25 = vpop.permute.xlu0 %2046 }
 0x166   : > { %v2133_v22 = vsel %vm2130_vm3, 0.0, %v2047_v25  ;;  %v2374_v25 = vld [vmem:[%s4560_s14 + $0x18] sm:$0xff] }
 0x16e   : > { %v2063_v36 = vpop.permute.xlu1 %2062 }
 0x16f   : > { %v2141_v19 = vsel %vm2130_vm3, %v4328_v49, %v2063_v36 }
 0x177   : > { %v2049_v18 = vpop.permute.xlu0 %2048 }
 0x178   : > { %v2134_v16 = vsel %vm2130_vm3, 0.0, %v2049_v18 }
 0x180   : > { %v2096_v39 = vpop.permute.xlu0 %2095 }
 0x181   : > { %v2150_v29 = vsel %vm2147_vm4, %v2133_v22, %v2096_v39  ;;  %v2373_v39 = vld [vmem:[%s4560_s14 + $0x10] sm:$0xff] }
 0x182   : > { %2763 = vmatprep.mubr.msk.f32.mxu0 %vm2177_vm5, %v2150_v29 }
 0x18b   : > { %v2065_v20 = vpop.permute.xlu1 %2064 }
 0x18c   : > { %v2142_v40 = vsel %vm2130_vm3, %v4458_v52, %v2065_v20 }
 0x193   : > { %v2112_v10 = vpop.permute.xlu1 %2111 }
 0x194   : > { %v2158_v3 = vsel %vm2147_vm4, %v2141_v19, %v2112_v10  ;;  %v2382_v10 = vld [vmem:[%s4560_s14 + $0x58] sm:$0xff] }
 0x195   : > { %2775 = vmatprep.mubr.msk.f32.mxu1 %vm2177_vm5, %v2158_v3 }
 0x19e   : > { %v2098_v31 = vpop.permute.xlu0 %2097 }
 0x19f   : > { %v2151_v58 = vsel %vm2147_vm4, %v2134_v16, %v2098_v31  ;;  %v2381_v31 = vld [vmem:[%s4560_s14 + $0x50] sm:$0xff] }
 0x1a0   : > { %2764 = vmatmul.mubr.msk.f32.gmra.mrb[2].mxu0 %vm2177_vm5, %v2151_v58 }
 0x1a2   : > { %v2051_v61 = vpop.permute.xlu0 %2050 }
 0x1a3   : > { %v2135_v51 = vsel %vm2130_vm3, %v5078_v44, %v2051_v61 }
 0x1a6   : > { %v2053_v17 = vpop.permute.xlu0 %2052 }
 0x1a7   : > { %v2136_v52 = vsel %vm2130_vm3, %v5079_v34, %v2053_v17  ;;  %v2383_v34 = vld [vmem:[%s4560_s14 + $0x60] sm:$0xff] }
 0x1a9   : > { %v2114_v37 = vpop.permute.xlu1 %2113 }
 0x1aa   : > { %v2159_v49 = vsel %vm2147_vm4, %v2142_v40, %v2114_v37  ;;  %v2100_v35 = vpop.permute.xlu0 %2099  ;;  %v2376_v37 = vld [vmem:[%s4560_s14 + $0x28] sm:$0xff] }
 0x1ab   : > { %2776 = vmatmul.mubr.msk.f32.gmra.mrb[2].mxu1 %vm2177_vm5, %v2159_v49  ;;  %v2152_v21 = vsel %vm2147_vm4, %v2135_v51, %v2100_v35  ;;  %v2375_v51 = vld [vmem:[%s4560_s14 + $0x20] sm:$0xff] }
 0x1ac   : > { %2766 = vmatprep.mubr.msk.f32.mxu0 %vm2177_vm5, %v2152_v21 }
 0x1ad   : > { %v2067_v55 = vpop.permute.xlu1 %2066 }
 0x1ae   : > { %v2143_v59 = vsel %vm2130_vm3, %v5074_v53, %v2067_v55  ;;  %v2102_v41 = vpop.permute.xlu0 %2101  ;;  %v2384_v55 = vld [vmem:[%s4560_s14 + $0x68] sm:$0xff] }
 0x1af   : > { %v2160_v48 = vsel %vm2147_vm4, %v2143_v59, %v4484_v54  ;;  %v2153_v47 = vsel %vm2147_vm4, %v2136_v52, %v2102_v41 }
 0x1b0   : > { %2778 = vmatprep.mubr.msk.f32.mxu1 %vm2177_vm5, %v2160_v48  ;;  %2767 = vmatmul.mubr.msk.f32.gmra.mrb[4].mxu0 %vm2177_vm5, %v2153_v47 }
 0x1b1   : > { %v2069_v11 = vpop.permute.xlu1 %2068 }
 0x1b2   : > { %v2144_v42 = vsel %vm2130_vm3, %v5076_v30, %v2069_v11  ;;  %v2071_v12 = vpop.permute.xlu0 %2070 }
 0x1b3   : > { %v2161_v56 = vsel %vm2147_vm4, %v2144_v42, %v4484_v54  ;;  %v2145_v57 = vsel %vm2130_vm3, %v4256_v46, %v2071_v12  ;;  %v2386_v12 = vld [vmem:[%s4560_s14 + $0x78] sm:$0xff] }
 0x1b4   : > { %2779 = vmatmul.mubr.msk.f32.gmra.mrb[4].mxu1 %vm2177_vm5, %v2161_v56  ;;  %v2162_v15 = vsel %vm2147_vm4, %v2145_v57, %v4484_v54 }
 0x1b5   : > { %v2055_v24 = vpop.permute.xlu1 %2054  ;;  %2781 = vmatprep.mubr.msk.f32.mxu1 %vm2177_vm5, %v2162_v15  ;;  %v2385_v15 = vld [vmem:[%s4560_s14 + $0x70] sm:$0xff] }
 0x1b6   : > { %v2073_v5 = vpop.permute.xlu0 %2072  ;;  %v2137_v30 = vsel %vm2130_vm3, %v4220_v28, %v2055_v24  ;;  %v2372_v28 = vld [vmem:[%s4560_s14 + $0x8] sm:$0xff] }
 0x1b7   : > { %v2146_v33 = vsel %vm2130_vm3, %v4377_v8, %v2073_v5  ;;  %v4557_v8 = vld [vmem:[%s4679_s6] ss:$0 sm:$0xff] }
 0x1b8   : > { %v2163_v53 = vsel %vm2147_vm4, %v2146_v33, %v4484_v54 }
 0x1b9   : > { %v2057_v50 = vpop.permute.xlu1 %2056  ;;  %2782 = vmatmul.mubr.msk.f32.gmra.mrb[6].mxu1 %vm2177_vm5, %v2163_v53 }
 0x1ba   : > { %v2138_v32 = vsel %vm2130_vm3, %v4291_v9, %v2057_v50  ;;  %v2106_v46 = vpop.permute.xlu0 %2105 }
 0x1bb   : > { %v2155_v27 = vsel %vm2147_vm4, %v2138_v32, %v2106_v46  ;;  %v2378_v32 = vld [vmem:[%s4560_s14 + $0x38] sm:$0xff] }
 0x1bd   : > { %v2104_v14 = vpop.permute.xlu1 %2103 }
 0x1be   : > { %v2154_v62 = vsel %vm2147_vm4, %v2137_v30, %v2104_v14  ;;  %v2377_v14 = vld [vmem:[%s4560_s14 + $0x30] sm:$0xff] }
 0x1bf   : > { %2769 = vmatprep.mubr.msk.f32.mxu0 %vm2177_vm5, %v2154_v62 }
 0x1c0   : > { %2770 = vmatmul.mubr.msk.f32.gmra.mrb[6].mxu0 %vm2177_vm5, %v2155_v27 }
 0x224   : > { %v2762_v9 = vpop.f32.mrb[0].mxu0 }
 0x225   : > { %v2298_v54 = vadd.f32 %v2762_v9, %v4557_v8  ;;  %v2292_v13 = vpop.f32.mrb[1].mxu0 }
 0x226   : > { %v2293_v2 = vadd.f32 %v4557_v8, %v2292_v13 }
 0x227   : > { %v2388_v45 = vadd.f32 %v2372_v28, %v2298_v54 }
 0x228   : > { %v2387_v4 = vadd.f32 %v2371_v23, %v2293_v2 }
 0x229   : > { %2405 = vst.msk [vmem:[%s4567_s15 + $0x8] sm:$0xff] %vm2403_vm6, %v2388_v45 }
 0x22a   : > { %2404 = vst.msk [vmem:[%s4567_s15] sm:$0xff] %vm2403_vm6, %v2387_v4 }
 0x22b   : > { %v2774_v60 = vpop.f32.mrb[0].mxu1 }
 0x22c   : > { %v2338_v1 = vadd.f32 %v2774_v60, %v4557_v8  ;;  %v2332_v7 = vpop.f32.mrb[1].mxu1 }
 0x22d   : > { %v2333_v6 = vadd.f32 %v4557_v8, %v2332_v7 }
 0x22e   : > { %v2396_v0 = vadd.f32 %v2380_v43, %v2338_v1 }
 0x22f   : > { %v2395_v26 = vadd.f32 %v2379_v63, %v2333_v6 }
 0x230   : > { %2413 = vst.msk [vmem:[%s4567_s15 + $0x48] sm:$0xff] %vm2403_vm6, %v2396_v0  ;;  %v2491_v28 = vld [vmem:[%s4567_s15 + $0x8] sm:$0xff] (%p3020_p6) }
 0x231   : > { %2412 = vst.msk [vmem:[%s4567_s15 + $0x40] sm:$0xff] %vm2403_vm6, %v2395_v26  ;;  %2492 = vst [vmem:[%s2431_s20 + $0x8] sm:$0xff] (%p3020_p6), %v2491_v28 }
 0x237   : > { %v2507_v43 = vld [vmem:[%s4567_s15 + $0x48] sm:$0xff] (%p3020_p6) }
 0x238   : > { %v2505_v60 = vld [vmem:[%s4567_s15 + $0x40] sm:$0xff] (%p3020_p6)  ;;  %2508 = vst [vmem:[%s2431_s20 + $0x88] sm:$0xff] (%p3020_p6), %v2507_v43 }
 0x239   : > { %2506 = vst [vmem:[%s2431_s20 + $0x80] sm:$0xff] (%p3020_p6), %v2505_v60 }
 0x273   : > { %v2765_v38 = vpop.f32.mrb[2].mxu0 }
 0x274   : > { %v2308_v18 = vadd.f32 %v2765_v38, %v4557_v8  ;;  %v2302_v22 = vpop.f32.mrb[3].mxu0 }
 0x275   : > { %v2303_v29 = vadd.f32 %v4557_v8, %v2302_v22 }
 0x276   : > { %v2390_v36 = vadd.f32 %v2374_v25, %v2308_v18 }
 0x277   : > { %v2389_v20 = vadd.f32 %v2373_v39, %v2303_v29 }
 0x278   : > { %2407 = vst.msk [vmem:[%s4567_s15 + $0x18] sm:$0xff] %vm2403_vm6, %v2390_v36 }
 0x279   : > { %2406 = vst.msk [vmem:[%s4567_s15 + $0x10] sm:$0xff] %vm2403_vm6, %v2389_v20 }
 0x27e   : > { %v2777_v19 = vpop.f32.mrb[2].mxu1 }
 0x27f   : > { %v2348_v3 = vadd.f32 %v2777_v19, %v4557_v8  ;;  %v2342_v16 = vpop.f32.mrb[3].mxu1  ;;  %v2495_v13 = vld [vmem:[%s4567_s15 + $0x18] sm:$0xff] (%p3020_p6) }
 0x280   : > { %v2343_v58 = vadd.f32 %v4557_v8, %v2342_v16  ;;  %v2493_v54 = vld [vmem:[%s4567_s15 + $0x10] sm:$0xff] (%p3020_p6)  ;;  %2496 = vst [vmem:[%s2431_s20 + $0x18] sm:$0xff] (%p3020_p6), %v2495_v13 }
 0x281   : > { %v2398_v61 = vadd.f32 %v2382_v10, %v2348_v3  ;;  %2494 = vst [vmem:[%s2431_s20 + $0x10] sm:$0xff] (%p3020_p6), %v2493_v54 }
 0x282   : > { %v2397_v17 = vadd.f32 %v2381_v31, %v2343_v58 }
 0x283   : > { %2415 = vst.msk [vmem:[%s4567_s15 + $0x58] sm:$0xff] %vm2403_vm6, %v2398_v61  ;;  %v2768_v40 = vpop.f32.mrb[4].mxu0 }
 0x284   : > { %2414 = vst.msk [vmem:[%s4567_s15 + $0x50] sm:$0xff] %vm2403_vm6, %v2397_v17  ;;  %v2318_v49 = vadd.f32 %v2768_v40, %v4557_v8  ;;  %v2312_v44 = vpop.f32.mrb[5].mxu0 }
 0x285   : > { %v2313_v21 = vadd.f32 %v4557_v8, %v2312_v44 }
 0x286   : > { %v2392_v52 = vadd.f32 %v2376_v37, %v2318_v49 }
 0x287   : > { %v2780_v35 = vpop.f32.mrb[4].mxu1  ;;  %v2391_v11 = vadd.f32 %v2375_v51, %v2313_v21 }
 0x288   : > { %v2358_v59 = vadd.f32 %v2780_v35, %v4557_v8  ;;  %v2352_v48 = vpop.f32.mrb[5].mxu1  ;;  %2409 = vst.msk [vmem:[%s4567_s15 + $0x28] sm:$0xff] %vm2403_vm6, %v2392_v52 }
 0x289   : > { %v2353_v41 = vadd.f32 %v4557_v8, %v2352_v48  ;;  %2408 = vst.msk [vmem:[%s4567_s15 + $0x20] sm:$0xff] %vm2403_vm6, %v2391_v11 }
 0x28a   : > { %v2400_v47 = vadd.f32 %v2384_v55, %v2358_v59  ;;  %v2511_v7 = vld [vmem:[%s4567_s15 + $0x58] sm:$0xff] (%p3020_p6) }
 0x28b   : > { %v2399_v42 = vadd.f32 %v2383_v34, %v2353_v41  ;;  %v2509_v1 = vld [vmem:[%s4567_s15 + $0x50] sm:$0xff] (%p3020_p6)  ;;  %2512 = vst [vmem:[%s2431_s20 + $0x98] sm:$0xff] (%p3020_p6), %v2511_v7 }
 0x28c   : > { %2417 = vst.msk [vmem:[%s4567_s15 + $0x68] sm:$0xff] %vm2403_vm6, %v2400_v47  ;;  %v2783_v56 = vpop.f32.mrb[6].mxu1  ;;  %2510 = vst [vmem:[%s2431_s20 + $0x90] sm:$0xff] (%p3020_p6), %v2509_v1 }
 0x28d   : > { %2416 = vst.msk [vmem:[%s4567_s15 + $0x60] sm:$0xff] %vm2403_vm6, %v2399_v42  ;;  %v2368_v24 = vadd.f32 %v2783_v56, %v4557_v8  ;;  %v2362_v57 = vpop.f32.mrb[7].mxu1 }
 0x28e   : > { %v2363_v5 = vadd.f32 %v4557_v8, %v2362_v57 }
 0x28f   : > { %v2402_v50 = vadd.f32 %v2386_v12, %v2368_v24  ;;  %v2499_v2 = vld [vmem:[%s4567_s15 + $0x28] sm:$0xff] (%p3020_p6) }
 0x290   : > { %v2401_v33 = vadd.f32 %v2385_v15, %v2363_v5  ;;  %v2497_v23 = vld [vmem:[%s4567_s15 + $0x20] sm:$0xff] (%p3020_p6)  ;;  %2500 = vst [vmem:[%s2431_s20 + $0x48] sm:$0xff] (%p3020_p6), %v2499_v2 }
 0x291   : > { %2419 = vst.msk [vmem:[%s4567_s15 + $0x78] sm:$0xff] %vm2403_vm6, %v2402_v50  ;;  %2498 = vst [vmem:[%s2431_s20 + $0x40] sm:$0xff] (%p3020_p6), %v2497_v23 }
 0x292   : > { %2418 = vst.msk [vmem:[%s4567_s15 + $0x70] sm:$0xff] %vm2403_vm6, %v2401_v33 }
 0x293   : > { %v2771_v53 = vpop.f32.mrb[6].mxu0  ;;  %2426 = sbr.rel (!%p3020_p6) target bundleno = 674 (0x2a2), region = 208  ;;  %v2515_v6 = vld [vmem:[%s4567_s15 + $0x68] sm:$0xff] (%p3020_p6) }
 0x294   : > { %v2328_v46 = vadd.f32 %v2771_v53, %v4557_v8  ;;  %v2322_v30 = vpop.f32.mrb[7].mxu0  ;;  %v2513_v63 = vld [vmem:[%s4567_s15 + $0x60] sm:$0xff] (%p3020_p6)  ;;  %2516 = vst [vmem:[%s2431_s20 + $0xc8] sm:$0xff] (%p3020_p6), %v2515_v6 }
 0x295   : > { %v2323_v27 = vadd.f32 %v4557_v8, %v2322_v30  ;;  %v2489_v8 = vld [vmem:[%s4567_s15] sm:$0xff] (%p3020_p6)  ;;  %2514 = vst [vmem:[%s2431_s20 + $0xc0] sm:$0xff] (%p3020_p6), %v2513_v63 }
 0x296   : > { %v2394_v62 = vadd.f32 %v2378_v32, %v2328_v46  ;;  %2490 = vst [vmem:[%s2431_s20] sm:$0xff] (%p3020_p6), %v2489_v8 }
 0x297   : > { %v2393_v9 = vadd.f32 %v2377_v14, %v2323_v27 }
 0x298   : > { %2411 = vst.msk [vmem:[%s4567_s15 + $0x38] sm:$0xff] %vm2403_vm6, %v2394_v62  ;;  %v2519_v26 = vld [vmem:[%s4567_s15 + $0x78] sm:$0xff] (%p3020_p6) }
 0x299   : > { %2410 = vst.msk [vmem:[%s4567_s15 + $0x30] sm:$0xff] %vm2403_vm6, %v2393_v9  ;;  %v2517_v0 = vld [vmem:[%s4567_s15 + $0x70] sm:$0xff] (%p3020_p6)  ;;  %2520 = vst [vmem:[%s2431_s20 + $0xd8] sm:$0xff] (%p3020_p6), %v2519_v26 }
 0x29a   : > { %2518 = vst [vmem:[%s2431_s20 + $0xd0] sm:$0xff] %v2517_v0 }
 0x29f   : > { %v2503_v4 = vld [vmem:[%s4567_s15 + $0x38] sm:$0xff] }
 0x2a0   : > { %v2501_v45 = vld [vmem:[%s4567_s15 + $0x30] sm:$0xff]  ;;  %2504 = vst [vmem:[%s2431_s20 + $0x58] sm:$0xff] %v2503_v4 }
 0x2a1   : > { %2502 = vst [vmem:[%s2431_s20 + $0x50] sm:$0xff] %v2501_v45 }
 0x2a2 PF: > { %s18_s11 = sadd.s32 1, %s2917_s11   ;;  %s5080_s27 = smov %s2897_s28 }
 0x2a3   : > { %p15_p13 = scmp.ge.s32.totalorder %s18_s11, 6   ;;  %s5081_s28 = smov %s3028_s21 }
 0x2a4   : > { %s5082_s29 = smov %s2909_s9  ;;  %s5083_s30 = smov %s2913_s10 }
 0x2a5   : > { %s5084_s9 = smov %s5087_s12  ;;  %s5085_s10 = smov %s5091_s13 }
 0x2a6   :  { %17 = sbr.rel (!%p15_p13) target bundleno = 6 (0x6), region = 304 }

</bundles_post_ra>
